<compile_context>
chip_gen: v7x
topology: tpu7x:2x2x1
jax: 0.10.0
libtpu: 0.0.40
codegen_flags: <defaults>
</compile_context>

<pallas_src>
import jax
import jax.numpy as jnp
from jax.experimental import pallas as pl
from jax.experimental.pallas import tpu as pltpu

K_NEIGHBORS = 3
EPS = 1e-16  # matches torch_geometric knn_interpolate clamp(min=1e-16)


def _round_up(x, m):
    return (x + m - 1) // m * m


def _knn_interp_kernel(fineT_ref, nodes_ref, aoa_ref, mach_ref, out_ref):
    b = pl.program_id(0)
    a = aoa_ref[b]                  # per-batch scalars read from SMEM
    m = mach_ref[b]

    fineT = fineT_ref[...]          # (2, TF)   lane axis = fine nodes
    nodes = nodes_ref[...]          # (Nc, 2)   sublane axis = coarse nodes

    nc = nodes.shape[0]
    tf = fineT.shape[1]

    fx = fineT[0:1, :]              # (1, TF)
    fy = fineT[1:2, :]              # (1, TF)
    cx = nodes[:, 0:1]              # (Nc, 1)
    cyc = nodes[:, 1:2]             # (Nc, 1)

    dx = cx - fx                    # (Nc, TF)
    dy = cyc - fy
    d2 = dx * dx + dy * dy          # squared distances, coarse nodes on sublanes

    # Synthetic per-coarse-node solver fields, computed in-kernel (fused prep).
    # TODO(synk): SU2Module CFD solve, write_mesh_file and process_sim have no
    # Pallas equivalent; these sin/cos fields are a deterministic stand-in for
    # the 3-field solver output (in a real deployment a small (B, C, Nc) input
    # with a constant index_map would replace them).
    g0 = jnp.sin(cx * a) + m        # (Nc, 1)
    g1 = jnp.cos(cyc * a) * m       # (Nc, 1)
    g2 = cx * cyc + a               # (Nc, 1)

    row_idx = jax.lax.broadcasted_iota(jnp.int32, (nc, tf), 0)

    # k=3 iterative nearest-neighbour selection (min -> mask -> repeat).
    # Accumulate a single weight matrix W instead of a gather-matmul per step.
    W = jnp.zeros((nc, tf), jnp.float32)
    d = d2
    for _ in range(K_NEIGHBORS):
        dmin = jnp.min(d, axis=0, keepdims=True)                       # (1, TF)
        amin = jnp.min(jnp.where(d == dmin, row_idx, nc), axis=0,
                       keepdims=True)                                  # first argmin
        sel = row_idx == amin                                          # (Nc, TF)
        w = 1.0 / jnp.maximum(dmin, EPS)                               # (1, TF)
        W = W + jnp.where(sel, w, 0.0)
        d = jnp.where(sel, jnp.inf, d)

    # Single post-loop weighted combine (3 VPU mults + sublane reductions).
    wsum = jnp.sum(W, axis=0, keepdims=True)                           # (1, TF)
    acc0 = jnp.sum(g0 * W, axis=0, keepdims=True)                      # (1, TF)
    acc1 = jnp.sum(g1 * W, axis=0, keepdims=True)
    acc2 = jnp.sum(g2 * W, axis=0, keepdims=True)
    out_ref[...] = jnp.concatenate([acc0, acc1, acc2], axis=0) / wsum  # (3, TF)


def knn_interpolate_pallas(fine_pos, nodes, aoa, mach, *, tile_f=512):
    """k=3 inverse-distance^2 interpolation of the synthetic coarse fields.

    fine_pos: (B, Nf, 2), nodes: (Nc, 2), aoa/mach: (B,).  Returns (B, Nf, 3).
    """
    B, Nf, _ = fine_pos.shape
    Nc = nodes.shape[0]
    C = 3

    # Lane tile over the fine axis: multiple of 128, capped so tiny meshes use
    # a single tile.  (Nc, TF) f32 temporaries stay well under the v7x 64 MiB
    # VMEM budget even at TF=2048.
    tf = min(tile_f, _round_up(Nf, 128))
    nf_pad = _round_up(Nf, tf)

    fine_posT = jnp.transpose(fine_pos, (0, 2, 1))              # (B, 2, Nf)
    if nf_pad != Nf:
        fine_posT = jnp.pad(fine_posT, ((0, 0), (0, 0), (0, nf_pad - Nf)))

    outT = pl.pallas_call(
        _knn_interp_kernel,
        out_shape=jax.ShapeDtypeStruct((B, C, nf_pad), jnp.float32),
        grid_spec=pltpu.PrefetchScalarGridSpec(
            num_scalar_prefetch=0,
            grid=(B, nf_pad // tf),
            in_specs=[
                pl.BlockSpec((None, 2, tf), lambda b, j: (b, 0, j)),
                pl.BlockSpec((Nc, 2), lambda b, j: (0, 0)),
                pl.BlockSpec(memory_space=pltpu.MemorySpace.SMEM),
                pl.BlockSpec(memory_space=pltpu.MemorySpace.SMEM),
            ],
            out_specs=pl.BlockSpec((None, C, tf), lambda b, j: (b, 0, j)),
        ),
        compiler_params=pltpu.CompilerParams(
            dimension_semantics=("parallel", "parallel")),
    )(fine_posT, nodes, aoa, mach)

    outT = outT[:, :, :Nf]                       # drop lane padding
    return jnp.transpose(outT, (0, 2, 1))        # back to (B, Nf, C) torch layout


class UCMPallas:
    """UCM: upsample the coarse simulation onto the fine mesh (no GCNs)."""

    def __init__(self, key, num_coarse_nodes=64):
        # self.nodes is UCM's only learnable parameter (coarse mesh coords).
        self.nodes = jax.random.uniform(key, (num_coarse_nodes, 2),
                                        dtype=jnp.float32)

    def __call__(self, fine_pos, aoa, mach_or_reynolds):
        # TODO(synk): SU2Module CFD solve, write_mesh_file and process_sim have
        # no Pallas equivalent; the kernel fuses a deterministic synthetic
        # stand-in for the 3 solver output fields.
        fine_y = knn_interpolate_pallas(fine_pos, self.nodes,
                                        aoa.astype(jnp.float32),
                                        mach_or_reynolds.astype(jnp.float32))
        return fine_y.reshape(-1, fine_y.shape[-1])              # (B*Nf, 3)


def _knn_interp_ref(fine_pos, coarse_pos, coarse_y, k=K_NEIGHBORS):
    """Pure-JAX reference of torch_geometric.knn_interpolate (per-batch)."""
    d2 = jnp.sum((fine_pos[:, :, None, :] - coarse_pos[:, None, :, :]) ** 2,
                 axis=-1)                                  # (B, Nf, Nc)
    vals, idx = jax.lax.top_k(-d2, k)
    d_sel = -vals                                          # (B, Nf, k)
    w = 1.0 / jnp.maximum(d_sel, EPS)
    y_sel = jnp.take_along_axis(coarse_y[:, None, :, :], idx[..., None], axis=2)
    return jnp.sum(w[..., None] * y_sel, axis=2) / jnp.sum(w, axis=2, keepdims=True)


if __name__ == "__main__":
    key = jax.random.PRNGKey(0)
    k_nodes, k_fine, k_aoa, k_mach = jax.random.split(key, 4)

    B = 2          # batch size
    Nc = 64        # coarse mesh nodes (sublane axis, multiple of 8)
    Nf = 1000      # fine mesh nodes per batch element (exercises lane padding)
    C = 3          # output fields

    model = UCMPallas(k_nodes, num_coarse_nodes=Nc)

    fine_pos = jax.random.uniform(k_fine, (B, Nf, 2), dtype=jnp.float32)
    aoa = jax.random.uniform(k_aoa, (B,), dtype=jnp.float32) * 10.0
    mach = jax.random.uniform(k_mach, (B,), dtype=jnp.float32)

    fine_y = jax.block_until_ready(model(fine_pos, aoa, mach))
    assert fine_y.shape == (B * Nf, C)

    # cross-check kernel against a pure-JAX knn_interpolate reference
    batch_x = jnp.broadcast_to(model.nodes[None], (B, Nc, 2))
    px, py = batch_x[..., 0], batch_x[..., 1]
    a, m = aoa[:, None], mach[:, None]
    coarse_y = jnp.stack([jnp.sin(px * a) + m,
                          jnp.cos(py * a) * m,
                          px * py + a], axis=-1).astype(jnp.float32)
    ref = _knn_interp_ref(fine_pos, batch_x, coarse_y).reshape(-1, C)
    assert jnp.allclose(fine_y, ref, rtol=1e-5, atol=1e-5)

    print("KERNEL_OK")
</pallas_src>

<mosaic_0001>
module attributes {stable_mosaic.version = 11 : i64} {
  func.func @_knn_interp_kernel(%arg0: i32, %arg1: i32, %arg2: memref<1x2x512xf32, #tpu.memory_space<vmem>>, %arg3: memref<64x2xf32, #tpu.memory_space<vmem>>, %arg4: memref<2xf32, #tpu.memory_space<smem>>, %arg5: memref<2xf32, #tpu.memory_space<smem>>, %arg6: memref<1x3x512xf32, #tpu.memory_space<vmem>>) attributes {dimension_semantics = [#tpu.dimension_semantics<parallel>, #tpu.dimension_semantics<parallel>], iteration_bounds = array<i64: 2, 2>, scalar_prefetch = 0 : i64, scratch_operands = 0 : i64, tpu.core_type = #tpu.core_type<tc>, window_params = [{transform_indices = @transform_0, window_bounds = array<i64: 1, 2, 512>}, {pipeline_mode = #tpu.pipeline_mode<synchronous>, transform_indices = @transform_1, window_bounds = array<i64: 64, 2>}, {transform_indices = @transform_2, window_bounds = array<i64: 2>}, {transform_indices = @transform_3, window_bounds = array<i64: 2>}, {transform_indices = @transform_4, window_bounds = array<i64: 1, 3, 512>}]} {
    %0 = arith.index_cast %arg0 : i32 to index
    %1 = memref.load %arg4[%0] : memref<2xf32, #tpu.memory_space<smem>>
    %2 = arith.index_cast %arg0 : i32 to index
    %3 = memref.load %arg5[%2] : memref<2xf32, #tpu.memory_space<smem>>
    %c0 = arith.constant 0 : index
    %c0_0 = arith.constant 0 : index
    %c0_1 = arith.constant 0 : index
    %4 = vector.load %arg2[%c0, %c0_0, %c0_1] : memref<1x2x512xf32, #tpu.memory_space<vmem>>, vector<1x2x512xf32>
    %5 = vector.shape_cast %4 : vector<1x2x512xf32> to vector<2x512xf32>
    %c0_2 = arith.constant 0 : index
    %c0_3 = arith.constant 0 : index
    %6 = vector.load %arg3[%c0_2, %c0_3] : memref<64x2xf32, #tpu.memory_space<vmem>>, vector<64x2xf32>
    %7 = vector.extract_strided_slice %5 {offsets = [0, 0], sizes = [1, 512], strides = [1, 1]} : vector<2x512xf32> to vector<1x512xf32>
    %8 = vector.extract_strided_slice %5 {offsets = [1, 0], sizes = [1, 512], strides = [1, 1]} : vector<2x512xf32> to vector<1x512xf32>
    %9 = vector.extract_strided_slice %6 {offsets = [0, 0], sizes = [64, 1], strides = [1, 1]} : vector<64x2xf32> to vector<64x1xf32>
    %10 = vector.extract_strided_slice %6 {offsets = [0, 1], sizes = [64, 1], strides = [1, 1]} : vector<64x2xf32> to vector<64x1xf32>
    %11 = vector.broadcast %9 : vector<64x1xf32> to vector<64x512xf32>
    %12 = vector.broadcast %7 : vector<1x512xf32> to vector<64x512xf32>
    %13 = arith.subf %11, %12 : vector<64x512xf32>
    %14 = vector.broadcast %10 : vector<64x1xf32> to vector<64x512xf32>
    %15 = vector.broadcast %8 : vector<1x512xf32> to vector<64x512xf32>
    %16 = arith.subf %14, %15 : vector<64x512xf32>
    %17 = arith.mulf %13, %13 : vector<64x512xf32>
    %18 = arith.mulf %16, %16 : vector<64x512xf32>
    %19 = arith.addf %17, %18 : vector<64x512xf32>
    %20 = vector.broadcast %1 : f32 to vector<64x1xf32>
    %21 = arith.mulf %9, %20 : vector<64x1xf32>
    %22 = math.sin %21 : vector<64x1xf32>
    %23 = vector.broadcast %3 : f32 to vector<64x1xf32>
    %24 = arith.addf %22, %23 : vector<64x1xf32>
    %25 = vector.broadcast %1 : f32 to vector<64x1xf32>
    %26 = arith.mulf %10, %25 : vector<64x1xf32>
    %27 = math.cos %26 : vector<64x1xf32>
    %28 = vector.broadcast %3 : f32 to vector<64x1xf32>
    %29 = arith.mulf %27, %28 : vector<64x1xf32>
    %30 = arith.mulf %9, %10 : vector<64x1xf32>
    %31 = vector.broadcast %1 : f32 to vector<64x1xf32>
    %32 = arith.addf %30, %31 : vector<64x1xf32>
    %33 = tpu.iota {dimensions = array<i32: 0>} : vector<64x512xi32>
    %cst = arith.constant 0.000000e+00 : f32
    %34 = vector.broadcast %cst : f32 to vector<64x512xf32>
    %cst_4 = arith.constant dense<0x7F800000> : vector<512xf32>
    %35 = vector.multi_reduction <minimumf>, %19, %cst_4 [0] : vector<64x512xf32> to vector<512xf32>
    %36 = vector.shape_cast %35 : vector<512xf32> to vector<1x512xf32>
    %37 = vector.broadcast %36 : vector<1x512xf32> to vector<64x512xf32>
    %38 = arith.cmpf oeq, %19, %37 : vector<64x512xf32>
    %c64_i32 = arith.constant 64 : i32
    %39 = vector.broadcast %c64_i32 : i32 to vector<64x512xi32>
    %40 = arith.select %38, %33, %39 : vector<64x512xi1>, vector<64x512xi32>
    %cst_5 = arith.constant dense<2147483647> : vector<512xi32>
    %41 = vector.multi_reduction <minsi>, %40, %cst_5 [0] : vector<64x512xi32> to vector<512xi32>
    %42 = vector.shape_cast %41 : vector<512xi32> to vector<1x512xi32>
    %43 = vector.broadcast %42 : vector<1x512xi32> to vector<64x512xi32>
    %44 = arith.cmpi eq, %33, %43 : vector<64x512xi32>
    %cst_6 = arith.constant 1.000000e-16 : f32
    %45 = vector.broadcast %cst_6 : f32 to vector<1x512xf32>
    %46 = arith.maximumf %36, %45 : vector<1x512xf32>
    %cst_7 = arith.constant 1.000000e+00 : f32
    %47 = vector.broadcast %cst_7 : f32 to vector<1x512xf32>
    %48 = arith.divf %47, %46 : vector<1x512xf32>
    %cst_8 = arith.constant 0.000000e+00 : f32
    %49 = vector.shape_cast %48 : vector<1x512xf32> to vector<1x512xf32>
    %50 = vector.broadcast %49 : vector<1x512xf32> to vector<64x512xf32>
    %51 = vector.broadcast %cst_8 : f32 to vector<64x512xf32>
    %52 = arith.select %44, %50, %51 : vector<64x512xi1>, vector<64x512xf32>
    %53 = arith.addf %34, %52 : vector<64x512xf32>
    %cst_9 = arith.constant 0x7F800000 : f32
    %54 = vector.broadcast %cst_9 : f32 to vector<64x512xf32>
    %55 = arith.select %44, %54, %19 : vector<64x512xi1>, vector<64x512xf32>
    %cst_10 = arith.constant dense<0x7F800000> : vector<512xf32>
    %56 = vector.multi_reduction <minimumf>, %55, %cst_10 [0] : vector<64x512xf32> to vector<512xf32>
    %57 = vector.shape_cast %56 : vector<512xf32> to vector<1x512xf32>
    %58 = vector.broadcast %57 : vector<1x512xf32> to vector<64x512xf32>
    %59 = arith.cmpf oeq, %55, %58 : vector<64x512xf32>
    %c64_i32_11 = arith.constant 64 : i32
    %60 = vector.broadcast %c64_i32_11 : i32 to vector<64x512xi32>
    %61 = arith.select %59, %33, %60 : vector<64x512xi1>, vector<64x512xi32>
    %cst_12 = arith.constant dense<2147483647> : vector<512xi32>
    %62 = vector.multi_reduction <minsi>, %61, %cst_12 [0] : vector<64x512xi32> to vector<512xi32>
    %63 = vector.shape_cast %62 : vector<512xi32> to vector<1x512xi32>
    %64 = vector.broadcast %63 : vector<1x512xi32> to vector<64x512xi32>
    %65 = arith.cmpi eq, %33, %64 : vector<64x512xi32>
    %cst_13 = arith.constant 1.000000e-16 : f32
    %66 = vector.broadcast %cst_13 : f32 to vector<1x512xf32>
    %67 = arith.maximumf %57, %66 : vector<1x512xf32>
    %cst_14 = arith.constant 1.000000e+00 : f32
    %68 = vector.broadcast %cst_14 : f32 to vector<1x512xf32>
    %69 = arith.divf %68, %67 : vector<1x512xf32>
    %cst_15 = arith.constant 0.000000e+00 : f32
    %70 = vector.shape_cast %69 : vector<1x512xf32> to vector<1x512xf32>
    %71 = vector.broadcast %70 : vector<1x512xf32> to vector<64x512xf32>
    %72 = vector.broadcast %cst_15 : f32 to vector<64x512xf32>
    %73 = arith.select %65, %71, %72 : vector<64x512xi1>, vector<64x512xf32>
    %74 = arith.addf %53, %73 : vector<64x512xf32>
    %cst_16 = arith.constant 0x7F800000 : f32
    %75 = vector.broadcast %cst_16 : f32 to vector<64x512xf32>
    %76 = arith.select %65, %75, %55 : vector<64x512xi1>, vector<64x512xf32>
    %cst_17 = arith.constant dense<0x7F800000> : vector<512xf32>
    %77 = vector.multi_reduction <minimumf>, %76, %cst_17 [0] : vector<64x512xf32> to vector<512xf32>
    %78 = vector.shape_cast %77 : vector<512xf32> to vector<1x512xf32>
    %79 = vector.broadcast %78 : vector<1x512xf32> to vector<64x512xf32>
    %80 = arith.cmpf oeq, %76, %79 : vector<64x512xf32>
    %c64_i32_18 = arith.constant 64 : i32
    %81 = vector.broadcast %c64_i32_18 : i32 to vector<64x512xi32>
    %82 = arith.select %80, %33, %81 : vector<64x512xi1>, vector<64x512xi32>
    %cst_19 = arith.constant dense<2147483647> : vector<512xi32>
    %83 = vector.multi_reduction <minsi>, %82, %cst_19 [0] : vector<64x512xi32> to vector<512xi32>
    %84 = vector.shape_cast %83 : vector<512xi32> to vector<1x512xi32>
    %85 = vector.broadcast %84 : vector<1x512xi32> to vector<64x512xi32>
    %86 = arith.cmpi eq, %33, %85 : vector<64x512xi32>
    %cst_20 = arith.constant 1.000000e-16 : f32
    %87 = vector.broadcast %cst_20 : f32 to vector<1x512xf32>
    %88 = arith.maximumf %78, %87 : vector<1x512xf32>
    %cst_21 = arith.constant 1.000000e+00 : f32
    %89 = vector.broadcast %cst_21 : f32 to vector<1x512xf32>
    %90 = arith.divf %89, %88 : vector<1x512xf32>
    %cst_22 = arith.constant 0.000000e+00 : f32
    %91 = vector.shape_cast %90 : vector<1x512xf32> to vector<1x512xf32>
    %92 = vector.broadcast %91 : vector<1x512xf32> to vector<64x512xf32>
    %93 = vector.broadcast %cst_22 : f32 to vector<64x512xf32>
    %94 = arith.select %86, %92, %93 : vector<64x512xi1>, vector<64x512xf32>
    %95 = arith.addf %74, %94 : vector<64x512xf32>
    %cst_23 = arith.constant dense<0.000000e+00> : vector<512xf32>
    %96 = vector.multi_reduction <add>, %95, %cst_23 [0] : vector<64x512xf32> to vector<512xf32>
    %97 = vector.shape_cast %96 : vector<512xf32> to vector<1x512xf32>
    %98 = vector.broadcast %24 : vector<64x1xf32> to vector<64x512xf32>
    %99 = arith.mulf %98, %95 : vector<64x512xf32>
    %cst_24 = arith.constant dense<0.000000e+00> : vector<512xf32>
    %100 = vector.multi_reduction <add>, %99, %cst_24 [0] : vector<64x512xf32> to vector<512xf32>
    %101 = vector.shape_cast %100 : vector<512xf32> to vector<1x512xf32>
    %102 = vector.broadcast %29 : vector<64x1xf32> to vector<64x512xf32>
    %103 = arith.mulf %102, %95 : vector<64x512xf32>
    %cst_25 = arith.constant dense<0.000000e+00> : vector<512xf32>
    %104 = vector.multi_reduction <add>, %103, %cst_25 [0] : vector<64x512xf32> to vector<512xf32>
    %105 = vector.shape_cast %104 : vector<512xf32> to vector<1x512xf32>
    %106 = vector.broadcast %32 : vector<64x1xf32> to vector<64x512xf32>
    %107 = arith.mulf %106, %95 : vector<64x512xf32>
    %cst_26 = arith.constant dense<0.000000e+00> : vector<512xf32>
    %108 = vector.multi_reduction <add>, %107, %cst_26 [0] : vector<64x512xf32> to vector<512xf32>
    %109 = vector.shape_cast %108 : vector<512xf32> to vector<1x512xf32>
    %110 = tpu.concatenate %101, %105, %109 in 0 : vector<1x512xf32>, vector<1x512xf32>, vector<1x512xf32> -> vector<3x512xf32>
    %111 = vector.broadcast %97 : vector<1x512xf32> to vector<3x512xf32>
    %112 = arith.divf %110, %111 : vector<3x512xf32>
    %c0_27 = arith.constant 0 : index
    %c0_28 = arith.constant 0 : index
    %c0_29 = arith.constant 0 : index
    %113 = vector.load %arg6[%c0_27, %c0_28, %c0_29] : memref<1x3x512xf32, #tpu.memory_space<vmem>>, vector<1x3x512xf32>
    %114 = vector.shape_cast %113 : vector<1x3x512xf32> to vector<3x512xf32>
    %115 = vector.shape_cast %112 : vector<3x512xf32> to vector<1x3x512xf32>
    tpu.vector_store %arg6[%c0_27, %c0_28, %c0_29], %115 {strides = array<i32>} : memref<1x3x512xf32, #tpu.memory_space<vmem>>, vector<1x3x512xf32>,
    return
  }
  func.func @transform_0(%arg0: i32, %arg1: i32) -> (i32, i32, i32) {
    %c0_i32 = arith.constant 0 : i32
    %c0_i32_0 = arith.constant 0 : i32
    return %arg0, %c0_i32, %arg1 : i32, i32, i32
  }
  func.func @transform_1(%arg0: i32, %arg1: i32) -> (i32, i32) {
    %c0_i32 = arith.constant 0 : i32
    %c0_i32_0 = arith.constant 0 : i32
    %c0_i32_1 = arith.constant 0 : i32
    return %c0_i32, %c0_i32_0 : i32, i32
  }
  func.func @transform_2(%arg0: i32, %arg1: i32) -> i32 {
    %c0_i32 = arith.constant 0 : i32
    %c0_i32_0 = arith.constant 0 : i32
    return %c0_i32 : i32
  }
  func.func @transform_3(%arg0: i32, %arg1: i32) -> i32 {
    %c0_i32 = arith.constant 0 : i32
    %c0_i32_0 = arith.constant 0 : i32
    return %c0_i32 : i32
  }
  func.func @transform_4(%arg0: i32, %arg1: i32) -> (i32, i32, i32) {
    %c0_i32 = arith.constant 0 : i32
    %c0_i32_0 = arith.constant 0 : i32
    return %arg0, %c0_i32, %arg1 : i32, i32, i32
  }
}

</mosaic_0001>

<bundles_post_ra>
// kernel: tpu_custom_call.1
= control target key start
LH: loop header
LB: loop body
LE: loop exit
PB: predicated region body
PF: predicated region fallthrough
CT: control target
= control target key end

     0   :  { %9 = vsyncpa [#allocation3], 0  ;;  %s7888_s0 = inlined_call_operand.vmem [shape: f32[2,2,1024], index: 0, kind: input, shape index: {}]   ;;  %s7889_s1 = inlined_call_operand.vmem [shape: f32[64,2], index: 1, kind: input, shape index: {}]   ;;  %s7890_s2 = inlined_call_operand.vmem [shape: f32[2], index: 2, kind: input, shape index: {}]   ;;  %s7891_s3 = inlined_call_operand.vmem [shape: f32[2], index: 3, kind: input, shape index: {}]   ;;  %s7892_s4 = inlined_call_operand.vmem [shape: f32[2,3,1024], index: 4, kind: output, shape index: {}]  }
   0x1   :  { %10 = vsyncpa [#allocation5], 0  ;;  %s4269_s15 = smov 0   ;;  %s4271_s16 = smov 0  }
   0x2   :  { %s4273_s17 = smov 0   ;;  %s4275_s18 = smov 0  }
   0x3   :  { %s4277_s19 = smov 0  }
   0x4 LB: > { %s3887_s20 = sadd.s32 4294967295, %s4231_s19   ;;  %s25_s21 = sadd.s32 1, %s4223_s17  ;;  %s4231_s19 = sphi %s4277_s19, %s16_s19   ;;  %s4227_s18 = sphi %s4275_s18, %s8693_s18   ;;  %s4223_s17 = sphi %s4273_s17, %s8692_s17   ;;  %s4219_s16 = sphi %s4271_s16, %s8691_s16   ;;  %s4215_s15 = sphi %s4269_s15, %s8690_s15  }
   0x5   : > { %p26_p0 = scmp.ge.s32.totalorder %s25_s21, 2  ;;  %s28_s22 = sadd.s32 1, %s4227_s18 }
   0x6   : > { %p3889_p1 = scmp.ge.s32.totalorder %s4231_s19, 1  ;;  %p152_p2 = scmp.lt.s32.totalorder %s4231_s19, 5 }
   0x7   : > { %s8695_s21 = smov (%p26_p0, %s25_s21), 0  ;;  %s8697_s22 = smov (!%p26_p0, %s28_s22), %s4227_s18 }
   0x8   : > { %p4302_p3 = pnand %p3889_p1, %p152_p2  ;;  %p30_p4 = scmp.ge.s32.totalorder %s8697_s22, 2 }
   0x9   : > { %p4306_p5 = scmp.eq.s32.totalorder %s3887_s20, 0  ;;  %s168_s27 = sshll.u32 %s7890_s2, 4  ;;  %s169_s27 = int_to_ptr.vmem [resolvable:$true] %s168_s27 }
   0xa   : > { %s8173_s23 = scalar_select %p4302_p3, 1, 0 }
   0xb   : > { %s8174_s24 = scalar_select %p4306_p5, 1, 0 }
   0xc   : > { %p4008_p6 = pneg %p4302_p3  ;;  %s8699_s22 = smov (%p30_p4, %s8697_s22), 0 }
   0xd   : > { %s179_s5 = sshll.u32 %s7891_s3, 4  ;;  %s4155_s6 = scalar_lea.vmem %s169_s27, 16  ;;  %s180_s5 = int_to_ptr.vmem [resolvable:$true] %s179_s5 }
   0xe   : > { %p4319_p7 = pnand %p4306_p5, %p4008_p6  ;;  %p4156_p8 = scmp.ne.s32.totalorder %s169_s27, %s4155_s6 }
   0xf   : > { %p4163_p12 = scmp.lt.s32.totalorder %s169_s27, %s169_s27  ;;  %p4164_p13 = scmp.lt.s32.totalorder %s4155_s6, %s4155_s6 }
  0x10   : > { %p4157_p9 = pneg %p4319_p7 }
  0x11   : > { %p4165_p0 = por %p4164_p13, %p4163_p12 }
  0x12   : > { %p4158_p10 = pnand %p4157_p9, %p4156_p8 }
  0x14   : > { %p4159_p11 = pneg %p4158_p10 }
  0x16   : > { %p4166_p1 = pnand %p4165_p0, %p4159_p11 }
  0x18   : > { %4169 = shalt.err (!%p4166_p1)
}
  0x19   : > { %s4233_s7 = smov [#allocation2]   ;;  %s4170_s8 = scalar_lea.vmem %s180_s5, 16 }
  0x1a   : > { %4011 = dma.vmem_to_smem (!%p4319_p7), %s169_s27, 16, %s4233_s7, [#allocation3]  }
  0x1b   : > { %p4171_p2 = scmp.ne.s32.totalorder %s180_s5, %s4170_s8  ;;  %p4178_p5 = scmp.lt.s32.totalorder %s180_s5, %s180_s5 }
  0x1c   : > { %p4179_p3 = scmp.lt.s32.totalorder %s4170_s8, %s4170_s8 }
  0x1d   : > { %p4173_p4 = pnand %p4171_p2, %p4157_p9 }
  0x1e   : > { %p4180_p8 = por %p4179_p3, %p4178_p5 }
  0x1f   : > { %p4174_p6 = pneg %p4173_p4 }
  0x21   : > { %p4181_p10 = pnand %p4180_p8, %p4174_p6 }
  0x23   : > { %4184 = shalt.err (!%p4181_p10)
}
  0x24   : > { %s4234_s9 = smov [#allocation4]   ;;  %p8176_p11 = scmp.ne.s32.totalorder %s8173_s23, 0 }
  0x25   : > { %4014 = dma.vmem_to_smem (!%p4319_p7), %s180_s5, 16, %s4234_s9, [#allocation5]  }
  0x26   : > { %205 = sbr.rel (%p8176_p11) target bundleno = 753 (0x2f1), region = 36 }
  0x2d   : > { %p8177_p12 = scmp.ne.s32.totalorder %s8174_s24, 0 }
  0x2f   : > { %4206 = dma.done.wait (%p8177_p12), [#allocation3], 16  }
  0x30   : > { %4208 = vsyncadd (%p8177_p12), [#allocation3], 4294967280 }
  0x31   : > { %4210 = dma.done.wait (%p8177_p12), [#allocation5], 16  }
  0x32   : > { %4212 = vsyncadd (%p8177_p12), [#allocation5], 4294967280 }
  0x33   : > { %215 = sfence }
  0x34   : > { %v4345_v0 = vld [vmem:[%s7889_s1] sm:$0xff]  ;;  %s264_s12 = sld [smem:[#allocation2 + %s4219_s16]]  ;;  %v7898_v1 = vmov 1   ;;  %v7896_v2 = vmov 0   ;;  %v4355_v3 = vld [vmem:[%s7889_s1 + $0x8] sm:$0xff]  ;;  %v4372_v7 = vld [vmem:[%s7889_s1 + $0x10] sm:$0xff]  ;;  %v316_v39 = vlaneseq }
  0x35   : > { %4071 = vset.pattern.permute.xlu1 %v7898_v1  ;;  %4070 = vset.pattern.permute.xlu0 %v7896_v2  ;;  %v4382_v10 = vld [vmem:[%s7889_s1 + $0x18] sm:$0xff]  ;;  %v4393_v12 = vld [vmem:[%s7889_s1 + $0x20] sm:$0xff]  ;;  %v4404_v17 = vld [vmem:[%s7889_s1 + $0x28] sm:$0xff]  ;;  %v7910_v56 = vmov 683565275   ;;  %s4243_s8 = smov 127  }
  0x36   : > { %385 = vperm.xlu1 %4071, %v4345_v0   ;;  %277 = vperm.xlu0 %4070, %v4345_v0   ;;  %v4413_v20 = vld [vmem:[%s7889_s1 + $0x30] sm:$0xff]  ;;  %v4418_v21 = vld [vmem:[%s7889_s1 + $0x38] sm:$0xff]  ;;  %v4440_v49 = vshrl.u32 %v316_v39, 7  ;;  %v7903_v59 = vmov 2475754826   ;;  %s3896_s9 = sshll.u32 %s4215_s15, 2 }
  0x37   : > { %v7901_v63 = vmov 2131351028   ;;  %p245_p3 = scmp.lt.s32.totalorder %s4219_s16, 1  ;;  %p4515_p5 = scmp.lt.s32.totalorder %s3896_s9, 7 }
  0x38   : > { %8185 = vst [vmem:[#allocation15_spill] sm:$0xff] %v4440_v49  ;;  %s4595_s14 = sld [smem:[#allocation4 + %s4219_s16]] }
  0x39   : > { %s4526_s11 = scalar_select %p245_p3, %s4219_s16, 1 }
  0x3a   : > { %v4357_v4 = vstv %s264_s12  ;;  %389 = vperm.xlu1 %4071, %v4355_v3   ;;  %282 = vperm.xlu0 %4070, %v4355_v3   ;;  %s8701_s9 = smov (!%p4515_p5, %s3896_s9), 7 }
  0x3b   : > { %8178 = vst [vmem:[#allocation8_spill] sm:$0xff] %v4357_v4  ;;  %v4363_v5 = vmul.f32 %v4357_v4, %v4345_v0  ;;  %v4367_v6 = vmul.f32 %v4357_v4, %v4355_v3  ;;  %v4376_v8 = vmul.f32 %v4357_v4, %v4372_v7  ;;  %v4388_v11 = vmul.f32 %v4357_v4, %v4382_v10  ;;  %s3897_s12 = sshll.u32 %s4526_s11, 3 }
  0x3c   : > { %v4398_v15 = vmul.f32 %v4357_v4, %v4393_v12  ;;  %v4408_v19 = vmul.f32 %v4357_v4, %v4404_v17  ;;  %v4425_v23 = vmul.f32 %v4357_v4, %v4413_v20  ;;  %v4429_v24 = vmul.f32 %v4357_v4, %v4418_v21  ;;  %s4578_s15 = sadd.s32 %s3897_s12, %s8701_s9 }
  0x3d   : > { %8179 = vst [vmem:[#allocation9_spill] sm:$0xff] %v4363_v5  ;;  %v592_v9 = vand.u32 2139095040, %v4363_v5  ;;  %8180 = vst [vmem:[#allocation10_spill] sm:$0xff] %v4388_v11  ;;  %v696_v14 = vand.u32 2139095040, %v4367_v6  ;;  %v800_v16 = vand.u32 2139095040, %v4376_v8  ;;  %v904_v22 = vand.u32 2139095040, %v4388_v11 }
  0x3e   : > { %393 = vperm.xlu1 %4071, %v4372_v7   ;;  %287 = vperm.xlu0 %4070, %v4372_v7   ;;  %8181 = vst [vmem:[#allocation11_spill] sm:$0xff] %v4398_v15  ;;  %8182 = vst [vmem:[#allocation12_spill] sm:$0xff] %v4408_v19  ;;  %v1008_v27 = vand.u32 2139095040, %v4398_v15  ;;  %v1112_v29 = vand.u32 2139095040, %v4408_v19  ;;  %v1216_v32 = vand.u32 2139095040, %v4425_v23  ;;  %v1320_v33 = vand.u32 2139095040, %v4429_v24 }
  0x3f   : > { %v593_v13 = vshrl.u32 %v592_v9, 23  ;;  %8183 = vst [vmem:[#allocation13_spill] sm:$0xff] %v4425_v23  ;;  %8184 = vst [vmem:[#allocation14_spill] sm:$0xff] %v4429_v24  ;;  %v697_v26 = vshrl.u32 %v696_v14, 23  ;;  %v801_v28 = vshrl.u32 %v800_v16, 23  ;;  %v905_v31 = vshrl.u32 %v904_v22, 23 }
  0x40   : > { %v1009_v35 = vshrl.u32 %v1008_v27, 23  ;;  %v1113_v38 = vshrl.u32 %v1112_v29, 23  ;;  %v1217_v41 = vshrl.u32 %v1216_v32, 23  ;;  %v1321_v42 = vshrl.u32 %v1320_v33, 23  ;;  %s3898_s13 = sshll.u32 %s4578_s15, 1 }
  0x41   : > { %v3902_v18 = vadd.s32 4294967169, %v593_v13  ;;  %v3906_v34 = vadd.s32 4294967169, %v697_v26  ;;  %v3910_v37 = vadd.s32 4294967169, %v801_v28  ;;  %v3914_v40 = vadd.s32 4294967169, %v905_v31  ;;  %s252_s16 = scalar_lea.vmem %s7888_s0, %s3898_s13 }
  0x42   : > { %397 = vperm.xlu1 %4071, %v4382_v10   ;;  %292 = vperm.xlu0 %4070, %v4382_v10   ;;  %v3918_v44 = vadd.s32 4294967169, %v1009_v35  ;;  %v589_v47 = vand.u32 2147483647, %v4363_v5  ;;  %v3922_v48 = vadd.s32 4294967169, %v1113_v38  ;;  %v4447_v52 = vadd.s32 4294967169, %v1217_v41 }
  0x43   : > { %v599_v25 = vadd.s32 1, %v3902_v18  ;;  %v703_v43 = vadd.s32 1, %v3906_v34  ;;  %v807_v46 = vadd.s32 1, %v3910_v37  ;;  %v4444_v51 = vadd.s32 1, %v3914_v40 }
  0x44   : > { %v4450_v53 = vadd.s32 4294967169, %v1321_v42  ;;  %v4452_v54 = vadd.s32 1, %v3918_v44  ;;  %v596_v55 = vand.u32 8388607, %v589_v47  ;;  %v7905_v14 = vmov 2102212464  }
  0x45   : > { %vm600_vm0 = vcmp.gt.s32.totalorder %v599_v25, 0  ;;  %vm704_vm1 = vcmp.gt.s32.totalorder %v703_v43, 0  ;;  %vm808_vm2 = vcmp.gt.s32.totalorder %v807_v46, 0  ;;  %vm912_vm7 = vcmp.gt.s32.totalorder %v4444_v51, 0 }
  0x46   : > { %v601_v30 = vsel %vm600_vm0, %v599_v25, 0  ;;  %401 = vperm.xlu1 %4071, %v4393_v12   ;;  %297 = vperm.xlu0 %4070, %v4393_v12   ;;  %v597_v62 = vor.u32 8388608, %v596_v55  ;;  %v7907_v25 = vmov 920167782   ;;  %v705_v41 = vsel %vm704_vm1, %v703_v43, 0 }
  0x47   : > { %v603_v36 = vand.u32 31, %v601_v30  ;;  %v4442_v50 = vshrl.u32 %v601_v30, 5  ;;  %v7920_v30 = vmov 1326507024   ;;  %vm1016_vm8 = vcmp.gt.s32.totalorder %v4452_v54, 0 }
  0x48   : > { %v637_v40 = vshll.u32 %v597_v62, 8  ;;  %vm591_vm15 = vcmp.lt.s32.totalorder %v4363_v5, 0  ;;  %vm4680_vm0 = vcmp.le.f32.partialorder %v589_v47, 0.7853982 }
  0x49   : > { %v604_v45 = vsub.s32 32, %v603_v36  ;;  %v606_v57 = vshll.u32 %v7910_v56, %v603_v36  ;;  %v609_v61 = vshll.u32 %v7903_v59, %v603_v36  ;;  %v612_v13 = vshll.u32 %v7901_v63, %v603_v36 }
  0x4a   : > { %405 = vperm.xlu1 %4071, %v4404_v17   ;;  %302 = vperm.xlu0 %4070, %v4404_v17   ;;  %v615_v22 = vshll.u32 %v7905_v14, %v603_v36  ;;  %vm621_vm3 = vcmp.lt.s32.totalorder %v4442_v50, 1  ;;  %v618_v29 = vshll.u32 %v7907_v25, %v603_v36  ;;  %vm622_vm4 = vcmp.lt.s32.totalorder %v4442_v50, 2 }
  0x4b   : > { %v605_v58 = vshrl.u32 %v7910_v56, %v604_v45  ;;  %v607_v60 = vshrl.u32 %v7903_v59, %v604_v45  ;;  %v610_v9 = vshrl.u32 %v7901_v63, %v604_v45  ;;  %v613_v16 = vshrl.u32 %v7905_v14, %v604_v45 }
  0x4c   : > { %v616_v26 = vshrl.u32 %v7907_v25, %v604_v45  ;;  %v619_v31 = vshrl.u32 %v7920_v30, %v604_v45  ;;  %vm623_vm5 = vcmp.lt.s32.totalorder %v4442_v50, 3  ;;  %vm624_vm6 = vcmp.lt.s32.totalorder %v4442_v50, 4 }
  0x4d   : > { %v608_v18 = vor.u32 %v607_v60, %v606_v57  ;;  %v611_v27 = vor.u32 %v610_v9, %v609_v61  ;;  %v614_v28 = vor.u32 %v613_v16, %v612_v13  ;;  %v707_v61 = vand.u32 31, %v705_v41 }
  0x4e   : > { %409 = vperm.xlu1 %4071, %v4413_v20   ;;  %307 = vperm.xlu0 %4070, %v4413_v20   ;;  %v617_v32 = vor.u32 %v616_v26, %v615_v22  ;;  %v620_v33 = vor.u32 %v619_v31, %v618_v29  ;;  %v4521_v50 = vsub.s32 1, %v4440_v49  ;;  %v426_v9 = vsub.s32 5, %v4440_v49 }
  0x4f   : > { %v625_v34 = vsel %vm621_vm3, %v605_v58, %v608_v18  ;;  %v626_v35 = vsel %vm624_vm6, %v614_v28, 2102212464  ;;  %v629_v36 = vsel %vm621_vm3, %v608_v18, %v611_v27  ;;  %v633_v39 = vsel %vm621_vm3, %v611_v27, %v614_v28 }
  0x50   : > { %v627_v37 = vsel %vm623_vm5, %v611_v27, %v626_v35  ;;  %v630_v38 = vsel %vm624_vm6, %v617_v32, 920167782  ;;  %v634_v44 = vsel %vm624_vm6, %v620_v33, 1326507024  ;;  %v4535_v16 = vadd.s32 1, %v4447_v52 }
  0x51   : > { %v631_v42 = vsel %vm623_vm5, %v614_v28, %v630_v38  ;;  %v635_v43 = vsel %vm623_vm5, %v617_v32, %v634_v44  ;;  %v628_v55 = vsel %vm622_vm4, %v625_v34, %v627_v37  ;;  %v708_v22 = vsub.s32 32, %v707_v61 }
  0x52   : > { %413 = vperm.xlu1 %4071, %v4418_v21   ;;  %312 = vperm.xlu0 %4070, %v4418_v21   ;;  %v632_v45 = vsel %vm622_vm4, %v629_v36, %v631_v42  ;;  %v636_v57 = vsel %vm622_vm4, %v633_v39, %v635_v43  ;;  %8187 = vst [vmem:[#allocation16_spill] sm:$0xff] %v4535_v16  ;;  %v1017_v26 = vsel %vm1016_vm8, %v4452_v54, 0  ;;  %v4540_v27 = vadd.s32 1, %v4450_v53 }
  0x53   : > { %v4501_v58 = vmul.u32.u64.low %v637_v40, %v632_v45  ;;  %v4502_v60 = vmul.u32.u64.high %v637_v40, %v632_v45, %v4501_v58  ;;  %v4552_v52 = vshrl.u32 %v705_v41, 5  ;;  %v7900_v53 = vand.u32 2147483647, %v4367_v6 }
  0x54   : > { %8188 = vst [vmem:[#allocation17_spill] sm:$0xff] %v4540_v27  ;;  %v4568_v33 = vshrl.u32 %v1017_v26, 5  ;;  %v4570_v34 = vand.u32 31, %v1017_v26  ;;  %v710_v37 = vshll.u32 %v7910_v56, %v707_v61  ;;  %v711_v38 = vshrl.u32 %v7903_v59, %v708_v22 }
  0x55   : > { %v647_v18 = vadd.s32 1, %v4502_v60  ;;  %v713_v39 = vshll.u32 %v7903_v59, %v707_v61  ;;  %v714_v41 = vshrl.u32 %v7901_v63, %v708_v22  ;;  %v709_v44 = vshrl.u32 %v7910_v56, %v708_v22 }
  0x56   : > { %2262 = vrot.lane.b32.xlu0 %v4345_v0, %s4243_s8  ;;  %2264 = vrot.lane.b32.xlu1 %v4355_v3, %s4243_s8  ;;  %v809_v0 = vsel %vm808_vm2, %v807_v46, 0  ;;  %v1119_v3 = vadd.s32 1, %v3922_v48  ;;  %v913_v46 = vsel %vm912_vm7, %v4444_v51, 0  ;;  %v422_v51 = vsub.s32 3, %v4440_v49 }
  0x57   : > { %4072 = vset.pattern.permute.xlu1 %v7896_v2  ;;  %v4510_v48 = vmul.u32.u64.low %v637_v40, %v636_v57  ;;  %v4511_v62 = vmul.u32.u64.high %v637_v40, %v636_v57, %v4510_v48  ;;  %v4532_v13 = vand.u32 31, %v913_v46  ;;  %v4554_v28 = vshrl.u32 %v809_v0, 5 }
  0x58   : > { %vm1120_vm9 = vcmp.gt.s32.totalorder %v1119_v3, 0  ;;  %v4562_v29 = vshrl.u32 %v913_v46, 5  ;;  %v712_v45 = vor.u32 %v711_v38, %v710_v37  ;;  %v715_v43 = vor.u32 %v714_v41, %v713_v39 }
  0x59   : > { %vm646_vm10 = vc.u32 %v4511_v62, %v4501_v58  ;;  %v4566_v32 = vsub.s32 32, %v4532_v13  ;;  %v723_v57 = vshrl.u32 %v7920_v30, %v708_v22  ;;  %vm725_vm11 = vcmp.lt.s32.totalorder %v4552_v52, 1 }
  0x5a   : > { %2266 = vrot.lane.b32.xlu0 %v4372_v7, %s4243_s8  ;;  %2268 = vrot.lane.b32.xlu1 %v4382_v10, %s4243_s8  ;;  %v4528_v7 = vand.u32 31, %v809_v0  ;;  %v644_v10 = vmul.u32 %v637_v40, %v628_v55  ;;  %v648_v54 = vsel %vm646_vm10, %v647_v18, %v4502_v60  ;;  %v700_v40 = vand.u32 8388607, %v7900_v53 }
  0x5b   : > { %v719_v0 = vshll.u32 %v7905_v14, %v707_v61  ;;  %v722_v55 = vshll.u32 %v7907_v25, %v707_v61  ;;  %vm727_vm12 = vcmp.lt.s32.totalorder %v4552_v52, 3  ;;  %vm728_vm13 = vcmp.lt.s32.totalorder %v4552_v52, 4 }
  0x5c   : > { %v649_v31 = vadd.s32 %v648_v54, %v644_v10  ;;  %v701_v10 = vor.u32 8388608, %v700_v40  ;;  %vm726_vm14 = vcmp.lt.s32.totalorder %v4552_v52, 2  ;;  %v729_v37 = vsel %vm725_vm11, %v709_v44, %v712_v45  ;;  %v4625_v40 = vld [vmem:[%s252_s16] sm:$0xff] }
  0x5d   : > { %v724_v18 = vor.u32 %v723_v57, %v722_v55  ;;  %v4670_v52 = vsub.s32 0, %v4440_v49  ;;  %v820_v47 = vshll.u32 %v7901_v63, %v4528_v7  ;;  %v823_v2 = vshll.u32 %v7905_v14, %v4528_v7 }
  0x5e   : > { %2270 = vrot.lane.b32.xlu0 %v4393_v12, %s4243_s8  ;;  %2272 = vrot.lane.b32.xlu1 %v4404_v17, %s4243_s8  ;;  %v4560_v12 = vsub.s32 32, %v4528_v7  ;;  %v1121_v17 = vsel %vm1120_vm9, %v1119_v3, 0  ;;  %v650_v36 = vadd.s32 536870912, %v649_v31  ;;  %v720_v3 = vshrl.u32 %v7907_v25, %v708_v22 }
  0x5f   : > { %v4572_v35 = vshrl.u32 %v1121_v17, 5  ;;  %v4600_v26 = vand.u32 31, %v1121_v17  ;;  %v733_v17 = vsel %vm725_vm11, %v712_v45, %v715_v43  ;;  %v430_v45 = vsub.s32 7, %v4440_v49 }
  0x60   : > { %v651_v42 = vshrl.u32 %v650_v36, 30  ;;  %v721_v48 = vor.u32 %v720_v3, %v719_v0  ;;  %v741_v0 = vshll.u32 %v701_v10, 8  ;;  %v4647_v10 = vstv %s4595_s14  ;;  %s3901_s14 = sshll.u32 %s4578_s15, 2 }
  0x61   : > { %8189 = vst [vmem:[#allocation18_spill] sm:$0xff] %v4572_v35  ;;  %8190 = vst [vmem:[#allocation19_spill] sm:$0xff] %v4600_v26  ;;  %v4634_v44 = vsub.s32 32, %v4600_v26  ;;  %vm829_vm3 = vcmp.lt.s32.totalorder %v4554_v28, 1  ;;  %vm832_vm4 = vcmp.lt.s32.totalorder %v4554_v28, 4  ;;  %vm831_vm5 = vcmp.lt.s32.totalorder %v4554_v28, 3  ;;  %s262_s16 = scalar_lea.vmem %s7892_s4, %s3901_s14 }
  0x62   : > { %2274 = vrot.lane.b32.xlu0 %v4413_v20, %s4243_s8  ;;  %2276 = vrot.lane.b32.xlu1 %v4418_v21, %s4243_s8  ;;  %v716_v20 = vshll.u32 %v7901_v63, %v707_v61  ;;  %v717_v21 = vshrl.u32 %v7905_v14, %v708_v22  ;;  %v652_v60 = vshll.u32 %v651_v42, 30  ;;  %v4611_v22 = vsub.s32 32, %v4570_v34  ;;  %8191 = vst [vmem:[#allocation20_spill] sm:$0xff] %v4647_v10 }
  0x63   : > { %v675_v57 = vsub.s32 4, %v651_v42  ;;  %vm830_vm6 = vcmp.lt.s32.totalorder %v4554_v28, 2 }
  0x64   : > { %v718_v46 = vor.u32 %v717_v21, %v716_v20  ;;  %v4602_v54 = vsub.s32 %v649_v31, %v652_v60  ;;  %v734_v31 = vsel %vm728_vm13, %v721_v48, 920167782  ;;  %v738_v21 = vsel %vm728_vm13, %v724_v18, 1326507024 }
  0x65   : > { %v739_v55 = vsel %vm727_vm12, %v721_v48, %v738_v21  ;;  %v419_v18 = vrot.slane %v4625_v40, %v4521_v50  ;;  %v4656_v48 = vrot.slane %v4625_v40, %v422_v51  ;;  %v645_v51 = vadd.s32 %v4501_v58, %v4511_v62 }
  0x66   : > { %v730_v61 = vsel %vm728_vm13, %v718_v46, 2102212464  ;;  %v655_v36 = vsub.s32 0, %v4602_v54  ;;  %v735_v39 = vsel %vm727_vm12, %v718_v46, %v734_v31  ;;  %v737_v20 = vsel %vm725_vm11, %v715_v43, %v718_v46 }
  0x67   : > { %v731_v38 = vsel %vm727_vm12, %v715_v43, %v730_v61  ;;  %v736_v41 = vsel %vm726_vm14, %v733_v17, %v735_v39  ;;  %v740_v60 = vsel %vm726_vm14, %v737_v20, %v739_v55  ;;  %v4661_v31 = vrot.slane %v4625_v40, %v426_v9 }
  0x68   : > { %v3903_v3 = vmin.u32 %v655_v36, %v4602_v54  ;;  %v4642_v61 = vmul.u32.u64.low %v741_v0, %v736_v41  ;;  %v4643_v43 = vmul.u32.u64.high %v741_v0, %v736_v41, %v4642_v61  ;;  %v732_v17 = vsel %vm726_vm14, %v729_v37, %v731_v38 }
  0x69   : > { %v4663_v36 = vmul.u32.u64.low %v741_v0, %v740_v60  ;;  %v4664_v39 = vmul.u32.u64.high %v741_v0, %v740_v60, %v4663_v36  ;;  %v4667_v20 = vrot.slane %v4625_v40, %v430_v45  ;;  %v676_v38 = vsel %vm591_vm15, %v675_v57, %v651_v42 }
  0x6a   : > { %v657_v46 = vclz %v3903_v3  ;;  %v748_v9 = vmul.u32 %v741_v0, %v732_v17  ;;  %v751_v21 = vadd.s32 1, %v4643_v43  ;;  %v7909_v45 = vand.u32 2147483647, %v4376_v8 }
  0x6b   : > { %v814_v55 = vshll.u32 %v7910_v56, %v4528_v7  ;;  %v817_v58 = vshll.u32 %v7903_v59, %v4528_v7  ;;  %vm750_vm2 = vc.u32 %v4664_v39, %v4642_v61  ;;  %v818_v42 = vshrl.u32 %v7901_v63, %v4560_v12 }
  0x6c   : > { %v3904_v41 = vadd.s32 4294967294, %v657_v46  ;;  %v752_v46 = vsel %vm750_vm2, %v751_v21, %v4643_v43  ;;  %v815_v36 = vshrl.u32 %v7903_v59, %v4560_v12  ;;  %v824_v63 = vshrl.u32 %v7907_v25, %v4560_v12 }
  0x6d   : > { %v753_v17 = vadd.s32 %v752_v46, %v748_v9  ;;  %v804_v43 = vand.u32 8388607, %v7909_v45  ;;  %v819_v9 = vor.u32 %v818_v42, %v817_v58  ;;  %v827_v21 = vshrl.u32 %v7920_v30, %v4560_v12 }
  0x6e   : > { %vm3905_vm1 = vcmp.lt.s32.totalorder %v3904_v41, 0  ;;  %v816_v58 = vor.u32 %v815_v36, %v814_v55  ;;  %v4720_v42 = vsel %vm4680_vm0, 0, %v676_v38  ;;  %v813_v38 = vshrl.u32 %v7910_v56, %v4560_v12 }
  0x6f   : > { %v660_v62 = vsel %vm3905_vm1, 0, %v3904_v41  ;;  %v821_v41 = vshrl.u32 %v7905_v14, %v4560_v12  ;;  %v825_v14 = vor.u32 %v824_v63, %v823_v2  ;;  %8194 = vst [vmem:[#allocation21_spill] sm:$0xff] %v4720_v42  ;;  %v805_v2 = vor.u32 8388608, %v804_v43 }
  0x70   : > { %v661_v0 = vsub.s32 32, %v660_v62  ;;  %v662_v57 = vshll.u32 %v4602_v54, %v660_v62  ;;  %v665_v60 = vsub.s32 4294967266, %v660_v62  ;;  %v826_v54 = vshll.u32 %v7907_v25, %v4528_v7 }
  0x71   : > { %v754_v62 = vadd.s32 536870912, %v753_v17  ;;  %v822_v37 = vor.u32 %v821_v41, %v820_v47  ;;  %v4716_v25 = vrot.slane %v419_v18, %v4521_v50  ;;  %v837_v36 = vsel %vm829_vm3, %v816_v58, %v819_v9 }
  0x72   : > { %v663_v1 = vshrl.u32 %v645_v51, %v661_v0  ;;  %v666_v53 = vadd.s32 127, %v665_v60  ;;  %v828_v0 = vor.u32 %v827_v21, %v826_v54  ;;  %v682_v54 = vadd.s32 3, %v4720_v42 }
  0x73   : > { %v4711_v51 = vshrl.u32 %v754_v62, 30  ;;  %v834_v55 = vsel %vm832_vm4, %v822_v37, 2102212464  ;;  %v326_v12 = vsub.s32 4, %v4440_v49  ;;  %v4783_v3 = vrot.slane %v4661_v31, %v4521_v50 }
  0x74   : > { %v664_v46 = vor.u32 %v663_v1, %v662_v57  ;;  %v667_v59 = vshll.u32 %v666_v53, 23  ;;  %v841_v53 = vsel %vm829_vm3, %v819_v9, %v822_v37  ;;  %v842_v47 = vsel %vm832_vm4, %v828_v0, 1326507024 }
  0x75   : > { %v756_v1 = vshll.u32 %v4711_v51, 30  ;;  %v319_v0 = vrot.slane %v4625_v40, %v4670_v52  ;;  %v749_v31 = vadd.s32 %v4642_v61, %v4664_v39  ;;  %vm7965_vm12 = vweird.f32 %v4363_v5 }
  0x76   : > { %v668_v7 = vor.u32 4788187, %v667_v59  ;;  %v671_v60 = vcvt.s32.f32 %v664_v46  ;;  %v838_v59 = vsel %vm832_vm4, %v825_v14, 920167782  ;;  %v330_v46 = vsub.s32 6, %v4440_v49 }
  0x77   : > { %v4729_v18 = vsub.s32 %v753_v17, %v756_v1  ;;  %v839_v41 = vsel %vm831_vm5, %v822_v37, %v838_v59  ;;  %v843_v17 = vsel %vm831_vm5, %v825_v14, %v842_v47  ;;  %v833_v14 = vsel %vm829_vm3, %v813_v38, %v816_v58 }
  0x78   : > { %v669_v63 = vand.u32 2147483647, %v668_v7  ;;  %v844_v43 = vsel %vm830_vm6, %v841_v53, %v843_v17  ;;  %v845_v7 = vshll.u32 %v805_v2, 8  ;;  %v840_v1 = vsel %vm830_vm6, %v837_v36, %v839_v41 }
  0x79   : > { %v759_v62 = vsub.s32 0, %v4729_v18  ;;  %v8195_v59 = vsub.s32 2, %v4440_v49  ;;  %v4769_v38 = vand.u32 3, %v682_v54  ;;  %v4787_v17 = vrot.slane %v4667_v20, %v4521_v50 }
  0x7a   : > { %v672_v57 = vmul.f32 %v671_v60, %v669_v63  ;;  %v835_v60 = vsel %vm831_vm5, %v819_v9, %v834_v55  ;;  %v4763_v47 = vmul.u32.u64.low %v845_v7, %v844_v43  ;;  %v4764_v2 = vmul.u32.u64.high %v845_v7, %v844_v43, %v4763_v47 }
  0x7b   : > { %v3907_v37 = vmin.u32 %v759_v62, %v4729_v18  ;;  %v323_v53 = vrot.slane %v4625_v40, %v8195_v59  ;;  %v4773_v9 = vrot.slane %v4656_v48, %v4521_v50  ;;  %v4790_v54 = vrot.slane %v4625_v40, %v326_v12 }
  0x7c   : > { %v673_v21 = vxor.u32 2147483648, %v672_v57  ;;  %v4777_v36 = vmul.u32.u64.low %v845_v7, %v840_v1  ;;  %v4778_v41 = vmul.u32.u64.high %v845_v7, %v840_v1, %v4777_v36  ;;  %v4793_v28 = vrot.slane %v4625_v40, %v330_v46 }
  0x7d   : > { %v761_v55 = vclz %v3907_v37  ;;  %v4796_v62 = vrot.slane %v319_v0, %v4670_v52  ;;  %v4799_v43 = vrot.slane %v323_v53, %v4670_v52  ;;  %vm684_vm9 = vcmp.lt.s32.totalorder %v4769_v38, 2 }
  0x7e   : > { %v674_v63 = vsel %vm591_vm15, %v673_v21, %v672_v57  ;;  %v836_v57 = vsel %vm830_vm6, %v833_v14, %v835_v60  ;;  %vm854_vm8 = vc.u32 %v4764_v2, %v4777_v36  ;;  %vm685_vm10 = vcmp.eq.s32.totalorder %v4769_v38, 0 }
  0x7f   : > { %v677_v58 = vsel %vm4680_vm0, %v4363_v5, %v674_v63  ;;  %v3908_v48 = vadd.s32 4294967294, %v761_v55  ;;  %v852_v21 = vmul.u32 %v845_v7, %v836_v57  ;;  %vm688_vm11 = vcmp.eq.s32.totalorder %v4769_v38, 2 }
  0x80   : > { %4083 = vcosq.f32 %v677_v58  ;;  %v855_v40 = vadd.s32 1, %v4778_v41  ;;  %v779_v39 = vsub.s32 4, %v4711_v51  ;;  %v7919_v0 = vand.u32 2147483647, %v4388_v11 }
  0x81   : > { %4085 = vsinq.f32 %v677_v58  ;;  %vm3909_vm7 = vcmp.lt.s32.totalorder %v3908_v48, 0  ;;  %v918_v7 = vshll.u32 %v7910_v56, %v4532_v13  ;;  %v8196_v37 = vmov 2475754826  }
  0x82   : > { %v764_v50 = vsel %vm3909_vm7, 0, %v3908_v48  ;;  %v856_v46 = vsel %vm854_vm8, %v855_v40, %v4778_v41  ;;  %v919_v14 = vshrl.u32 %v8196_v37, %v4566_v32  ;;  %vm695_vm13 = vcmp.lt.s32.totalorder %v4367_v6, 0 }
  0x83   : > { %v765_v20 = vsub.s32 32, %v764_v50  ;;  %v766_v12 = vshll.u32 %v4729_v18, %v764_v50  ;;  %v769_v61 = vsub.s32 4294967266, %v764_v50  ;;  %v857_v63 = vadd.s32 %v856_v46, %v852_v21 }
  0x84   : > { %v8197_v18 = vmov 2102212464   ;;  %v921_v53 = vshll.u32 %v8196_v37, %v4532_v13  ;;  %v8198_v47 = vmov 2131351028   ;;  %v8199_v57 = vmov 920167782  }
  0x85   : > { %v767_v60 = vshrl.u32 %v749_v31, %v765_v20  ;;  %v770_v1 = vadd.s32 127, %v769_v61  ;;  %v927_v59 = vshll.u32 %v8197_v18, %v4532_v13  ;;  %v922_v58 = vshrl.u32 %v8198_v47, %v4566_v32 }
  0x86   : > { %v924_v55 = vshll.u32 %v8198_v47, %v4532_v13  ;;  %v928_v41 = vshrl.u32 %v8199_v57, %v4566_v32  ;;  %v858_v31 = vadd.s32 536870912, %v857_v63  ;;  %v925_v21 = vshrl.u32 %v8197_v18, %v4566_v32 }
  0x87   : > { %v768_v48 = vor.u32 %v767_v60, %v766_v12  ;;  %v771_v50 = vshll.u32 %v770_v1, 23  ;;  %v908_v20 = vand.u32 8388607, %v7919_v0  ;;  %v930_v46 = vshll.u32 %v8199_v57, %v4532_v13 }
  0x88   : > { %v929_v61 = vor.u32 %v928_v41, %v927_v59  ;;  %v931_v45 = vshrl.u32 %v7920_v30, %v4566_v32  ;;  %v4842_v4 = vshrl.u32 %v858_v31, 30  ;;  %v920_v23 = vor.u32 %v919_v14, %v918_v7 }
  0x89   : > { %v772_v60 = vor.u32 4788187, %v771_v50  ;;  %v775_v1 = vcvt.s32.f32 %v768_v48  ;;  %v923_v27 = vor.u32 %v922_v58, %v921_v53  ;;  %vm936_vm14 = vcmp.lt.s32.totalorder %v4562_v29, 4 }
  0x8a   : > { %v4831_v40 = vpop.eup %4083  ;;  %v860_v41 = vshll.u32 %v4842_v4, 30  ;;  %v926_v0 = vor.u32 %v925_v21, %v924_v55  ;;  %v932_v7 = vor.u32 %v931_v45, %v930_v46  ;;  %vm933_vm15 = vcmp.lt.s32.totalorder %v4562_v29, 1 }
  0x8b   : > { %8200 = vst [vmem:[#allocation22_spill] sm:$0xff] %v4831_v40  ;;  %v4839_v56 = vpop.eup %4085  ;;  %v7922_v12 = vxor.u32 2147483648, %v4831_v40  ;;  %v773_v59 = vand.u32 2147483647, %v772_v60  ;;  %vm935_vm0 = vcmp.lt.s32.totalorder %v4562_v29, 3  ;;  %v780_v38 = vsel %vm695_vm13, %v779_v39, %v4711_v51 }
  0x8c   : > { %8201 = vst [vmem:[#allocation23_spill] sm:$0xff] %v4839_v56  ;;  %v7924_v24 = vxor.u32 2147483648, %v4839_v56  ;;  %v4861_v58 = vsub.s32 %v857_v63, %v860_v41  ;;  %v942_v55 = vsel %vm936_vm14, %v929_v61, 920167782  ;;  %v8202_v31 = vand.u32 2147483647, %v4367_v6 }
  0x8d   : > { %v690_v13 = vsel %vm688_vm11, %v7922_v12, %v4839_v56  ;;  %v776_v53 = vmul.f32 %v775_v1, %v773_v59  ;;  %v8205_v21 = vmov 683565275   ;;  %v909_v59 = vor.u32 8388608, %v908_v20 }
  0x8e   : > { %v687_v48 = vsel %vm685_vm10, %v4831_v40, %v7924_v24  ;;  %vm4869_vm1 = vcmp.le.f32.partialorder %v8202_v31, 0.7853982  ;;  %v917_v63 = vshrl.u32 %v8205_v21, %v4566_v32  ;;  %v863_v1 = vsub.s32 0, %v4861_v58 }
  0x8f   : > { %v691_v14 = vsel %vm684_vm9, %v687_v48, %v690_v13  ;;  %v777_v60 = vxor.u32 2147483648, %v776_v53  ;;  %v938_v13 = vsel %vm936_vm14, %v926_v0, 2102212464  ;;  %vm934_vm2 = vcmp.lt.s32.totalorder %v4562_v29, 2 }
  0x90   : > { %v692_v50 = vsel %vm7965_vm12, nan, %v691_v14  ;;  %v941_v41 = vsel %vm933_vm15, %v920_v23, %v923_v27  ;;  %v943_v51 = vsel %vm935_vm0, %v926_v0, %v942_v55  ;;  %v782_v39 = vsel %vm4869_vm1, 0, %v780_v38 }
  0x91   : > { %v1422_v46 = vadd.f32 %v4647_v10, %v692_v50  ;;  %v778_v32 = vsel %vm695_vm13, %v777_v60, %v776_v53  ;;  %v3911_v48 = vmin.u32 %v863_v1, %v4861_v58  ;;  %v946_v20 = vsel %vm936_vm14, %v932_v7, 1326507024 }
  0x92   : > { %v781_v14 = vsel %vm4869_vm1, %v4367_v6, %v778_v32  ;;  %v937_v50 = vsel %vm933_vm15, %v917_v63, %v920_v23  ;;  %v939_v55 = vsel %vm935_vm0, %v923_v27, %v938_v13  ;;  %v945_v53 = vsel %vm933_vm15, %v923_v27, %v926_v0 }
  0x93   : > { %3377 = vperm.xlu0 %4070, %v1422_v46   ;;  %v4905_v31 = vrot.slane %v4790_v54, %v4670_v52  ;;  %4087 = vcosq.f32 %v781_v14  ;;  %v865_v38 = vclz %v3911_v48  ;;  %v944_v7 = vsel %vm934_vm2, %v941_v41, %v943_v51 }
  0x94   : > { %4089 = vsinq.f32 %v781_v14  ;;  %v786_v45 = vadd.s32 3, %v782_v39  ;;  %v947_v23 = vsel %vm935_vm0, %v929_v61, %v946_v20  ;;  %v949_v63 = vshll.u32 %v909_v59, 8 }
  0x95   : > { %v1626_v46 = vand.u32 3, %v782_v39  ;;  %v3912_v60 = vadd.s32 4294967294, %v865_v38  ;;  %v940_v27 = vsel %vm934_vm2, %v937_v50, %v939_v55  ;;  %v948_v54 = vsel %vm934_vm2, %v945_v53, %v947_v23 }
  0x96   : > { %v8206_v0 = vmov 1   ;;  %v4916_v1 = vmul.u32.u64.low %v949_v63, %v948_v54  ;;  %v4917_v13 = vmul.u32.u64.high %v949_v63, %v948_v54, %v4916_v1  ;;  %v4925_v61 = vrot.slane %v4793_v28, %v4670_v52 }
  0x97   : > { %4073 = vset.pattern.permute.xlu0 %v8206_v0  ;;  %v4919_v41 = vmul.u32.u64.low %v949_v63, %v944_v7  ;;  %v4920_v51 = vmul.u32.u64.high %v949_v63, %v944_v7, %v4919_v41  ;;  %v853_v59 = vadd.s32 %v4777_v36, %v4764_v2  ;;  %vm3913_vm3 = vcmp.lt.s32.totalorder %v3912_v60, 0 }
  0x98   : > { %v883_v29 = vsub.s32 4, %v4842_v4  ;;  %vm785_vm4 = vweird.f32 %v4367_v6  ;;  %v787_v32 = vand.u32 3, %v786_v45  ;;  %vm799_vm5 = vcmp.lt.s32.totalorder %v4376_v8, 0 }
  0x99   : > { %v868_v39 = vsel %vm3913_vm3, 0, %v3912_v60  ;;  %v956_v50 = vmul.u32 %v949_v63, %v940_v27  ;;  %vm1627_vm6 = vcmp.lt.s32.totalorder %v1626_v46, 2  ;;  %v8207_v52 = vand.u32 2147483647, %v4376_v8 }
  0x9a   : > { %v869_v48 = vsub.s32 32, %v868_v39  ;;  %v870_v20 = vshll.u32 %v4861_v58, %v868_v39  ;;  %v873_v14 = vsub.s32 4294967266, %v868_v39  ;;  %vm958_vm8 = vc.u32 %v4917_v13, %v4919_v41 }
  0x9b   : > { %vm4935_vm7 = vcmp.le.f32.partialorder %v8207_v52, 0.7853982  ;;  %v959_v2 = vadd.s32 1, %v4920_v51  ;;  %vm1628_vm9 = vcmp.eq.s32.totalorder %v1626_v46, 0  ;;  %v884_v58 = vsel %vm799_vm5, %v883_v29, %v4842_v4 }
  0x9c   : > { %v871_v36 = vshrl.u32 %v853_v59, %v869_v48  ;;  %v874_v55 = vadd.s32 127, %v873_v14  ;;  %vm788_vm10 = vcmp.lt.s32.totalorder %v787_v32, 2  ;;  %vm789_vm11 = vcmp.eq.s32.totalorder %v787_v32, 0 }
  0x9d   : > { %vm1631_vm13 = vcmp.eq.s32.totalorder %v1626_v46, 2  ;;  %v960_v53 = vsel %vm958_vm8, %v959_v2, %v4920_v51  ;;  %v4088_v38 = vpop.eup %4087  ;;  %vm792_vm14 = vcmp.eq.s32.totalorder %v787_v32, 2  ;;  %v886_v27 = vsel %vm4935_vm7, 0, %v884_v58 }
  0x9e   : > { %v872_v7 = vor.u32 %v871_v36, %v870_v20  ;;  %v875_v45 = vshll.u32 %v874_v55, 23  ;;  %v961_v23 = vadd.s32 %v960_v53, %v956_v50  ;;  %v4090_v63 = vpop.eup %4089  ;;  %v793_v60 = vxor.u32 2147483648, %v4088_v38 }
  0x9f   : > { %v7923_v54 = vand.u32 2147483647, %v4398_v15  ;;  %v1022_v4 = vshll.u32 %v8205_v21, %v4570_v34  ;;  %v790_v1 = vxor.u32 2147483648, %v4090_v63  ;;  %v1023_v20 = vshrl.u32 %v8196_v37, %v4611_v22 }
  0xa0   : > { %v876_v59 = vor.u32 4788187, %v875_v45  ;;  %v879_v29 = vcvt.s32.f32 %v872_v7  ;;  %v962_v39 = vadd.s32 536870912, %v961_v23  ;;  %v794_v51 = vsel %vm792_vm14, %v793_v60, %v4090_v63 }
  0xa1   : > { %v1633_v48 = vsel %vm1631_vm13, %v793_v60, %v4090_v63  ;;  %v1025_v14 = vshll.u32 %v8196_v37, %v4570_v34  ;;  %v791_v50 = vsel %vm789_vm11, %v4088_v38, %v790_v1  ;;  %v1630_v52 = vsel %vm1628_vm9, %v4088_v38, %v790_v1 }
  0xa2   : > { %v877_v2 = vand.u32 2147483647, %v876_v59  ;;  %v963_v36 = vshrl.u32 %v962_v39, 30  ;;  %v795_v55 = vsel %vm788_vm10, %v791_v50, %v794_v51  ;;  %v1634_v58 = vsel %vm1627_vm6, %v1630_v52, %v1633_v48 }
  0xa3   : > { %v1028_v53 = vshll.u32 %v8198_v47, %v4570_v34  ;;  %v1029_v7 = vshrl.u32 %v8197_v18, %v4611_v22  ;;  %v796_v45 = vsel %vm785_vm4, nan, %v795_v55  ;;  %v1031_v38 = vshll.u32 %v8197_v18, %v4570_v34 }
  0xa4   : > { %v880_v63 = vmul.f32 %v879_v29, %v877_v2  ;;  %v964_v60 = vshll.u32 %v963_v36, 30  ;;  %v1423_v1 = vadd.f32 %v4647_v10, %v796_v45  ;;  %v1635_v46 = vsel %vm785_vm4, nan, %v1634_v58 }
  0xa5   : > { %v1026_v32 = vshrl.u32 %v8198_v47, %v4611_v22  ;;  %v1032_v59 = vshrl.u32 %v8199_v57, %v4611_v22  ;;  %v1034_v29 = vshll.u32 %v8199_v57, %v4570_v34  ;;  %v1035_v48 = vshrl.u32 %v7920_v30, %v4611_v22 }
  0xa6   : > { %v881_v39 = vxor.u32 2147483648, %v880_v63  ;;  %v4975_v51 = vsub.s32 %v961_v23, %v964_v60  ;;  %3382 = vperm.xlu1 %4072, %v1423_v1   ;;  %v890_v50 = vadd.s32 3, %v886_v27  ;;  %v1012_v6 = vand.u32 8388607, %v7923_v54 }
  0xa7   : > { %v1021_v52 = vshrl.u32 %v8205_v21, %v4611_v22  ;;  %v1030_v2 = vor.u32 %v1029_v7, %v1028_v53  ;;  %v2255_v55 = vmul.f32 %v1635_v46, %v4647_v10  ;;  %v1033_v34 = vor.u32 %v1032_v59, %v1031_v38 }
  0xa8   : > { %v882_v23 = vsel %vm799_vm5, %v881_v39, %v880_v63  ;;  %v967_v58 = vsub.s32 0, %v4975_v51  ;;  %v1024_v45 = vor.u32 %v1023_v20, %v1022_v4  ;;  %v1027_v60 = vor.u32 %v1026_v32, %v1025_v14 }
  0xa9   : > { %vm1037_vm15 = vcmp.lt.s32.totalorder %v4568_v33, 1  ;;  %vm1040_vm0 = vcmp.lt.s32.totalorder %v4568_v33, 4  ;;  %v1036_v30 = vor.u32 %v1035_v48, %v1034_v29  ;;  %vm1039_vm1 = vcmp.lt.s32.totalorder %v4568_v33, 3 }
  0xaa   : > { %v3915_v1 = vmin.u32 %v967_v58, %v4975_v51  ;;  %v1042_v22 = vsel %vm1040_vm0, %v1030_v2, 2102212464  ;;  %4074 = vset.pattern.permute.xlu1 %v8206_v0  ;;  %v885_v53 = vsel %vm4935_vm7, %v4376_v8, %v882_v23  ;;  %vm903_vm2 = vcmp.lt.s32.totalorder %v4388_v11, 0 }
  0xab   : > { %v987_v4 = vsub.s32 4, %v963_v36  ;;  %v1013_v20 = vor.u32 8388608, %v1012_v6  ;;  %3506 = vperm.xlu1 %4074, %v2255_v55   ;;  %v1041_v7 = vsel %vm1037_vm15, %v1021_v52, %v1024_v45  ;;  %v1043_v63 = vsel %vm1039_vm1, %v1027_v60, %v1042_v22 }
  0xac   : > { %v969_v14 = vclz %v3915_v1  ;;  %v1046_v38 = vsel %vm1040_vm0, %v1033_v34, 920167782  ;;  %v5006_v46 = vand.u32 3, %v886_v27  ;;  %vm1038_vm3 = vcmp.lt.s32.totalorder %v4568_v33, 2 }
  0xad   : > { %v1045_v28 = vsel %vm1037_vm15, %v1024_v45, %v1027_v60  ;;  %v1047_v32 = vsel %vm1039_vm1, %v1030_v2, %v1046_v38  ;;  %4091 = vcosq.f32 %v885_v53  ;;  %v5013_v59 = vand.u32 3, %v890_v50 }
  0xae   : > { %v5017_v39 = vadd.s32 %v4919_v41, %v4917_v13  ;;  %v1050_v29 = vsel %vm1040_vm0, %v1036_v30, 1326507024  ;;  %4093 = vsinq.f32 %v885_v53  ;;  %v5023_v27 = vsel %vm903_vm2, %v987_v4, %v963_v36 }
  0xaf   : > { %v5027_v48 = vsel %vm1038_vm3, %v1041_v7, %v1043_v63  ;;  %v5029_v6 = vshll.u32 %v1013_v20, 8  ;;  %v8210_v55 = vmov 0   ;;  %v5032_v13 = vadd.s32 4294967294, %v969_v14 }
  0xb0   : > { %4075 = vset.pattern.permute.xlu1 %v8210_v55  ;;  %v5036_v30 = vsel %vm1038_vm3, %v1045_v28, %v1047_v32  ;;  %v1049_v41 = vsel %vm1037_vm15, %v1027_v60, %v1030_v2  ;;  %v1051_v36 = vsel %vm1039_vm1, %v1033_v34, %v1050_v29  ;;  %vm893_vm4 = vcmp.eq.s32.totalorder %v5013_v59, 0 }
  0xb1   : > { %v5052_v34 = vsel %vm1038_vm3, %v1049_v41, %v1051_v36  ;;  %v5056_v60 = vmul.u32.u64.low %v5029_v6, %v5036_v30  ;;  %v5057_v14 = vmul.u32.u64.high %v5029_v6, %v5036_v30, %v5056_v60  ;;  %vm896_vm5 = vcmp.eq.s32.totalorder %v5013_v59, 2 }
  0xb2   : > { %vm892_vm6 = vcmp.lt.s32.totalorder %v5013_v59, 2  ;;  %vm889_vm7 = vweird.f32 %v4376_v8  ;;  %vm1731_vm8 = vcmp.eq.s32.totalorder %v5006_v46, 0  ;;  %vm1734_vm9 = vcmp.eq.s32.totalorder %v5006_v46, 2 }
  0xb3   : > { %vm1730_vm10 = vcmp.lt.s32.totalorder %v5006_v46, 2  ;;  %vm3917_vm11 = vcmp.lt.s32.totalorder %v5032_v13, 0  ;;  %vm7969_vm15 = vweird.f32 %v4388_v11 }
  0xb5   : > { %v386_v50 = vpop.permute.xlu1 %385  ;;  %v278_v52 = vpop.permute.xlu0 %277 }
  0xb6   : > { %v452_v23 = vsub.f32 %v386_v50, %v4716_v25  ;;  %v453_v58 = vsub.f32 %v386_v50, %v4773_v9  ;;  %v454_v45 = vsub.f32 %v386_v50, %v4783_v3  ;;  %v455_v1 = vsub.f32 %v386_v50, %v4787_v17 }
  0xb7   : > { %v352_v22 = vsub.f32 %v278_v52, %v4796_v62  ;;  %v353_v53 = vsub.f32 %v278_v52, %v4799_v43  ;;  %v354_v4 = vsub.f32 %v278_v52, %v4905_v31  ;;  %v355_v20 = vsub.f32 %v278_v52, %v4925_v61 }
  0xb8   : > { %v516_v2 = vmul.f32 %v452_v23, %v452_v23  ;;  %v517_v7 = vmul.f32 %v453_v58, %v453_v58  ;;  %v518_v63 = vmul.f32 %v454_v45, %v454_v45  ;;  %v519_v38 = vmul.f32 %v455_v1, %v455_v1 }
  0xb9   : > { %v484_v28 = vmul.f32 %v352_v22, %v352_v22  ;;  %v390_v32 = vpop.permute.xlu1 %389  ;;  %v283_v29 = vpop.permute.xlu0 %282  ;;  %v485_v36 = vmul.f32 %v353_v53, %v353_v53  ;;  %v486_v23 = vmul.f32 %v354_v4, %v354_v4  ;;  %v487_v12 = vmul.f32 %v355_v20, %v355_v20 }
  0xba   : > { %v456_v50 = vsub.f32 %v390_v32, %v4716_v25  ;;  %v457_v52 = vsub.f32 %v390_v32, %v4773_v9  ;;  %v458_v33 = vsub.f32 %v390_v32, %v4783_v3  ;;  %v459_v41 = vsub.f32 %v390_v32, %v4787_v17  ;;  %v5066_v22 = vpop.eup %4091 }
  0xbb   : > { %v5064_v30 = vadd.f32 %v516_v2, %v484_v28  ;;  %v356_v24 = vsub.f32 %v283_v29, %v4796_v62  ;;  %v357_v16 = vsub.f32 %v283_v29, %v4799_v43  ;;  %v358_v35 = vsub.f32 %v283_v29, %v4905_v31  ;;  %v5072_v53 = vpop.eup %4093 }
  0xbc   : > { %v520_v54 = vmul.f32 %v456_v50, %v456_v50  ;;  %v521_v58 = vmul.f32 %v457_v52, %v457_v52  ;;  %v522_v45 = vmul.f32 %v458_v33, %v458_v33  ;;  %v523_v1 = vmul.f32 %v459_v41, %v459_v41 }
  0xbd   : > { %v359_v57 = vsub.f32 %v283_v29, %v4925_v61  ;;  %v394_v32 = vpop.permute.xlu1 %393  ;;  %v488_v50 = vmul.f32 %v356_v24, %v356_v24  ;;  %v489_v52 = vmul.f32 %v357_v16, %v357_v16  ;;  %v490_v33 = vmul.f32 %v358_v35, %v358_v35  ;;  %v288_v18 = vpop.permute.xlu0 %287 }
  0xbe   : > { %v460_v4 = vsub.f32 %v394_v32, %v4716_v25  ;;  %v461_v20 = vsub.f32 %v394_v32, %v4773_v9  ;;  %v462_v2 = vsub.f32 %v394_v32, %v4783_v3  ;;  %v463_v28 = vsub.f32 %v394_v32, %v4787_v17 }
  0xbf   : > { %v491_v41 = vmul.f32 %v359_v57, %v359_v57  ;;  %v5078_v5 = vadd.f32 %v517_v7, %v485_v36  ;;  %v5080_v15 = vadd.f32 %v518_v63, %v486_v23  ;;  %v5082_v29 = vadd.f32 %v519_v38, %v487_v12 }
  0xc0   : > { %v524_v40 = vmul.f32 %v460_v4, %v460_v4  ;;  %v5084_v56 = vadd.f32 %v520_v54, %v488_v50  ;;  %v5086_v42 = vadd.f32 %v521_v58, %v489_v52  ;;  %v5088_v47 = vadd.f32 %v522_v45, %v490_v33 }
  0xc1   : > { %8211 = vst [vmem:[#allocation24_spill] sm:$0xff] %v5082_v29  ;;  %v5090_v37 = vadd.f32 %v523_v1, %v491_v41  ;;  %v398_v24 = vpop.permute.xlu1 %397  ;;  %v360_v16 = vsub.f32 %v288_v18, %v4796_v62  ;;  %v361_v35 = vsub.f32 %v288_v18, %v4799_v43  ;;  %v362_v57 = vsub.f32 %v288_v18, %v4905_v31  ;;  %v293_v52 = vpop.permute.xlu0 %292 }
  0xc2   : > { %8212 = vst [vmem:[#allocation25_spill] sm:$0xff] %v5086_v42  ;;  %8213 = vst [vmem:[#allocation26_spill] sm:$0xff] %v5088_v47  ;;  %v363_v7 = vsub.f32 %v288_v18, %v4925_v61  ;;  %v2311_v12 = vmin.f32 %v5064_v30, %v5084_v56  ;;  %v525_v54 = vmul.f32 %v461_v20, %v461_v20 }
  0xc3   : > { %8214 = vst [vmem:[#allocation27_spill] sm:$0xff] %v5090_v37  ;;  %v526_v63 = vmul.f32 %v462_v2, %v462_v2  ;;  %v527_v38 = vmul.f32 %v463_v28, %v463_v28  ;;  %v492_v36 = vmul.f32 %v360_v16, %v360_v16  ;;  %v493_v23 = vmul.f32 %v361_v35, %v361_v35 }
  0xc4   : > { %v494_v58 = vmul.f32 %v362_v57, %v362_v57  ;;  %v495_v45 = vmul.f32 %v363_v7, %v363_v7  ;;  %v464_v1 = vsub.f32 %v398_v24, %v4716_v25  ;;  %v465_v32 = vsub.f32 %v398_v24, %v4773_v9 }
  0xc5   : > { %v466_v4 = vsub.f32 %v398_v24, %v4783_v3  ;;  %v467_v50 = vsub.f32 %v398_v24, %v4787_v17  ;;  %v2324_v18 = vmin.f32 %v5078_v5, %v5086_v42  ;;  %v2337_v20 = vmin.f32 %v5080_v15, %v5088_v47  ;;  %v402_v24 = vpop.permute.xlu1 %401 }
  0xc6   : > { %v2350_v2 = vmin.f32 %v5082_v29, %v5090_v37  ;;  %v5108_v28 = vadd.f32 %v524_v40, %v492_v36  ;;  %v5110_v33 = vadd.f32 %v525_v54, %v493_v23  ;;  %v5112_v41 = vadd.f32 %v526_v63, %v494_v58 }
  0xc7   : > { %v5114_v16 = vadd.f32 %v527_v38, %v495_v45  ;;  %v528_v35 = vmul.f32 %v464_v1, %v464_v1  ;;  %v529_v7 = vmul.f32 %v465_v32, %v465_v32  ;;  %v530_v26 = vmul.f32 %v466_v4, %v466_v4 }
  0xc8   : > { %8215 = vst [vmem:[#allocation28_spill] sm:$0xff] %v5108_v28  ;;  %8216 = vst [vmem:[#allocation29_spill] sm:$0xff] %v5110_v33  ;;  %v2312_v57 = vmin.f32 %v2311_v12, %v5108_v28  ;;  %v531_v42 = vmul.f32 %v467_v50, %v467_v50  ;;  %v364_v40 = vsub.f32 %v293_v52, %v4796_v62  ;;  %v298_v50 = vpop.permute.xlu0 %297 }
  0xc9   : > { %8217 = vst [vmem:[#allocation30_spill] sm:$0xff] %v5112_v41  ;;  %8218 = vst [vmem:[#allocation31_spill] sm:$0xff] %v5114_v16  ;;  %v365_v54 = vsub.f32 %v293_v52, %v4799_v43  ;;  %v366_v63 = vsub.f32 %v293_v52, %v4905_v31  ;;  %v367_v38 = vsub.f32 %v293_v52, %v4925_v61 }
  0xca   : > { %v468_v36 = vsub.f32 %v402_v24, %v4716_v25  ;;  %v469_v23 = vsub.f32 %v402_v24, %v4773_v9  ;;  %v470_v12 = vsub.f32 %v402_v24, %v4783_v3  ;;  %v471_v58 = vsub.f32 %v402_v24, %v4787_v17 }
  0xcb   : > { %v496_v45 = vmul.f32 %v364_v40, %v364_v40  ;;  %v497_v1 = vmul.f32 %v365_v54, %v365_v54  ;;  %v498_v32 = vmul.f32 %v366_v63, %v366_v63  ;;  %v499_v4 = vmul.f32 %v367_v38, %v367_v38 }
  0xcc   : > { %v5130_v28 = vmin.f32 %v2324_v18, %v5110_v33  ;;  %v5133_v52 = vmin.f32 %v2337_v20, %v5112_v41  ;;  %v5136_v37 = vmin.f32 %v2350_v2, %v5114_v16  ;;  %v532_v47 = vmul.f32 %v468_v36, %v468_v36  ;;  %v406_v36 = vpop.permute.xlu1 %405 }
  0xcd   : > { %v5139_v24 = vadd.f32 %v528_v35, %v496_v45  ;;  %v5141_v40 = vadd.f32 %v529_v7, %v497_v1  ;;  %v5143_v54 = vadd.f32 %v530_v26, %v498_v32  ;;  %v5145_v63 = vadd.f32 %v531_v42, %v499_v4 }
  0xce   : > { %v368_v18 = vsub.f32 %v298_v50, %v4796_v62  ;;  %v369_v20 = vsub.f32 %v298_v50, %v4799_v43  ;;  %v370_v2 = vsub.f32 %v298_v50, %v4905_v31  ;;  %v371_v38 = vsub.f32 %v298_v50, %v4925_v61 }
  0xcf   : > { %8219 = vst [vmem:[#allocation32_spill] sm:$0xff] %v5139_v24  ;;  %8220 = vst [vmem:[#allocation33_spill] sm:$0xff] %v5141_v40  ;;  %v2313_v35 = vmin.f32 %v2312_v57, %v5139_v24  ;;  %v533_v7 = vmul.f32 %v469_v23, %v469_v23  ;;  %v534_v26 = vmul.f32 %v470_v12, %v470_v12  ;;  %v894_v16 = vxor.u32 2147483648, %v5072_v53 }
  0xd0   : > { %8221 = vst [vmem:[#allocation34_spill] sm:$0xff] %v5143_v54  ;;  %8222 = vst [vmem:[#allocation35_spill] sm:$0xff] %v5145_v63  ;;  %v535_v45 = vmul.f32 %v471_v58, %v471_v58  ;;  %v500_v42 = vmul.f32 %v368_v18, %v368_v18  ;;  %v501_v1 = vmul.f32 %v369_v20, %v369_v20  ;;  %v897_v41 = vxor.u32 2147483648, %v5066_v22  ;;  %v410_v24 = vpop.permute.xlu1 %409 }
  0xd1   : > { %v502_v32 = vmul.f32 %v370_v2, %v370_v2  ;;  %v503_v4 = vmul.f32 %v371_v38, %v371_v38  ;;  %v472_v33 = vsub.f32 %v406_v36, %v4716_v25  ;;  %v473_v50 = vsub.f32 %v406_v36, %v4773_v9  ;;  %v303_v2 = vpop.permute.xlu0 %302 }
  0xd2   : > { %v2326_v29 = vmin.f32 %v5130_v28, %v5141_v40  ;;  %v2339_v57 = vmin.f32 %v5133_v52, %v5143_v54  ;;  %v2352_v23 = vmin.f32 %v5136_v37, %v5145_v63  ;;  %v5164_v12 = vadd.f32 %v532_v47, %v500_v42 }
  0xd3   : > { %v895_v58 = vsel %vm893_vm4, %v5066_v22, %v894_v16  ;;  %v898_v18 = vsel %vm896_vm5, %v897_v41, %v5072_v53  ;;  %v474_v20 = vsub.f32 %v406_v36, %v4783_v3  ;;  %v475_v28 = vsub.f32 %v406_v36, %v4787_v17 }
  0xd4   : > { %8223 = vst [vmem:[#allocation36_spill] sm:$0xff] %v5164_v12  ;;  %v5174_v38 = vadd.f32 %v533_v7, %v501_v1  ;;  %v5176_v52 = vadd.f32 %v534_v26, %v502_v32  ;;  %v5178_v37 = vadd.f32 %v535_v45, %v503_v4  ;;  %v5181_v47 = vmin.f32 %v2313_v35, %v5164_v12 }
  0xd5   : > { %v899_v42 = vsel %vm892_vm6, %v895_v58, %v898_v18  ;;  %v536_v63 = vmul.f32 %v472_v33, %v472_v33  ;;  %v537_v54 = vmul.f32 %v473_v50, %v473_v50  ;;  %v538_v40 = vmul.f32 %v474_v20, %v474_v20 }
  0xd6   : > { %8224 = vst [vmem:[#allocation37_spill] sm:$0xff] %v5174_v38  ;;  %8225 = vst [vmem:[#allocation38_spill] sm:$0xff] %v5176_v52  ;;  %v900_v36 = vsel %vm889_vm7, nan, %v899_v42  ;;  %v539_v7 = vmul.f32 %v475_v28, %v475_v28  ;;  %v372_v26 = vsub.f32 %v303_v2, %v4796_v62  ;;  %v373_v45 = vsub.f32 %v303_v2, %v4799_v43 }
  0xd7   : > { %8226 = vst [vmem:[#allocation39_spill] sm:$0xff] %v5178_v37  ;;  %v1424_v35 = vadd.f32 %v4647_v10, %v900_v36  ;;  %v374_v1 = vsub.f32 %v303_v2, %v4905_v31  ;;  %v375_v32 = vsub.f32 %v303_v2, %v4925_v61  ;;  %v1733_v59 = vsel %vm1731_vm8, %v5066_v22, %v894_v16 }
  0xd8   : > { %v504_v33 = vmul.f32 %v372_v26, %v372_v26  ;;  %v505_v4 = vmul.f32 %v373_v45, %v373_v45  ;;  %v1736_v50 = vsel %vm1734_vm9, %v897_v41, %v5072_v53  ;;  %v476_v58 = vsub.f32 %v410_v24, %v4716_v25  ;;  %v308_v45 = vpop.permute.xlu0 %307 }
  0xd9   : > { %3387 = vperm.xlu1 %4075, %v1424_v35   ;;  %v506_v18 = vmul.f32 %v374_v1, %v374_v1  ;;  %v507_v20 = vmul.f32 %v375_v32, %v375_v32  ;;  %v1737_v28 = vsel %vm1730_vm10, %v1733_v59, %v1736_v50  ;;  %v477_v2 = vsub.f32 %v410_v24, %v4773_v9  ;;  %v414_v1 = vpop.permute.xlu1 %413 }
  0xda   : > { %v2327_v42 = vmin.f32 %v2326_v29, %v5174_v38  ;;  %v5204_v36 = vadd.f32 %v536_v63, %v504_v33  ;;  %v1738_v22 = vsel %vm889_vm7, nan, %v1737_v28  ;;  %v478_v16 = vsub.f32 %v410_v24, %v4783_v3 }
  0xdb   : > { %v2340_v53 = vmin.f32 %v2339_v57, %v5176_v52  ;;  %v5211_v41 = vmin.f32 %v2352_v23, %v5178_v37  ;;  %v2256_v26 = vmul.f32 %v1738_v22, %v4647_v10  ;;  %v479_v46 = vsub.f32 %v410_v24, %v4787_v17 }
  0xdc   : > { %8227 = vst [vmem:[#allocation40_spill] sm:$0xff] %v5204_v36  ;;  %v5215_v35 = vadd.f32 %v537_v54, %v505_v4  ;;  %v5217_v29 = vadd.f32 %v538_v40, %v506_v18  ;;  %v5219_v63 = vadd.f32 %v539_v7, %v507_v20  ;;  %v2315_v8 = vmin.f32 %v5181_v47, %v5204_v36 }
  0xdd   : > { %4076 = vset.pattern.permute.xlu1 %v8206_v0  ;;  %v540_v57 = vmul.f32 %v476_v58, %v476_v58  ;;  %v541_v23 = vmul.f32 %v477_v2, %v477_v2  ;;  %v542_v32 = vmul.f32 %v478_v16, %v478_v16  ;;  %v543_v59 = vmul.f32 %v479_v46, %v479_v46 }
  0xde   : > { %8228 = vst [vmem:[#allocation41_spill] sm:$0xff] %v5215_v35  ;;  %8229 = vst [vmem:[#allocation42_spill] sm:$0xff] %v5217_v29  ;;  %3511 = vperm.xlu1 %4076, %v2256_v26   ;;  %v376_v24 = vsub.f32 %v308_v45, %v4796_v62  ;;  %v377_v54 = vsub.f32 %v308_v45, %v4799_v43  ;;  %v378_v40 = vsub.f32 %v308_v45, %v4905_v31 }
  0xdf   : > { %8230 = vst [vmem:[#allocation43_spill] sm:$0xff] %v5219_v63  ;;  %v379_v7 = vsub.f32 %v308_v45, %v4925_v61  ;;  %v972_v47 = vsel %vm3917_vm11, 0, %v5032_v13  ;;  %v480_v33 = vsub.f32 %v414_v1, %v4716_v25  ;;  %v481_v4 = vsub.f32 %v414_v1, %v4773_v9 }
  0xe0   : > { %v482_v50 = vsub.f32 %v414_v1, %v4783_v3  ;;  %v508_v58 = vmul.f32 %v376_v24, %v376_v24  ;;  %v509_v18 = vmul.f32 %v377_v54, %v377_v54  ;;  %v510_v20 = vmul.f32 %v378_v40, %v378_v40 }
  0xe1   : > { %v511_v28 = vmul.f32 %v379_v7, %v379_v7  ;;  %v973_v2 = vsub.s32 32, %v972_v47  ;;  %v974_v22 = vshll.u32 %v4975_v51, %v972_v47  ;;  %v977_v16 = vsub.s32 4294967266, %v972_v47 }
  0xe2   : > { %v483_v26 = vsub.f32 %v414_v1, %v4787_v17  ;;  %v2328_v46 = vmin.f32 %v2327_v42, %v5215_v35  ;;  %v2341_v13 = vmin.f32 %v2340_v53, %v5217_v29  ;;  %v2354_v25 = vmin.f32 %v5211_v41, %v5219_v63  ;;  %4077 = vset.pattern.permute.xlu1 %v8210_v55  ;;  %v313_v1 = vpop.permute.xlu0 %312 }
  0xe3   : > { %v5240_v9 = vadd.f32 %v540_v57, %v508_v58  ;;  %v8232_v3 = vand.u32 2147483647, %v4388_v11  ;;  %v5249_v51 = vadd.f32 %v541_v23, %v509_v18  ;;  %v5251_v17 = vadd.f32 %v542_v32, %v510_v20 }
  0xe4   : > { %v975_v42 = vshrl.u32 %v5017_v39, %v973_v2  ;;  %v978_v53 = vadd.s32 127, %v977_v16  ;;  %v5254_v24 = vadd.f32 %v543_v59, %v511_v28  ;;  %v544_v57 = vmul.f32 %v480_v33, %v480_v33 }
  0xe5   : > { %8231 = vst [vmem:[#allocation44_spill] sm:$0xff] %v5240_v9  ;;  %vm5245_vm13 = vcmp.le.f32.partialorder %v8232_v3, 0.7853982  ;;  %8235 = vst [vmem:[#allocation45_spill] sm:$0xff] %v5249_v51  ;;  %v2316_v41 = vmin.f32 %v2315_v8, %v5240_v9  ;;  %v545_v54 = vmul.f32 %v481_v4, %v481_v4  ;;  %v546_v47 = vmul.f32 %v482_v50, %v482_v50 }
  0xe6   : > { %8236 = vst [vmem:[#allocation46_spill] sm:$0xff] %v5251_v17  ;;  %8237 = vst [vmem:[#allocation47_spill] sm:$0xff] %v5254_v24  ;;  %v976_v40 = vor.u32 %v975_v42, %v974_v22  ;;  %v979_v7 = vshll.u32 %v978_v53, 23  ;;  %v547_v58 = vmul.f32 %v483_v26, %v483_v26  ;;  %v380_v3 = vsub.f32 %v313_v1, %v4796_v62 }
  0xe7   : > { %v381_v23 = vsub.f32 %v313_v1, %v4799_v43  ;;  %v382_v32 = vsub.f32 %v313_v1, %v4905_v31  ;;  %v383_v39 = vsub.f32 %v313_v1, %v4925_v61  ;;  %v2329_v18 = vmin.f32 %v2328_v46, %v5249_v51 }
  0xe8   : > { %v2342_v59 = vmin.f32 %v2341_v13, %v5251_v17  ;;  %v980_v20 = vor.u32 4788187, %v979_v7  ;;  %v983_v8 = vcvt.s32.f32 %v976_v40  ;;  %v512_v33 = vmul.f32 %v380_v3, %v380_v3 }
  0xe9   : > { %v513_v4 = vmul.f32 %v381_v23, %v381_v23  ;;  %v514_v28 = vmul.f32 %v382_v32, %v382_v32  ;;  %v515_v2 = vmul.f32 %v383_v39, %v383_v39  ;;  %v2355_v50 = vmin.f32 %v2354_v25, %v5254_v24 }
  0xea   : > { %v981_v22 = vand.u32 2147483647, %v980_v20  ;;  %v5266_v62 = vmul.u32.u64.low %v5029_v6, %v5052_v34  ;;  %v5267_v43 = vmul.u32.u64.high %v5029_v6, %v5052_v34, %v5266_v62  ;;  %v5269_v31 = vadd.f32 %v544_v57, %v512_v33 }
  0xeb   : > { %v5271_v61 = vadd.f32 %v545_v54, %v513_v4  ;;  %v5273_v16 = vadd.f32 %v546_v47, %v514_v28  ;;  %v5275_v26 = vadd.f32 %v547_v58, %v515_v2  ;;  %v5280_v13 = vsel %vm5245_vm13, 0, %v5023_v27 }
  0xec   : > { %8238 = vst [vmem:[#allocation48_spill] sm:$0xff] %v5269_v31  ;;  %v984_v46 = vmul.f32 %v983_v8, %v981_v22  ;;  %8242 = vst [vmem:[#allocation52_spill] sm:$0xff] %v5280_v13  ;;  %v5283_v25 = vadd.s32 8, %v4440_v49  ;;  %v1063_v34 = vadd.s32 1, %v5057_v14  ;;  %v2317_v42 = vmin.f32 %v2316_v41, %v5269_v31 }
  0xed   : > { %8239 = vst [vmem:[#allocation49_spill] sm:$0xff] %v5271_v61  ;;  %8240 = vst [vmem:[#allocation50_spill] sm:$0xff] %v5273_v16  ;;  %v2330_v53 = vmin.f32 %v2329_v18, %v5271_v61  ;;  %v2343_v1 = vmin.f32 %v2342_v59, %v5273_v16  ;;  %v2356_v57 = vmin.f32 %v2355_v50, %v5275_v26  ;;  %v5291_v40 = vadd.s32 16, %v4440_v49 }
  0xee   : > { %8241 = vst [vmem:[#allocation51_spill] sm:$0xff] %v5275_v26  ;;  %8243 = vst [vmem:[#allocation53_spill] sm:$0xff] %v5283_v25  ;;  %v985_v54 = vxor.u32 2147483648, %v984_v46  ;;  %v1060_v27 = vmul.u32 %v5029_v6, %v5027_v48  ;;  %vm1062_vm14 = vc.u32 %v5267_v43, %v5056_v60  ;;  %v2318_v7 = vrot.slane %v2317_v42, 4 }
  0xef   : > { %8244 = vst [vmem:[#allocation54_spill] sm:$0xff] %v5291_v40  ;;  %v2331_v47 = vrot.slane %v2330_v53, 4  ;;  %v2344_v58 = vrot.slane %v2343_v1, 4  ;;  %v2357_v41 = vrot.slane %v2356_v57, 4  ;;  %v994_v23 = vadd.s32 3, %v5280_v13 }
  0xf0   : > { %v986_v3 = vsel %vm903_vm2, %v985_v54, %v984_v46  ;;  %v5301_v32 = vadd.s32 24, %v4440_v49  ;;  %v1064_v39 = vsel %vm1062_vm14, %v1063_v34, %v5057_v14  ;;  %v2319_v6 = vmin.f32 %v2317_v42, %v2318_v7 }
  0xf1   : > { %v989_v48 = vsel %vm5245_vm13, %v4388_v11, %v986_v3  ;;  %v2332_v18 = vmin.f32 %v2330_v53, %v2331_v47  ;;  %v2345_v59 = vmin.f32 %v2343_v1, %v2344_v58  ;;  %v2358_v20 = vmin.f32 %v2356_v57, %v2357_v41 }
  0xf2   : > { %8245 = vst [vmem:[#allocation55_spill] sm:$0xff] %v5301_v32  ;;  %4095 = vcosq.f32 %v989_v48  ;;  %v5307_v8 = vadd.s32 %v1064_v39, %v1060_v27  ;;  %v7966_v33 = vand.u32 2147483647, %v4408_v19  ;;  %v2320_v4 = vrot.slane %v2319_v6, 2 }
  0xf3   : > { %4097 = vsinq.f32 %v989_v48  ;;  %v2333_v28 = vrot.slane %v2332_v18, 2  ;;  %v2346_v2 = vrot.slane %v2345_v59, 2  ;;  %v995_v50 = vand.u32 3, %v994_v23 }
  0xf4   : > { %v5311_v14 = vadd.s32 32, %v4440_v49  ;;  %v2359_v22 = vrot.slane %v2358_v20, 2  ;;  %v1066_v45 = vadd.s32 536870912, %v5307_v8  ;;  %v5315_v62 = vadd.s32 40, %v4440_v49 }
  0xf5   : > { %v2321_v46 = vmin.f32 %v2319_v6, %v2320_v4  ;;  %v2334_v34 = vmin.f32 %v2332_v18, %v2333_v28  ;;  %v2347_v42 = vmin.f32 %v2345_v59, %v2346_v2  ;;  %v5318_v53 = vadd.s32 48, %v4440_v49  ;;  %v8255_v4 = vld [vmem:[#allocation25_spill] sm:$0xff]  ;;  %v8256_v28 = vld [vmem:[#allocation26_spill] sm:$0xff]  ;;  %v8257_v2 = vld [vmem:[#allocation27_spill] sm:$0xff] }
  0xf6   : > { %8246 = vst [vmem:[#allocation56_spill] sm:$0xff] %v5311_v14  ;;  %8247 = vst [vmem:[#allocation57_spill] sm:$0xff] %v5315_v62  ;;  %v2360_v1 = vmin.f32 %v2358_v20, %v2359_v22  ;;  %v5320_v57 = vshrl.u32 %v1066_v45, 30  ;;  %v5324_v54 = vand.u32 8388607, %v7966_v33  ;;  %v5328_v27 = vadd.s32 56, %v4440_v49 }
  0xf7   : > { %8248 = vst [vmem:[#allocation58_spill] sm:$0xff] %v5318_v53  ;;  %v2322_v7 = vrot.slane %v2321_v46, 1  ;;  %v2335_v47 = vrot.slane %v2334_v34, 1  ;;  %v2348_v58 = vrot.slane %v2347_v42, 1  ;;  %vm996_vm0 = vcmp.lt.s32.totalorder %v995_v50, 2  ;;  %v8265_v33 = vld [vmem:[#allocation34_spill] sm:$0xff] }
  0xf8   : > { %8249 = vst [vmem:[#allocation59_spill] sm:$0xff] %v5324_v54  ;;  %8250 = vst [vmem:[#allocation60_spill] sm:$0xff] %v5328_v27  ;;  %vm997_vm1 = vcmp.eq.s32.totalorder %v995_v50, 0  ;;  %vm1000_vm2 = vcmp.eq.s32.totalorder %v995_v50, 2  ;;  %v2361_v41 = vrot.slane %v2360_v1, 1  ;;  %v5338_v48 = vadd.s32 %v5056_v60, %v5267_v43  ;;  %v8254_v43 = vld [vmem:[#allocation24_spill] sm:$0xff] }
  0xf9   : > { %v5330_v3 = vmin.f32 %v2321_v46, %v2322_v7  ;;  %v5332_v23 = vmin.f32 %v2334_v34, %v2335_v47  ;;  %v5334_v39 = vmin.f32 %v2347_v42, %v2348_v58  ;;  %v5346_v20 = vshrl.u32 %v8205_v21, %v4634_v44  ;;  %v8259_v46 = vld [vmem:[#allocation28_spill] sm:$0xff]  ;;  %v8260_v34 = vld [vmem:[#allocation29_spill] sm:$0xff]  ;;  %v8261_v42 = vld [vmem:[#allocation30_spill] sm:$0xff] }
  0xfa   : > { %8251 = vst [vmem:[#allocation61_spill] sm:$0xff] %v5338_v48  ;;  %v5340_v6 = vmin.f32 %v2360_v1, %v2361_v41  ;;  %v8262_v7 = vld [vmem:[#allocation31_spill] sm:$0xff]  ;;  %v8263_v47 = vld [vmem:[#allocation32_spill] sm:$0xff]  ;;  %v8264_v58 = vld [vmem:[#allocation33_spill] sm:$0xff] }
  0xfb   : > { %8252 = vst [vmem:[#allocation62_spill] sm:$0xff] %v5346_v20  ;;  %vm2363_vm3 = vcmp.eq.f32.partialorder %v5064_v30, %v5330_v3  ;;  %vm2364_vm4 = vcmp.eq.f32.partialorder %v5078_v5, %v5332_v23  ;;  %vm2365_vm5 = vcmp.eq.f32.partialorder %v5080_v15, %v5334_v39  ;;  %vm2367_vm6 = vcmp.eq.f32.partialorder %v5084_v56, %v5330_v3  ;;  %v8266_v59 = vld [vmem:[#allocation35_spill] sm:$0xff] }
  0xfc   : > { %v5356_v60 = vpop.eup %4095  ;;  %vm2366_vm7 = vcmp.eq.f32.partialorder %v8254_v43, %v5340_v6  ;;  %vm2368_vm8 = vcmp.eq.f32.partialorder %v8255_v4, %v5332_v23  ;;  %vm2371_vm11 = vcmp.eq.f32.partialorder %v8259_v46, %v5330_v3  ;;  %vm2375_vm10 = vcmp.eq.f32.partialorder %v8263_v47, %v5330_v3 }
  0xfd   : > { %8253 = vst [vmem:[#allocation63_spill] sm:$0xff] %v5356_v60  ;;  %v5366_v22 = vpop.eup %4097  ;;  %v7967_v45 = vxor.u32 2147483648, %v5356_v60  ;;  %vm2380_vm9 = vcmp.eq.f32.partialorder %v5174_v38, %v5332_v23  ;;  %vm2383_vm14 = vcmp.eq.f32.partialorder %v5204_v36, %v5330_v3  ;;  %vm2389_vm12 = vcmp.eq.f32.partialorder %v5251_v17, %v5334_v39 }
  0xfe   : > { %8258 = vst [vmem:[#allocation24_spill] sm:$0xff] %v5366_v22  ;;  %v7968_v1 = vxor.u32 2147483648, %v5366_v22  ;;  %vm2393_vm13 = vcmp.eq.f32.partialorder %v5273_v16, %v5334_v39  ;;  %v2400_v19 = vsel %vm2368_vm8, %v5283_v25, 64  ;;  %v2403_v0 = vsel %vm2371_vm11, %v5291_v40, 64 }
  0xff   : > { %v1002_v41 = vsel %vm1000_vm2, %v7967_v45, %v5366_v22  ;;  %vm2392_vm2 = vcmp.eq.f32.partialorder %v5271_v61, %v5332_v23  ;;  %vm8272_vm8 = vcmp.eq.f32.partialorder %v8264_v58, %v5332_v23  ;;  %vm8273_vm11 = vcmp.eq.f32.partialorder %v8265_v33, %v5334_v39 }
 0x100   : > { %v999_v18 = vsel %vm997_vm1, %v5356_v60, %v7968_v1  ;;  %vm2390_vm1 = vcmp.eq.f32.partialorder %v5254_v24, %v5340_v6  ;;  %v2407_v60 = vsel %vm2375_vm10, %v5301_v32, 64  ;;  %v2408_v22 = vsel %vm8272_vm8, %v5301_v32, 64 }
 0x101   : > { %v1003_v45 = vsel %vm996_vm0, %v999_v18, %v1002_v41  ;;  %vm2394_vm0 = vcmp.eq.f32.partialorder %v5275_v26, %v5340_v6  ;;  %v2395_v18 = vsel %vm2363_vm3, %v4440_v49, 64  ;;  %v2398_v41 = vsel %vm2366_vm7, %v4440_v49, 64 }
 0x102   : > { %v1004_v1 = vsel %vm7969_vm15, nan, %v1003_v45  ;;  %vm2391_vm15 = vcmp.eq.f32.partialorder %v5269_v31, %v5330_v3  ;;  %v2396_v45 = vsel %vm2364_vm4, %v4440_v49, 64  ;;  %vm8267_vm3 = vcmp.eq.f32.partialorder %v8256_v28, %v5334_v39 }
 0x103   : > { %v1425_v50 = vadd.f32 %v4647_v10, %v1004_v1  ;;  %v2397_v1 = vsel %vm2365_vm5, %v4440_v49, 64  ;;  %v2401_v55 = vsel %vm8267_vm3, %v5283_v25, 64  ;;  %vm8268_vm4 = vcmp.eq.f32.partialorder %v8257_v2, %v5340_v6 }
 0x104   : > { %v2402_v54 = vsel %vm8268_vm4, %v5283_v25, 64  ;;  %vm8269_vm5 = vcmp.eq.f32.partialorder %v8260_v34, %v5332_v23  ;;  %vm8271_vm7 = vcmp.eq.f32.partialorder %v8262_v7, %v5340_v6  ;;  %v2409_v48 = vsel %vm8273_vm11, %v5301_v32, 64 }
 0x105   : > { %3392 = vperm.xlu1 %4077, %v1425_v50   ;;  %v2399_v50 = vsel %vm2367_vm6, %v5283_v25, 64  ;;  %v2404_v20 = vsel %vm8269_vm5, %v5291_v40, 64  ;;  %vm8270_vm6 = vcmp.eq.f32.partialorder %v8261_v42, %v5334_v39  ;;  %v2406_v10 = vsel %vm8271_vm7, %v5291_v40, 64 }
 0x106   : > { %v2405_v11 = vsel %vm8270_vm6, %v5291_v40, 64  ;;  %vm8274_vm3 = vcmp.eq.f32.partialorder %v8266_v59, %v5340_v6  ;;  %vm8275_vm4 = vcmp.eq.f32.partialorder %v5164_v12, %v5330_v3  ;;  %v2412_v58 = vsel %vm2380_vm9, %v5311_v14, 64 }
 0x107   : > { %v2410_v13 = vsel %vm8274_vm3, %v5301_v32, 64  ;;  %v2411_v47 = vsel %vm8275_vm4, %v5311_v14, 64  ;;  %vm8276_vm10 = vcmp.eq.f32.partialorder %v5176_v52, %v5334_v39  ;;  %vm8277_vm5 = vcmp.eq.f32.partialorder %v5178_v37, %v5340_v6 }
 0x108   : > { %v2413_v33 = vsel %vm8276_vm10, %v5311_v14, 64  ;;  %v2414_v59 = vsel %vm8277_vm5, %v5311_v14, 64  ;;  %v2415_v12 = vsel %vm2383_vm14, %v5315_v62, 64  ;;  %vm8278_vm6 = vcmp.eq.f32.partialorder %v5215_v35, %v5332_v23 }
 0x109   : > { %v2416_v38 = vsel %vm8278_vm6, %v5315_v62, 64  ;;  %vm8279_vm9 = vcmp.eq.f32.partialorder %v5217_v29, %v5334_v39  ;;  %vm8280_vm7 = vcmp.eq.f32.partialorder %v5219_v63, %v5340_v6  ;;  %vm8281_vm8 = vcmp.eq.f32.partialorder %v5240_v9, %v5330_v3 }
 0x10a   : > { %v2417_v52 = vsel %vm8279_vm9, %v5315_v62, 64  ;;  %v2418_v37 = vsel %vm8280_vm7, %v5315_v62, 64  ;;  %v2419_v36 = vsel %vm8281_vm8, %v5318_v53, 64  ;;  %vm8282_vm14 = vcmp.eq.f32.partialorder %v5249_v51, %v5332_v23 }
 0x10b   : > { %v2420_v35 = vsel %vm8282_vm14, %v5318_v53, 64  ;;  %v2421_v29 = vsel %vm2389_vm12, %v5318_v53, 64  ;;  %v2422_v63 = vsel %vm2390_vm1, %v5318_v53, 64  ;;  %v2423_v9 = vsel %vm2391_vm15, %v5328_v27, 64 }
 0x10c   : > { %v2424_v51 = vsel %vm2392_vm2, %v5328_v27, 64  ;;  %v2425_v17 = vsel %vm2393_vm13, %v5328_v27, 64  ;;  %v2426_v24 = vsel %vm2394_vm0, %v5328_v27, 64  ;;  %vm2427_vm12 = vcmp.lt.s32.totalorder %v2395_v18, %v2399_v50 }
 0x10d   : > { %v2428_v7 = vsel %vm2427_vm12, %v2395_v18, %v2399_v50  ;;  %vm2450_vm1 = vcmp.lt.s32.totalorder %v2396_v45, %v2400_v19  ;;  %vm2473_vm11 = vcmp.lt.s32.totalorder %v2397_v1, %v2401_v55  ;;  %vm2496_vm15 = vcmp.lt.s32.totalorder %v2398_v41, %v2402_v54 }
 0x10e   : > { %vm2429_vm3 = vcmp.lt.s32.totalorder %v2428_v7, %v2403_v0  ;;  %v2451_v31 = vsel %vm2450_vm1, %v2396_v45, %v2400_v19  ;;  %v2474_v42 = vsel %vm2473_vm11, %v2397_v1, %v2401_v55  ;;  %v2497_v61 = vsel %vm2496_vm15, %v2398_v41, %v2402_v54  ;;  %v8284_v45 = vld [vmem:[#allocation19_spill] sm:$0xff] }
 0x10f   : > { %v2430_v34 = vsel %vm2429_vm3, %v2428_v7, %v2403_v0  ;;  %vm2452_vm2 = vcmp.lt.s32.totalorder %v2451_v31, %v2404_v20  ;;  %vm2475_vm4 = vcmp.lt.s32.totalorder %v2474_v42, %v2405_v11  ;;  %vm2498_vm10 = vcmp.lt.s32.totalorder %v2497_v61, %v2406_v10 }
 0x110   : > { %vm2431_vm5 = vcmp.lt.s32.totalorder %v2430_v34, %v2407_v60  ;;  %v2453_v16 = vsel %vm2452_vm2, %v2451_v31, %v2404_v20  ;;  %v2476_v46 = vsel %vm2475_vm4, %v2474_v42, %v2405_v11  ;;  %v2499_v2 = vsel %vm2498_vm10, %v2497_v61, %v2406_v10 }
 0x111   : > { %v2432_v28 = vsel %vm2431_vm5, %v2430_v34, %v2407_v60  ;;  %vm2454_vm13 = vcmp.lt.s32.totalorder %v2453_v16, %v2408_v22  ;;  %vm2477_vm0 = vcmp.lt.s32.totalorder %v2476_v46, %v2409_v48  ;;  %vm2500_vm6 = vcmp.lt.s32.totalorder %v2499_v2, %v2410_v13 }
 0x112   : > { %vm2433_vm9 = vcmp.lt.s32.totalorder %v2432_v28, %v2411_v47  ;;  %v2455_v18 = vsel %vm2454_vm13, %v2453_v16, %v2408_v22  ;;  %v2478_v50 = vsel %vm2477_vm0, %v2476_v46, %v2409_v48  ;;  %v2501_v26 = vsel %vm2500_vm6, %v2499_v2, %v2410_v13 }
 0x113   : > { %v2434_v4 = vsel %vm2433_vm9, %v2432_v28, %v2411_v47  ;;  %vm2456_vm7 = vcmp.lt.s32.totalorder %v2455_v18, %v2412_v58  ;;  %vm2479_vm8 = vcmp.lt.s32.totalorder %v2478_v50, %v2413_v33  ;;  %vm2502_vm14 = vcmp.lt.s32.totalorder %v2501_v26, %v2414_v59 }
 0x114   : > { %vm2435_vm12 = vcmp.lt.s32.totalorder %v2434_v4, %v2415_v12  ;;  %v2457_v19 = vsel %vm2456_vm7, %v2455_v18, %v2412_v58  ;;  %v2480_v0 = vsel %vm2479_vm8, %v2478_v50, %v2413_v33  ;;  %v2503_v55 = vsel %vm2502_vm14, %v2501_v26, %v2414_v59 }
 0x115   : > { %v2436_v54 = vsel %vm2435_vm12, %v2434_v4, %v2415_v12  ;;  %vm2458_vm1 = vcmp.lt.s32.totalorder %v2457_v19, %v2416_v38  ;;  %vm2481_vm11 = vcmp.lt.s32.totalorder %v2480_v0, %v2417_v52  ;;  %vm2504_vm15 = vcmp.lt.s32.totalorder %v2503_v55, %v2418_v37 }
 0x116   : > { %vm2437_vm3 = vcmp.lt.s32.totalorder %v2436_v54, %v2419_v36  ;;  %v2459_v11 = vsel %vm2458_vm1, %v2457_v19, %v2416_v38  ;;  %v2482_v10 = vsel %vm2481_vm11, %v2480_v0, %v2417_v52  ;;  %v2505_v31 = vsel %vm2504_vm15, %v2503_v55, %v2418_v37 }
 0x117   : > { %v2438_v61 = vsel %vm2437_vm3, %v2436_v54, %v2419_v36  ;;  %vm2460_vm2 = vcmp.lt.s32.totalorder %v2459_v11, %v2420_v35  ;;  %vm2483_vm4 = vcmp.lt.s32.totalorder %v2482_v10, %v2421_v29  ;;  %vm2506_vm10 = vcmp.lt.s32.totalorder %v2505_v31, %v2422_v63 }
 0x118   : > { %vm2439_vm5 = vcmp.lt.s32.totalorder %v2438_v61, %v2423_v9  ;;  %v2461_v16 = vsel %vm2460_vm2, %v2459_v11, %v2420_v35  ;;  %v2484_v13 = vsel %vm2483_vm4, %v2482_v10, %v2421_v29  ;;  %v2507_v48 = vsel %vm2506_vm10, %v2505_v31, %v2422_v63 }
 0x119   : > { %v2440_v20 = vsel %vm2439_vm5, %v2438_v61, %v2423_v9  ;;  %vm2462_vm13 = vcmp.lt.s32.totalorder %v2461_v16, %v2424_v51  ;;  %vm2485_vm0 = vcmp.lt.s32.totalorder %v2484_v13, %v2425_v17  ;;  %vm2508_vm6 = vcmp.lt.s32.totalorder %v2507_v48, %v2426_v24 }
 0x11a   : > { %v2441_v12 = vrot.slane %v2440_v20, 4  ;;  %v2463_v26 = vsel %vm2462_vm13, %v2461_v16, %v2424_v51  ;;  %v2486_v33 = vsel %vm2485_vm0, %v2484_v13, %v2425_v17  ;;  %v2509_v59 = vsel %vm2508_vm6, %v2507_v48, %v2426_v24 }
 0x11b   : > { %v2464_v60 = vrot.slane %v2463_v26, 4  ;;  %v2487_v38 = vrot.slane %v2486_v33, 4  ;;  %v2510_v52 = vrot.slane %v2509_v59, 4  ;;  %v2551_v37 = vmax.f32 %v5330_v3, 1e-16 }
 0x11c   : > { %vm2442_vm9 = vcmp.lt.s32.totalorder %v2440_v20, %v2441_v12  ;;  %v2552_v36 = vmax.f32 %v5332_v23, 1e-16  ;;  %v2553_v35 = vmax.f32 %v5334_v39, 1e-16  ;;  %v8283_v29 = vshll.u32 %v5320_v57, 30 }
 0x11d   : > { %v2443_v9 = vsel %vm2442_vm9, %v2440_v20, %v2441_v12  ;;  %vm2465_vm7 = vcmp.lt.s32.totalorder %v2463_v26, %v2464_v60  ;;  %vm2488_vm8 = vcmp.lt.s32.totalorder %v2486_v33, %v2487_v38  ;;  %vm2511_vm14 = vcmp.lt.s32.totalorder %v2509_v59, %v2510_v52 }
 0x11e   : > { %v5564_v63 = vsub.s32 %v5307_v8, %v8283_v29  ;;  %v2444_v51 = vrot.slane %v2443_v9, 2  ;;  %v2466_v17 = vsel %vm2465_vm7, %v2463_v26, %v2464_v60  ;;  %v2489_v24 = vsel %vm2488_vm8, %v2486_v33, %v2487_v38 }
 0x11f   : > { %v2512_v4 = vsel %vm2511_vm14, %v2509_v59, %v2510_v52  ;;  %v2467_v28 = vrot.slane %v2466_v17, 2  ;;  %v2490_v3 = vrot.slane %v2489_v24, 2  ;;  %4099 = vrcp.f32 %v2551_v37 }
 0x120   : > { %v2513_v2 = vrot.slane %v2512_v4, 2  ;;  %vm2445_vm12 = vcmp.lt.s32.totalorder %v2443_v9, %v2444_v51  ;;  %v2554_v23 = vmax.f32 %v5340_v6, 1e-16  ;;  %4101 = vrcp.f32 %v2552_v36 }
 0x121   : > { %v1071_v39 = vsub.s32 0, %v5564_v63  ;;  %v2446_v8 = vsel %vm2445_vm12, %v2443_v9, %v2444_v51  ;;  %vm2468_vm1 = vcmp.lt.s32.totalorder %v2466_v17, %v2467_v28  ;;  %vm2491_vm11 = vcmp.lt.s32.totalorder %v2489_v24, %v2490_v3  ;;  %v8309_v9 = vld [vmem:[#allocation29_spill] sm:$0xff] }
 0x122   : > { %vm2514_vm15 = vcmp.lt.s32.totalorder %v2512_v4, %v2513_v2  ;;  %v2447_v22 = vrot.slane %v2446_v8, 1  ;;  %v2469_v46 = vsel %vm2468_vm1, %v2466_v17, %v2467_v28  ;;  %v2492_v34 = vsel %vm2491_vm11, %v2489_v24, %v2490_v3  ;;  %v8312_v17 = vld [vmem:[#allocation30_spill] sm:$0xff]  ;;  %v8318_v3 = vld [vmem:[#allocation32_spill] sm:$0xff] }
 0x123   : > { %v2515_v42 = vsel %vm2514_vm15, %v2512_v4, %v2513_v2  ;;  %v2470_v7 = vrot.slane %v2469_v46, 1  ;;  %v2493_v47 = vrot.slane %v2492_v34, 1  ;;  %4103 = vrcp.f32 %v2553_v35  ;;  %v8315_v4 = vld [vmem:[#allocation31_spill] sm:$0xff] }
 0x124   : > { %v2516_v58 = vrot.slane %v2515_v42, 1  ;;  %vm2448_vm3 = vcmp.lt.s32.totalorder %v2446_v8, %v2447_v22  ;;  %4105 = vrcp.f32 %v2554_v23  ;;  %v5570_v6 = vshll.u32 %v8205_v21, %v8284_v45  ;;  %v8321_v23 = vld [vmem:[#allocation33_spill] sm:$0xff] }
 0x125   : > { %v8285_v1 = vmov 2475754826   ;;  %v5576_v18 = vsel %vm2448_vm3, %v2446_v8, %v2447_v22  ;;  %vm2471_vm2 = vcmp.lt.s32.totalorder %v2469_v46, %v2470_v7  ;;  %vm2494_vm4 = vcmp.lt.s32.totalorder %v2492_v34, %v2493_v47  ;;  %v8324_v8 = vld [vmem:[#allocation34_spill] sm:$0xff] }
 0x126   : > { %v5574_v41 = vshrl.u32 %v8285_v1, %v4634_v44  ;;  %8286 = vst [vmem:[#allocation19_spill] sm:$0xff] %v5576_v18  ;;  %vm2517_vm10 = vcmp.lt.s32.totalorder %v2515_v42, %v2516_v58  ;;  %v5578_v50 = vsel %vm2471_vm2, %v2469_v46, %v2470_v7  ;;  %v5580_v19 = vsel %vm2494_vm4, %v2492_v34, %v2493_v47  ;;  %v8326_v46 = vld [vmem:[#allocation35_spill] sm:$0xff]  ;;  %v8332_v47 = vld [vmem:[#allocation37_spill] sm:$0xff] }
 0x127   : > { %8287 = vst [vmem:[#allocation64_spill] sm:$0xff] %v5578_v50  ;;  %8288 = vst [vmem:[#allocation65_spill] sm:$0xff] %v5580_v19  ;;  %v5582_v0 = vsel %vm2517_vm10, %v2515_v42, %v2516_v58  ;;  %v5586_v55 = vshll.u32 %v8285_v1, %v8284_v45  ;;  %vm8073_vm5 = vcmp.eq.s32.totalorder %v4440_v49, %v5576_v18  ;;  %v8290_v10 = vmov 2131351028   ;;  %v8329_v42 = vld [vmem:[#allocation36_spill] sm:$0xff] }
 0x128   : > { %8289 = vst [vmem:[#allocation66_spill] sm:$0xff] %v5582_v0  ;;  %v5591_v54 = vmin.u32 %v1071_v39, %v5564_v63  ;;  %v5596_v31 = vshrl.u32 %v8290_v10, %v4634_v44  ;;  %vm8072_vm13 = vcmp.eq.s32.totalorder %v4440_v49, %v5578_v50  ;;  %vm8071_vm0 = vcmp.eq.s32.totalorder %v4440_v49, %v5580_v19 }
 0x129   : > { %vm8070_vm6 = vcmp.eq.s32.totalorder %v4440_v49, %v5582_v0  ;;  %vm8069_vm9 = vcmp.eq.s32.totalorder %v5283_v25, %v5576_v18  ;;  %v5606_v61 = vpop.eup %4099  ;;  %vm8012_vm7 = vcmp.eq.s32.totalorder %v5283_v25, %v5578_v50  ;;  %vm8013_vm8 = vcmp.eq.s32.totalorder %v5283_v25, %v5580_v19 }
 0x12a   : > { %8291 = vst [vmem:[#allocation67_spill] sm:$0xff] %v5606_v61  ;;  %vm8014_vm14 = vcmp.eq.s32.totalorder %v5283_v25, %v5582_v0  ;;  %vm8015_vm12 = vcmp.eq.s32.totalorder %v5291_v40, %v5576_v18  ;;  %v5616_v16 = vpop.eup %4101  ;;  %vm8068_vm4 = vcmp.eq.s32.totalorder %v5301_v32, %v5580_v19  ;;  %vm8067_vm1 = vcmp.eq.s32.totalorder %v5315_v62, %v5580_v19 }
 0x12b   : > { %8292 = vst [vmem:[#allocation68_spill] sm:$0xff] %v5616_v16  ;;  %vm8010_vm15 = vcmp.eq.s32.totalorder %v5328_v27, %v5576_v18  ;;  %vm8011_vm3 = vcmp.eq.s32.totalorder %v5328_v27, %v5578_v50  ;;  %vm2549_vm2 = vcmp.eq.s32.totalorder %v5328_v27, %v5580_v19  ;;  %vm2550_vm10 = vcmp.eq.s32.totalorder %v5328_v27, %v5582_v0 }
 0x12c   : > { %v5664_v20 = vsel %vm8010_vm15, %v5606_v61, 0.0  ;;  %v5672_v12 = vsel %vm8011_vm3, %v5616_v16, 0.0  ;;  %vm8066_vm15 = vcmp.eq.s32.totalorder %v5318_v53, %v5578_v50  ;;  %vm8065_vm11 = vcmp.eq.s32.totalorder %v5318_v53, %v5580_v19  ;;  %v8367_v16 = vld [vmem:[#allocation21_spill] sm:$0xff] }
 0x12d   : > { %v5642_v13 = vpop.eup %4103  ;;  %8295 = vst [vmem:[#allocation71_spill] sm:$0xff] %v5664_v20  ;;  %8296 = vst [vmem:[#allocation72_spill] sm:$0xff] %v5672_v12  ;;  %vm8062_vm3 = vcmp.eq.s32.totalorder %v5318_v53, %v5582_v0  ;;  %v5696_v59 = vsel %vm8073_vm5, inf, %v5064_v30  ;;  %v5702_v60 = vsel %vm8072_vm13, inf, %v5078_v5  ;;  %v5708_v38 = vsel %vm8071_vm0, inf, %v5080_v15  ;;  %v8301_v5 = vld [vmem:[#allocation25_spill] sm:$0xff] }
 0x12e   : > { %8293 = vst [vmem:[#allocation69_spill] sm:$0xff] %v5642_v13  ;;  %v5652_v48 = vpop.eup %4105  ;;  %v5678_v26 = vsel %vm2549_vm2, %v5642_v13, 0.0  ;;  %v5714_v52 = vsel %vm8070_vm6, inf, %v8254_v43  ;;  %v5720_v30 = vsel %vm8069_vm9, inf, %v5084_v56  ;;  %v5726_v37 = vsel %vm8012_vm7, inf, %v8301_v5  ;;  %v8303_v15 = vld [vmem:[#allocation26_spill] sm:$0xff] }
 0x12f   : > { %8294 = vst [vmem:[#allocation70_spill] sm:$0xff] %v5652_v48  ;;  %8297 = vst [vmem:[#allocation73_spill] sm:$0xff] %v5678_v26  ;;  %v5684_v33 = vsel %vm2550_vm10, %v5652_v48, 0.0  ;;  %v5732_v36 = vsel %vm8013_vm8, inf, %v8303_v15  ;;  %v8305_v43 = vld [vmem:[#allocation27_spill] sm:$0xff]  ;;  %v8307_v56 = vld [vmem:[#allocation28_spill] sm:$0xff]  ;;  %vm8310_vm7 = vcmp.eq.s32.totalorder %v5291_v40, %v5578_v50  ;;  %vm8313_vm8 = vcmp.eq.s32.totalorder %v5291_v40, %v5580_v19 }
 0x130   : > { %8298 = vst [vmem:[#allocation74_spill] sm:$0xff] %v5684_v33  ;;  %8299 = vst [vmem:[#allocation75_spill] sm:$0xff] %v5714_v52  ;;  %v5738_v35 = vsel %vm8014_vm14, inf, %v8305_v43  ;;  %v5744_v29 = vsel %vm8015_vm12, inf, %v8307_v56  ;;  %v5750_v51 = vsel %vm8310_vm7, inf, %v8309_v9  ;;  %v5756_v24 = vsel %vm8313_vm8, inf, %v8312_v17 }
 0x131   : > { %8300 = vst [vmem:[#allocation76_spill] sm:$0xff] %v5720_v30  ;;  %8302 = vst [vmem:[#allocation25_spill] sm:$0xff] %v5726_v37  ;;  %vm8316_vm14 = vcmp.eq.s32.totalorder %v5291_v40, %v5582_v0  ;;  %vm8319_vm12 = vcmp.eq.s32.totalorder %v5301_v32, %v5576_v18  ;;  %vm8322_vm7 = vcmp.eq.s32.totalorder %v5301_v32, %v5578_v50  ;;  %v5780_v22 = vsel %vm8068_vm4, inf, %v8324_v8  ;;  %v8335_v5 = vld [vmem:[#allocation38_spill] sm:$0xff]  ;;  %v8338_v43 = vld [vmem:[#allocation39_spill] sm:$0xff] }
 0x132   : > { %8304 = vst [vmem:[#allocation26_spill] sm:$0xff] %v5732_v36  ;;  %8306 = vst [vmem:[#allocation27_spill] sm:$0xff] %v5738_v35  ;;  %v5762_v28 = vsel %vm8316_vm14, inf, %v8315_v4  ;;  %v5768_v2 = vsel %vm8319_vm12, inf, %v8318_v3  ;;  %v5774_v39 = vsel %vm8322_vm7, inf, %v8321_v23  ;;  %vm8327_vm8 = vcmp.eq.s32.totalorder %v5301_v32, %v5582_v0  ;;  %v8341_v9 = vld [vmem:[#allocation40_spill] sm:$0xff] }
 0x133   : > { %8308 = vst [vmem:[#allocation28_spill] sm:$0xff] %v5744_v29  ;;  %8311 = vst [vmem:[#allocation29_spill] sm:$0xff] %v5750_v51  ;;  %v5786_v34 = vsel %vm8327_vm8, inf, %v8326_v46  ;;  %vm8330_vm14 = vcmp.eq.s32.totalorder %v5311_v14, %v5576_v18  ;;  %vm8333_vm12 = vcmp.eq.s32.totalorder %v5311_v14, %v5578_v50  ;;  %vm8336_vm7 = vcmp.eq.s32.totalorder %v5311_v14, %v5580_v19  ;;  %v8344_v4 = vld [vmem:[#allocation41_spill] sm:$0xff]  ;;  %v8347_v23 = vld [vmem:[#allocation42_spill] sm:$0xff] }
 0x134   : > { %8314 = vst [vmem:[#allocation30_spill] sm:$0xff] %v5756_v24  ;;  %8317 = vst [vmem:[#allocation31_spill] sm:$0xff] %v5762_v28  ;;  %v5792_v7 = vsel %vm8330_vm14, inf, %v8329_v42  ;;  %v5798_v58 = vsel %vm8333_vm12, inf, %v8332_v47  ;;  %v5804_v15 = vsel %vm8336_vm7, inf, %v8335_v5  ;;  %vm8339_vm8 = vcmp.eq.s32.totalorder %v5311_v14, %v5582_v0  ;;  %v8349_v46 = vld [vmem:[#allocation43_spill] sm:$0xff] }
 0x135   : > { %8320 = vst [vmem:[#allocation32_spill] sm:$0xff] %v5768_v2  ;;  %8323 = vst [vmem:[#allocation33_spill] sm:$0xff] %v5774_v39  ;;  %v5810_v56 = vsel %vm8339_vm8, inf, %v8338_v43  ;;  %vm8342_vm14 = vcmp.eq.s32.totalorder %v5315_v62, %v5576_v18  ;;  %vm8345_vm12 = vcmp.eq.s32.totalorder %v5315_v62, %v5578_v50  ;;  %v5828_v8 = vsel %vm8067_vm1, inf, %v8347_v23  ;;  %v8352_v47 = vld [vmem:[#allocation44_spill] sm:$0xff]  ;;  %v8355_v43 = vld [vmem:[#allocation45_spill] sm:$0xff] }
 0x136   : > { %8325 = vst [vmem:[#allocation34_spill] sm:$0xff] %v5780_v22  ;;  %8328 = vst [vmem:[#allocation35_spill] sm:$0xff] %v5786_v34  ;;  %v5816_v17 = vsel %vm8342_vm14, inf, %v8341_v9  ;;  %v5822_v3 = vsel %vm8345_vm12, inf, %v8344_v4  ;;  %vm8350_vm7 = vcmp.eq.s32.totalorder %v5315_v62, %v5582_v0  ;;  %vm8353_vm8 = vcmp.eq.s32.totalorder %v5318_v53, %v5576_v18  ;;  %v8357_v4 = vld [vmem:[#allocation46_spill] sm:$0xff]  ;;  %v8361_v12 = vld [vmem:[#allocation48_spill] sm:$0xff] }
 0x137   : > { %8331 = vst [vmem:[#allocation36_spill] sm:$0xff] %v5792_v7  ;;  %8334 = vst [vmem:[#allocation37_spill] sm:$0xff] %v5798_v58  ;;  %v5834_v42 = vsel %vm8350_vm7, inf, %v8349_v46  ;;  %v5840_v5 = vsel %vm8353_vm8, inf, %v8352_v47  ;;  %v5846_v9 = vsel %vm8066_vm15, inf, %v8355_v43  ;;  %v5852_v23 = vsel %vm8065_vm11, inf, %v8357_v4 }
 0x138   : > { %8337 = vst [vmem:[#allocation38_spill] sm:$0xff] %v5804_v15  ;;  %8340 = vst [vmem:[#allocation39_spill] sm:$0xff] %v5810_v56  ;;  %v8359_v46 = vld [vmem:[#allocation47_spill] sm:$0xff]  ;;  %v2659_v47 = vmin.f32 %v5696_v59, %v5720_v30  ;;  %v2672_v33 = vmin.f32 %v5702_v60, %v5726_v37  ;;  %v2685_v43 = vmin.f32 %v5708_v38, %v5732_v36  ;;  %v1073_v4 = vclz %v5591_v54  ;;  %v8364_v20 = vld [vmem:[#allocation49_spill] sm:$0xff] }
 0x139   : > { %8343 = vst [vmem:[#allocation40_spill] sm:$0xff] %v5816_v17  ;;  %8346 = vst [vmem:[#allocation41_spill] sm:$0xff] %v5822_v3  ;;  %v5858_v11 = vsel %vm8062_vm3, inf, %v8359_v46  ;;  %v2698_v26 = vmin.f32 %v5714_v52, %v5738_v35  ;;  %vm8362_vm14 = vcmp.eq.s32.totalorder %v5328_v27, %v5576_v18  ;;  %vm8365_vm12 = vcmp.eq.s32.totalorder %v5328_v27, %v5578_v50  ;;  %v8368_v18 = vld [vmem:[#allocation50_spill] sm:$0xff]  ;;  %v8370_v50 = vld [vmem:[#allocation51_spill] sm:$0xff] }
 0x13a   : > { %8348 = vst [vmem:[#allocation42_spill] sm:$0xff] %v5828_v8  ;;  %8351 = vst [vmem:[#allocation43_spill] sm:$0xff] %v5834_v42  ;;  %v5873_v46 = vsel %vm8362_vm14, inf, %v8361_v12  ;;  %v5879_v48 = vsel %vm8365_vm12, inf, %v8364_v20  ;;  %v2660_v13 = vmin.f32 %v2659_v47, %v5744_v29  ;;  %v1523_v61 = vand.u32 3, %v8367_v16  ;;  %v8373_v62 = vld [vmem:[#allocation23_spill] sm:$0xff] }
 0x13b   : > { %8354 = vst [vmem:[#allocation44_spill] sm:$0xff] %v5840_v5  ;;  %8356 = vst [vmem:[#allocation45_spill] sm:$0xff] %v5846_v9  ;;  %v2673_v1 = vmin.f32 %v2672_v33, %v5750_v51  ;;  %v2686_v54 = vmin.f32 %v2685_v43, %v5756_v24  ;;  %v2699_v21 = vmin.f32 %v2698_v26, %v5762_v28  ;;  %v3920_v53 = vadd.s32 4294967294, %v1073_v4  ;;  %v8372_v33 = vld [vmem:[#allocation52_spill] sm:$0xff]  ;;  %v8375_v14 = vld [vmem:[#allocation22_spill] sm:$0xff] }
 0x13c   : > { %8358 = vst [vmem:[#allocation46_spill] sm:$0xff] %v5852_v23  ;;  %8360 = vst [vmem:[#allocation47_spill] sm:$0xff] %v5858_v11  ;;  %v5890_v12 = vsel %vm2549_vm2, inf, %v8368_v18  ;;  %v5896_v20 = vsel %vm2550_vm10, inf, %v8370_v50  ;;  %v2661_v16 = vmin.f32 %v2660_v13, %v5768_v2  ;;  %v1832_v47 = vand.u32 3, %v8372_v33  ;;  %v8376_v40 = vld [vmem:[#allocation11_spill] sm:$0xff] }
 0x13d   : > { %8363 = vst [vmem:[#allocation48_spill] sm:$0xff] %v5873_v46  ;;  %8366 = vst [vmem:[#allocation49_spill] sm:$0xff] %v5879_v48  ;;  %v2674_v43 = vmin.f32 %v2673_v1, %v5774_v39  ;;  %v2687_v26 = vmin.f32 %v2686_v54, %v5780_v22  ;;  %v2700_v4 = vmin.f32 %v2699_v21, %v5786_v34  ;;  %vm3921_vm7 = vcmp.lt.s32.totalorder %v3920_v53, 0 }
 0x13e   : > { %8369 = vst [vmem:[#allocation21_spill] sm:$0xff] %v5890_v12  ;;  %8371 = vst [vmem:[#allocation50_spill] sm:$0xff] %v5896_v20  ;;  %v2662_v18 = vmin.f32 %v2661_v16, %v5792_v7  ;;  %v1076_v19 = vsel %vm3921_vm7, 0, %v3920_v53  ;;  %vm1524_vm2 = vcmp.lt.s32.totalorder %v1523_v61, 2  ;;  %vm1525_vm8 = vcmp.eq.s32.totalorder %v1523_v61, 0 }
 0x13f   : > { %v2675_v0 = vmin.f32 %v2674_v43, %v5798_v58  ;;  %v2688_v50 = vmin.f32 %v2687_v26, %v5804_v15  ;;  %v2701_v13 = vmin.f32 %v2700_v4, %v5810_v56  ;;  %v1077_v27 = vsub.s32 32, %v1076_v19  ;;  %v8377_v26 = vld [vmem:[#allocation61_spill] sm:$0xff] }
 0x140   : > { %v2663_v33 = vmin.f32 %v2662_v18, %v5816_v17  ;;  %v1078_v1 = vshll.u32 %v5564_v63, %v1076_v19  ;;  %v1081_v54 = vsub.s32 4294967266, %v1076_v19  ;;  %v8374_v21 = vxor.u32 2147483648, %v8373_v62 }
 0x141   : > { %v2676_v53 = vmin.f32 %v2675_v0, %v5822_v3  ;;  %v2689_v16 = vmin.f32 %v2688_v50, %v5828_v8  ;;  %v2702_v43 = vmin.f32 %v2701_v13, %v5834_v42  ;;  %vm1007_vm10 = vcmp.lt.s32.totalorder %v8376_v40, 0 }
 0x142   : > { %v1527_v32 = vsel %vm1525_vm8, %v8375_v14, %v8374_v21  ;;  %v1079_v4 = vshrl.u32 %v8377_v26, %v1077_v27  ;;  %v2664_v25 = vmin.f32 %v2663_v33, %v5840_v5  ;;  %v1082_v18 = vadd.s32 127, %v1081_v54  ;;  %v8400_v49 = vld [vmem:[#allocation45_spill] sm:$0xff] }
 0x143   : > { %vm1528_vm14 = vcmp.eq.s32.totalorder %v1523_v61, 2  ;;  %vm1833_vm12 = vcmp.lt.s32.totalorder %v1832_v47, 2  ;;  %v2677_v63 = vmin.f32 %v2676_v53, %v5846_v9  ;;  %v2690_v19 = vmin.f32 %v2689_v16, %v5852_v23 }
 0x144   : > { %v2703_v21 = vmin.f32 %v2702_v43, %v5858_v11  ;;  %v1080_v0 = vor.u32 %v1079_v4, %v1078_v1  ;;  %v2665_v50 = vmin.f32 %v2664_v25, %v5873_v46  ;;  %v8378_v13 = vand.u32 2147483647, %v8376_v40  ;;  %v8384_v11 = vld [vmem:[#allocation63_spill] sm:$0xff] }
 0x145   : > { %v1083_v27 = vshll.u32 %v1082_v18, 23  ;;  %v8381_v33 = vxor.u32 2147483648, %v8375_v14  ;;  %vm1834_vm8 = vcmp.eq.s32.totalorder %v1832_v47, 0  ;;  %v2678_v53 = vmin.f32 %v2677_v63, %v5879_v48 }
 0x146   : > { %vm5924_vm7 = vcmp.le.f32.partialorder %v8378_v13, 0.7853982  ;;  %v2691_v16 = vmin.f32 %v2690_v19, %v5890_v12  ;;  %v2704_v1 = vmin.f32 %v2703_v21, %v5896_v20  ;;  %v1087_v43 = vcvt.s32.f32 %v1080_v0  ;;  %v8382_v13 = vld [vmem:[#allocation24_spill] sm:$0xff] }
 0x147   : > { %v1530_v54 = vsel %vm1528_vm14, %v8381_v33, %v8373_v62  ;;  %v2666_v25 = vrot.slane %v2665_v50, 4  ;;  %v1084_v26 = vor.u32 4788187, %v1083_v27  ;;  %v8383_v46 = vxor.u32 2147483648, %v8382_v13  ;;  %v8385_v62 = vld [vmem:[#allocation9_spill] sm:$0xff]  ;;  %v8387_v19 = vld [vmem:[#allocation20_spill] sm:$0xff] }
 0x148   : > { %v1531_v4 = vsel %vm1524_vm2, %v1527_v32, %v1530_v54  ;;  %v2679_v23 = vrot.slane %v2678_v53, 4  ;;  %v2692_v9 = vrot.slane %v2691_v16, 4  ;;  %v2705_v14 = vrot.slane %v2704_v1, 4 }
 0x149   : > { %v1836_v18 = vsel %vm1834_vm8, %v8384_v11, %v8383_v46  ;;  %vm8386_vm14 = vweird.f32 %v8385_v62  ;;  %v2667_v63 = vmin.f32 %v2665_v50, %v2666_v25  ;;  %v1085_v48 = vand.u32 2147483647, %v1084_v26 }
 0x14a   : > { %v1532_v33 = vsel %vm8386_vm14, nan, %v1531_v4  ;;  %vm1837_vm3 = vcmp.eq.s32.totalorder %v1832_v47, 2  ;;  %v2680_v21 = vmin.f32 %v2678_v53, %v2679_v23  ;;  %v2693_v0 = vmin.f32 %v2691_v16, %v2692_v9  ;;  %v8390_v9 = vld [vmem:[#allocation10_spill] sm:$0xff] }
 0x14b   : > { %v2254_v12 = vmul.f32 %v1532_v33, %v8387_v19  ;;  %v2706_v27 = vmin.f32 %v2704_v1, %v2705_v14  ;;  %v8388_v32 = vxor.u32 2147483648, %v8384_v11  ;;  %v2668_v54 = vrot.slane %v2667_v63, 2 }
 0x14c   : > { %v1088_v46 = vmul.f32 %v1087_v43, %v1085_v48  ;;  %v8389_v20 = vsub.s32 4, %v5320_v57  ;;  %v2681_v25 = vrot.slane %v2680_v21, 2  ;;  %v2694_v26 = vrot.slane %v2693_v0, 2 }
 0x14d   : > { %v1839_v61 = vsel %vm1837_vm3, %v8388_v32, %v8382_v13  ;;  %3501 = vperm.xlu0 %4073, %v2254_v12   ;;  %v2707_v23 = vrot.slane %v2706_v27, 2  ;;  %vm8391_vm2 = vweird.f32 %v8390_v9  ;;  %v2669_v16 = vmin.f32 %v2667_v63, %v2668_v54  ;;  %v8402_v54 = vld [vmem:[#allocation47_spill] sm:$0xff] }
 0x14e   : > { %v1092_v4 = vsel %vm1007_vm10, %v8389_v20, %v5320_v57  ;;  %v1840_v50 = vsel %vm1833_vm12, %v1836_v18, %v1839_v61  ;;  %v1089_v11 = vxor.u32 2147483648, %v1088_v46  ;;  %v5955_v48 = vor.u32 %v5574_v41, %v5570_v6  ;;  %v8401_v61 = vld [vmem:[#allocation46_spill] sm:$0xff] }
 0x14f   : > { %v1841_v53 = vsel %vm8391_vm2, nan, %v1840_v50  ;;  %v2682_v43 = vmin.f32 %v2680_v21, %v2681_v25  ;;  %v2695_v13 = vmin.f32 %v2693_v0, %v2694_v26  ;;  %v2708_v57 = vmin.f32 %v2706_v27, %v2707_v23  ;;  %v8405_v50 = vld [vmem:[#allocation21_spill] sm:$0xff]  ;;  %v8406_v25 = vld [vmem:[#allocation50_spill] sm:$0xff]  ;;  %v8407_v23 = vld [vmem:[#allocation15_spill] sm:$0xff] }
 0x150   : > { %v2257_v1 = vmul.f32 %v1841_v53, %v8387_v19  ;;  %8392 = vst [vmem:[#allocation51_spill] sm:$0xff] %v5955_v48  ;;  %v5959_v12 = vsel %vm5924_vm7, 0, %v1092_v4  ;;  %v2670_v20 = vrot.slane %v2669_v16, 1  ;;  %v1090_v47 = vsel %vm1007_vm10, %v1089_v11, %v1088_v46  ;;  %v8403_v46 = vld [vmem:[#allocation48_spill] sm:$0xff]  ;;  %v8404_v4 = vld [vmem:[#allocation49_spill] sm:$0xff] }
 0x151   : > { %8393 = vst [vmem:[#allocation52_spill] sm:$0xff] %v5959_v12  ;;  %v5965_v18 = vor.u32 %v5596_v31, %v5586_v55  ;;  %v5969_v6 = vshll.u32 %v8290_v10, %v8284_v45  ;;  %v2683_v41 = vrot.slane %v2682_v43, 1  ;;  %v2696_v14 = vrot.slane %v2695_v13, 1 }
 0x152   : > { %3516 = vperm.xlu0 %4073, %v2257_v1   ;;  %v2709_v62 = vrot.slane %v2708_v57, 1  ;;  %v1093_v33 = vsel %vm5924_vm7, %v8376_v40, %v1090_v47  ;;  %v5974_v63 = vmin.f32 %v2669_v16, %v2670_v20  ;;  %v5977_v21 = vadd.s32 3, %v5959_v12  ;;  %v8413_v12 = vld [vmem:[#allocation55_spill] sm:$0xff] }
 0x153   : > { %8394 = vst [vmem:[#allocation23_spill] sm:$0xff] %v5965_v18  ;;  %4107 = vcosq.f32 %v1093_v33  ;;  %v8396_v55 = vmov 2102212464   ;;  %v5983_v0 = vmin.f32 %v2682_v43, %v2683_v41  ;;  %v5985_v27 = vmin.f32 %v2695_v13, %v2696_v14  ;;  %v8408_v43 = vld [vmem:[#allocation53_spill] sm:$0xff]  ;;  %v8409_v41 = vld [vmem:[#allocation54_spill] sm:$0xff] }
 0x154   : > { %8395 = vst [vmem:[#allocation22_spill] sm:$0xff] %v5974_v63  ;;  %v5981_v31 = vshrl.u32 %v8396_v55, %v4634_v44  ;;  %v5987_v32 = vmin.f32 %v2708_v57, %v2709_v62  ;;  %4109 = vsinq.f32 %v1093_v33  ;;  %vm2711_vm3 = vcmp.eq.f32.partialorder %v5696_v59, %v5974_v63 }
 0x155   : > { %8397 = vst [vmem:[#allocation11_spill] sm:$0xff] %v5983_v0  ;;  %8398 = vst [vmem:[#allocation61_spill] sm:$0xff] %v5985_v27  ;;  %vm2715_vm10 = vcmp.eq.f32.partialorder %v5720_v30, %v5974_v63  ;;  %vm2719_vm12 = vcmp.eq.f32.partialorder %v5744_v29, %v5974_v63  ;;  %vm2712_vm8 = vcmp.eq.f32.partialorder %v5702_v60, %v5983_v0  ;;  %v2743_v9 = vsel %vm2711_vm3, %v8407_v23, 64  ;;  %v8428_v29 = vld [vmem:[#allocation58_spill] sm:$0xff] }
 0x156   : > { %8399 = vst [vmem:[#allocation24_spill] sm:$0xff] %v5987_v32  ;;  %vm2713_vm14 = vcmp.eq.f32.partialorder %v5708_v38, %v5985_v27  ;;  %vm2714_vm2 = vcmp.eq.f32.partialorder %v5714_v52, %v5987_v32  ;;  %vm2716_vm11 = vcmp.eq.f32.partialorder %v5726_v37, %v5983_v0  ;;  %vm2717_vm15 = vcmp.eq.f32.partialorder %v5732_v36, %v5985_v27 }
 0x157   : > { %vm2718_vm1 = vcmp.eq.f32.partialorder %v5738_v35, %v5987_v32  ;;  %vm2736_vm9 = vcmp.eq.f32.partialorder %v8400_v49, %v5983_v0  ;;  %vm2737_vm6 = vcmp.eq.f32.partialorder %v8401_v61, %v5985_v27  ;;  %vm2738_vm0 = vcmp.eq.f32.partialorder %v8402_v54, %v5987_v32  ;;  %v8430_v35 = vld [vmem:[#allocation60_spill] sm:$0xff] }
 0x158   : > { %vm2739_vm13 = vcmp.eq.f32.partialorder %v8403_v46, %v5974_v63  ;;  %vm2740_vm5 = vcmp.eq.f32.partialorder %v8404_v4, %v5983_v0  ;;  %vm2741_vm7 = vcmp.eq.f32.partialorder %v8405_v50, %v5985_v27  ;;  %vm2742_vm4 = vcmp.eq.f32.partialorder %v8406_v25, %v5987_v32 }
 0x159   : > { %v2744_v53 = vsel %vm2712_vm8, %v8407_v23, 64  ;;  %v2745_v16 = vsel %vm2713_vm14, %v8407_v23, 64  ;;  %v2746_v11 = vsel %vm2714_vm2, %v8407_v23, 64  ;;  %v2747_v13 = vsel %vm2715_vm10, %v8408_v43, 64 }
 0x15a   : > { %v2748_v57 = vsel %vm2716_vm11, %v8408_v43, 64  ;;  %v2749_v20 = vsel %vm2717_vm15, %v8408_v43, 64  ;;  %v2750_v47 = vsel %vm2718_vm1, %v8408_v43, 64  ;;  %v2751_v14 = vsel %vm2719_vm12, %v8409_v41, 64 }
 0x15b   : > { %vm8410_vm3 = vcmp.eq.f32.partialorder %v5750_v51, %v5983_v0  ;;  %vm8411_vm11 = vcmp.eq.f32.partialorder %v5756_v24, %v5985_v27  ;;  %vm8412_vm15 = vcmp.eq.f32.partialorder %v5762_v28, %v5987_v32  ;;  %vm8414_vm1 = vcmp.eq.f32.partialorder %v5768_v2, %v5974_v63  ;;  %v8418_v24 = vld [vmem:[#allocation56_spill] sm:$0xff]  ;;  %v8423_v51 = vld [vmem:[#allocation57_spill] sm:$0xff] }
 0x15c   : > { %v2752_v62 = vsel %vm8410_vm3, %v8409_v41, 64  ;;  %v2753_v33 = vsel %vm8411_vm11, %v8409_v41, 64  ;;  %v2754_v10 = vsel %vm8412_vm15, %v8409_v41, 64  ;;  %v2755_v18 = vsel %vm8414_vm1, %v8413_v12, 64 }
 0x15d   : > { %v6053_v26 = vpop.eup %4107  ;;  %vm8415_vm10 = vcmp.eq.f32.partialorder %v5774_v39, %v5983_v0  ;;  %vm8416_vm12 = vcmp.eq.f32.partialorder %v5780_v22, %v5985_v27  ;;  %vm8417_vm8 = vcmp.eq.f32.partialorder %v5786_v34, %v5987_v32  ;;  %vm8419_vm14 = vcmp.eq.f32.partialorder %v5792_v7, %v5974_v63 }
 0x15e   : > { %v6071_v1 = vpop.eup %4109  ;;  %v2756_v48 = vsel %vm8415_vm10, %v8413_v12, 64  ;;  %v2757_v19 = vsel %vm8416_vm12, %v8413_v12, 64  ;;  %v2758_v28 = vsel %vm8417_vm8, %v8413_v12, 64  ;;  %v2759_v2 = vsel %vm8419_vm14, %v8418_v24, 64 }
 0x15f   : > { %vm8420_vm2 = vcmp.eq.f32.partialorder %v5798_v58, %v5983_v0  ;;  %vm8421_vm3 = vcmp.eq.f32.partialorder %v5804_v15, %v5985_v27  ;;  %vm8422_vm11 = vcmp.eq.f32.partialorder %v5810_v56, %v5987_v32  ;;  %vm8424_vm15 = vcmp.eq.f32.partialorder %v5816_v17, %v5974_v63 }
 0x160   : > { %v2760_v39 = vsel %vm8420_vm2, %v8418_v24, 64  ;;  %v2761_v22 = vsel %vm8421_vm3, %v8418_v24, 64  ;;  %v2762_v34 = vsel %vm8422_vm11, %v8418_v24, 64  ;;  %v2763_v7 = vsel %vm8424_vm15, %v8423_v51, 64 }
 0x161   : > { %vm8425_vm1 = vcmp.eq.f32.partialorder %v5822_v3, %v5983_v0  ;;  %vm8426_vm10 = vcmp.eq.f32.partialorder %v5828_v8, %v5985_v27  ;;  %vm8427_vm12 = vcmp.eq.f32.partialorder %v5834_v42, %v5987_v32  ;;  %vm8429_vm8 = vcmp.eq.f32.partialorder %v5840_v5, %v5974_v63 }
 0x162   : > { %v2764_v58 = vsel %vm8425_vm1, %v8423_v51, 64  ;;  %v2765_v15 = vsel %vm8426_vm10, %v8423_v51, 64  ;;  %v2766_v56 = vsel %vm8427_vm12, %v8423_v51, 64  ;;  %v2767_v17 = vsel %vm8429_vm8, %v8428_v29, 64 }
 0x163   : > { %v2768_v3 = vsel %vm2736_vm9, %v8428_v29, 64  ;;  %v2769_v8 = vsel %vm2737_vm6, %v8428_v29, 64  ;;  %v2770_v42 = vsel %vm2738_vm0, %v8428_v29, 64  ;;  %v2771_v5 = vsel %vm2739_vm13, %v8430_v35, 64 }
 0x164   : > { %v2772_v49 = vsel %vm2740_vm5, %v8430_v35, 64  ;;  %v2773_v61 = vsel %vm2741_vm7, %v8430_v35, 64  ;;  %v2774_v54 = vsel %vm2742_vm4, %v8430_v35, 64  ;;  %vm2775_vm0 = vcmp.lt.s32.totalorder %v2743_v9, %v2747_v13 }
 0x165   : > { %vm2798_vm6 = vcmp.lt.s32.totalorder %v2744_v53, %v2748_v57  ;;  %vm2821_vm9 = vcmp.lt.s32.totalorder %v2745_v16, %v2749_v20  ;;  %vm2844_vm14 = vcmp.lt.s32.totalorder %v2746_v11, %v2750_v47  ;;  %v2776_v63 = vsel %vm2775_vm0, %v2743_v9, %v2747_v13 }
 0x166   : > { %v2799_v46 = vsel %vm2798_vm6, %v2744_v53, %v2748_v57  ;;  %v2822_v36 = vsel %vm2821_vm9, %v2745_v16, %v2749_v20  ;;  %v2845_v37 = vsel %vm2844_vm14, %v2746_v11, %v2750_v47  ;;  %vm2777_vm13 = vcmp.lt.s32.totalorder %v2776_v63, %v2751_v14 }
 0x167   : > { %vm2800_vm5 = vcmp.lt.s32.totalorder %v2799_v46, %v2752_v62  ;;  %vm2823_vm2 = vcmp.lt.s32.totalorder %v2822_v36, %v2753_v33  ;;  %vm2846_vm3 = vcmp.lt.s32.totalorder %v2845_v37, %v2754_v10  ;;  %v2778_v0 = vsel %vm2777_vm13, %v2776_v63, %v2751_v14 }
 0x168   : > { %v2801_v27 = vsel %vm2800_vm5, %v2799_v46, %v2752_v62  ;;  %v2824_v50 = vsel %vm2823_vm2, %v2822_v36, %v2753_v33  ;;  %v2847_v4 = vsel %vm2846_vm3, %v2845_v37, %v2754_v10  ;;  %vm2779_vm7 = vcmp.lt.s32.totalorder %v2778_v0, %v2755_v18 }
 0x169   : > { %vm2802_vm11 = vcmp.lt.s32.totalorder %v2801_v27, %v2756_v48  ;;  %vm2825_vm15 = vcmp.lt.s32.totalorder %v2824_v50, %v2757_v19  ;;  %vm2848_vm4 = vcmp.lt.s32.totalorder %v2847_v4, %v2758_v28  ;;  %v2780_v32 = vsel %vm2779_vm7, %v2778_v0, %v2755_v18 }
 0x16a   : > { %v2803_v25 = vsel %vm2802_vm11, %v2801_v27, %v2756_v48  ;;  %v2826_v30 = vsel %vm2825_vm15, %v2824_v50, %v2757_v19  ;;  %v2849_v52 = vsel %vm2848_vm4, %v2847_v4, %v2758_v28  ;;  %vm2781_vm1 = vcmp.lt.s32.totalorder %v2780_v32, %v2759_v2 }
 0x16b   : > { %vm2804_vm10 = vcmp.lt.s32.totalorder %v2803_v25, %v2760_v39  ;;  %vm2827_vm12 = vcmp.lt.s32.totalorder %v2826_v30, %v2761_v22  ;;  %vm2850_vm8 = vcmp.lt.s32.totalorder %v2849_v52, %v2762_v34  ;;  %v2782_v9 = vsel %vm2781_vm1, %v2780_v32, %v2759_v2 }
 0x16c   : > { %v2805_v53 = vsel %vm2804_vm10, %v2803_v25, %v2760_v39  ;;  %v2828_v16 = vsel %vm2827_vm12, %v2826_v30, %v2761_v22  ;;  %v2851_v11 = vsel %vm2850_vm8, %v2849_v52, %v2762_v34  ;;  %vm2783_vm0 = vcmp.lt.s32.totalorder %v2782_v9, %v2763_v7 }
 0x16d   : > { %vm2806_vm6 = vcmp.lt.s32.totalorder %v2805_v53, %v2764_v58  ;;  %vm2829_vm9 = vcmp.lt.s32.totalorder %v2828_v16, %v2765_v15  ;;  %vm2852_vm14 = vcmp.lt.s32.totalorder %v2851_v11, %v2766_v56  ;;  %v2784_v10 = vsel %vm2783_vm0, %v2782_v9, %v2763_v7 }
 0x16e   : > { %v2807_v37 = vsel %vm2806_vm6, %v2805_v53, %v2764_v58  ;;  %v2830_v36 = vsel %vm2829_vm9, %v2828_v16, %v2765_v15  ;;  %v2853_v63 = vsel %vm2852_vm14, %v2851_v11, %v2766_v56  ;;  %vm2785_vm13 = vcmp.lt.s32.totalorder %v2784_v10, %v2767_v17 }
 0x16f   : > { %vm2808_vm5 = vcmp.lt.s32.totalorder %v2807_v37, %v2768_v3  ;;  %vm2831_vm2 = vcmp.lt.s32.totalorder %v2830_v36, %v2769_v8  ;;  %vm2854_vm3 = vcmp.lt.s32.totalorder %v2853_v63, %v2770_v42  ;;  %v2786_v28 = vsel %vm2785_vm13, %v2784_v10, %v2767_v17 }
 0x170   : > { %v2809_v19 = vsel %vm2808_vm5, %v2807_v37, %v2768_v3  ;;  %v2832_v48 = vsel %vm2831_vm2, %v2830_v36, %v2769_v8  ;;  %v2855_v18 = vsel %vm2854_vm3, %v2853_v63, %v2770_v42  ;;  %vm2787_vm7 = vcmp.lt.s32.totalorder %v2786_v28, %v2771_v5 }
 0x171   : > { %vm2810_vm11 = vcmp.lt.s32.totalorder %v2809_v19, %v2772_v49  ;;  %vm2833_vm15 = vcmp.lt.s32.totalorder %v2832_v48, %v2773_v61  ;;  %vm2856_vm4 = vcmp.lt.s32.totalorder %v2855_v18, %v2774_v54  ;;  %v2788_v52 = vsel %vm2787_vm7, %v2786_v28, %v2771_v5  ;;  %v8437_v28 = vld [vmem:[#allocation75_spill] sm:$0xff] }
 0x172   : > { %v2811_v30 = vsel %vm2810_vm11, %v2809_v19, %v2772_v49  ;;  %v2834_v2 = vsel %vm2833_vm15, %v2832_v48, %v2773_v61  ;;  %v2857_v39 = vsel %vm2856_vm4, %v2855_v18, %v2774_v54  ;;  %v2789_v22 = vrot.slane %v2788_v52, 4 }
 0x173   : > { %v2812_v34 = vrot.slane %v2811_v30, 4  ;;  %v2835_v7 = vrot.slane %v2834_v2, 4  ;;  %v2858_v58 = vrot.slane %v2857_v39, 4  ;;  %v6186_v15 = vand.u32 3, %v5977_v21 }
 0x174   : > { %v6190_v56 = vor.u32 %v5981_v31, %v5969_v6  ;;  %v1135_v17 = vshll.u32 %v8396_v55, %v8284_v45  ;;  %v8431_v3 = vmov 920167782   ;;  %vm2790_vm1 = vcmp.lt.s32.totalorder %v2788_v52, %v2789_v22  ;;  %v8489_v55 = vld [vmem:[#allocation16_spill] sm:$0xff] }
 0x175   : > { %v1136_v8 = vshrl.u32 %v8431_v3, %v4634_v44  ;;  %vm2813_vm10 = vcmp.lt.s32.totalorder %v2811_v30, %v2812_v34  ;;  %vm2836_vm12 = vcmp.lt.s32.totalorder %v2834_v2, %v2835_v7  ;;  %vm2859_vm8 = vcmp.lt.s32.totalorder %v2857_v39, %v2858_v58 }
 0x176   : > { %v2791_v42 = vsel %vm2790_vm1, %v2788_v52, %v2789_v22  ;;  %v2814_v5 = vsel %vm2813_vm10, %v2811_v30, %v2812_v34  ;;  %v2837_v0 = vsel %vm2836_vm12, %v2834_v2, %v2835_v7  ;;  %v2860_v27 = vsel %vm2859_vm8, %v2857_v39, %v2858_v58  ;;  %v8441_v30 = vld [vmem:[#allocation27_spill] sm:$0xff]  ;;  %v8442_v39 = vld [vmem:[#allocation28_spill] sm:$0xff]  ;;  %v8444_v34 = vld [vmem:[#allocation29_spill] sm:$0xff] }
 0x177   : > { %v2792_v21 = vrot.slane %v2791_v42, 2  ;;  %v2815_v32 = vrot.slane %v2814_v5, 2  ;;  %v2838_v49 = vrot.slane %v2837_v0, 2  ;;  %v2861_v61 = vrot.slane %v2860_v27, 2  ;;  %v8446_v58 = vld [vmem:[#allocation18_spill] sm:$0xff] }
 0x178   : > { %v8121_v6 = vxor.u32 2147483648, %v6071_v1  ;;  %v8120_v31 = vxor.u32 2147483648, %v6053_v26  ;;  %v6200_v54 = vshll.u32 %v8431_v3, %v8284_v45  ;;  %v8432_v46 = vmov 1326507024  }
 0x179   : > { %v6204_v4 = vshrl.u32 %v8432_v46, %v4634_v44  ;;  %vm2793_vm0 = vcmp.lt.s32.totalorder %v2791_v42, %v2792_v21  ;;  %vm2816_vm6 = vcmp.lt.s32.totalorder %v2814_v5, %v2815_v32  ;;  %vm2839_vm9 = vcmp.lt.s32.totalorder %v2837_v0, %v2838_v49  ;;  %v8485_v46 = vld [vmem:[#allocation20_spill] sm:$0xff] }
 0x17a   : > { %vm2862_vm14 = vcmp.lt.s32.totalorder %v2860_v27, %v2861_v61  ;;  %v2794_v50 = vsel %vm2793_vm0, %v2791_v42, %v2792_v21  ;;  %v2817_v25 = vsel %vm2816_vm6, %v2814_v5, %v2815_v32  ;;  %v2840_v13 = vsel %vm2839_vm9, %v2837_v0, %v2838_v49  ;;  %v8449_v42 = vld [vmem:[#allocation31_spill] sm:$0xff]  ;;  %v8451_v0 = vld [vmem:[#allocation32_spill] sm:$0xff]  ;;  %v8453_v21 = vld [vmem:[#allocation33_spill] sm:$0xff] }
 0x17b   : > { %v2863_v57 = vsel %vm2862_vm14, %v2860_v27, %v2861_v61  ;;  %v2795_v20 = vrot.slane %v2794_v50, 1  ;;  %v2818_v47 = vrot.slane %v2817_v25, 1  ;;  %v2841_v14 = vrot.slane %v2840_v13, 1  ;;  %v8455_v49 = vld [vmem:[#allocation34_spill] sm:$0xff] }
 0x17c   : > { %v2864_v62 = vrot.slane %v2863_v57, 1  ;;  %vm1101_vm13 = vcmp.eq.s32.totalorder %v6186_v15, 0  ;;  %vm1104_vm5 = vcmp.eq.s32.totalorder %v6186_v15, 2  ;;  %v6208_v45 = vor.u32 %v1136_v8, %v1135_v17  ;;  %v8447_v17 = vld [vmem:[#allocation30_spill] sm:$0xff] }
 0x17d   : > { %vm2796_vm2 = vcmp.lt.s32.totalorder %v2794_v50, %v2795_v20  ;;  %vm2819_vm3 = vcmp.lt.s32.totalorder %v2817_v25, %v2818_v47  ;;  %vm2842_vm7 = vcmp.lt.s32.totalorder %v2840_v13, %v2841_v14  ;;  %v6227_v11 = vsel %vm1101_vm13, %v6053_v26, %v8121_v6 }
 0x17e   : > { %vm2865_vm11 = vcmp.lt.s32.totalorder %v2863_v57, %v2864_v62  ;;  %v6212_v33 = vsel %vm2796_vm2, %v2794_v50, %v2795_v20  ;;  %v6214_v9 = vsel %vm2819_vm3, %v2817_v25, %v2818_v47  ;;  %v6216_v53 = vsel %vm2842_vm7, %v2840_v13, %v2841_v14  ;;  %v8457_v50 = vld [vmem:[#allocation35_spill] sm:$0xff]  ;;  %v8459_v13 = vld [vmem:[#allocation36_spill] sm:$0xff]  ;;  %v8461_v20 = vld [vmem:[#allocation37_spill] sm:$0xff] }
 0x17f   : > { %8433 = vst [vmem:[#allocation63_spill] sm:$0xff] %v6212_v33  ;;  %8434 = vst [vmem:[#allocation9_spill] sm:$0xff] %v6214_v9  ;;  %v6218_v16 = vsel %vm2865_vm11, %v2863_v57, %v2864_v62  ;;  %vm8148_vm15 = vcmp.eq.s32.totalorder %v8407_v23, %v6212_v33  ;;  %vm8147_vm4 = vcmp.eq.s32.totalorder %v8407_v23, %v6214_v9  ;;  %vm1097_vm9 = vweird.f32 %v8376_v40  ;;  %v8463_v14 = vld [vmem:[#allocation38_spill] sm:$0xff] }
 0x180   : > { %8435 = vst [vmem:[#allocation10_spill] sm:$0xff] %v6216_v53  ;;  %8436 = vst [vmem:[#allocation15_spill] sm:$0xff] %v6218_v16  ;;  %v6232_v10 = vsel %vm1104_vm5, %v8120_v31, %v6071_v1  ;;  %vm8146_vm1 = vcmp.eq.s32.totalorder %v8407_v23, %v6216_v53  ;;  %vm8118_vm10 = vcmp.eq.s32.totalorder %v8407_v23, %v6218_v16  ;;  %v6300_v37 = vsel %vm8148_vm15, inf, %v5696_v59  ;;  %v8438_v59 = vld [vmem:[#allocation76_spill] sm:$0xff] }
 0x181   : > { %vm8115_vm12 = vcmp.eq.s32.totalorder %v8408_v43, %v6212_v33  ;;  %vm8116_vm8 = vcmp.eq.s32.totalorder %v8408_v43, %v6214_v9  ;;  %vm8117_vm0 = vcmp.eq.s32.totalorder %v8408_v43, %v6216_v53  ;;  %vm8119_vm6 = vcmp.eq.s32.totalorder %v8408_v43, %v6218_v16 }
 0x182   : > { %vm8145_vm5 = vcmp.eq.s32.totalorder %v8428_v29, %v6214_v9  ;;  %vm8144_vm3 = vcmp.eq.s32.totalorder %v8428_v29, %v6216_v53  ;;  %vm8143_vm7 = vcmp.eq.s32.totalorder %v8428_v29, %v6218_v16  ;;  %vm8142_vm11 = vcmp.eq.s32.totalorder %v8430_v35, %v6212_v33 }
 0x183   : > { %vm8141_vm14 = vcmp.eq.s32.totalorder %v8430_v35, %v6214_v9  ;;  %vm8140_vm13 = vcmp.eq.s32.totalorder %v8430_v35, %v6216_v53  ;;  %vm8136_vm2 = vcmp.eq.s32.totalorder %v8430_v35, %v6218_v16  ;;  %v6306_v36 = vsel %vm8147_vm4, inf, %v5702_v60  ;;  %v8439_v60 = vld [vmem:[#allocation25_spill] sm:$0xff] }
 0x184   : > { %v6312_v63 = vsel %vm8146_vm1, inf, %v5708_v38  ;;  %v6318_v19 = vsel %vm8118_vm10, inf, %v8437_v28  ;;  %v6324_v48 = vsel %vm8115_vm12, inf, %v8438_v59  ;;  %v6330_v18 = vsel %vm8116_vm8, inf, %v8439_v60  ;;  %v8440_v38 = vld [vmem:[#allocation26_spill] sm:$0xff]  ;;  %v8465_v28 = vld [vmem:[#allocation39_spill] sm:$0xff] }
 0x185   : > { %v6336_v52 = vsel %vm8117_vm0, inf, %v8440_v38  ;;  %v6342_v2 = vsel %vm8119_vm6, inf, %v8441_v30  ;;  %vm8443_vm12 = vcmp.eq.s32.totalorder %v8409_v41, %v6212_v33  ;;  %vm8445_vm8 = vcmp.eq.s32.totalorder %v8409_v41, %v6214_v9  ;;  %v8467_v60 = vld [vmem:[#allocation40_spill] sm:$0xff]  ;;  %v8469_v30 = vld [vmem:[#allocation41_spill] sm:$0xff] }
 0x186   : > { %v6348_v22 = vsel %vm8443_vm12, inf, %v8442_v39  ;;  %v6354_v7 = vsel %vm8445_vm8, inf, %v8444_v34  ;;  %vm1141_vm0 = vcmp.lt.s32.totalorder %v8446_v58, 1  ;;  %vm8448_vm10 = vcmp.eq.s32.totalorder %v8409_v41, %v6216_v53  ;;  %v8471_v34 = vld [vmem:[#allocation42_spill] sm:$0xff] }
 0x187   : > { %v6361_v8 = vsel %vm8448_vm10, inf, %v8447_v17  ;;  %vm8450_vm6 = vcmp.eq.s32.totalorder %v8409_v41, %v6218_v16  ;;  %vm8452_vm12 = vcmp.eq.s32.totalorder %v8413_v12, %v6212_v33  ;;  %vm8454_vm8 = vcmp.eq.s32.totalorder %v8413_v12, %v6214_v9 }
 0x188   : > { %v6367_v5 = vsel %vm8450_vm6, inf, %v8449_v42  ;;  %v6373_v27 = vsel %vm8452_vm12, inf, %v8451_v0  ;;  %v6379_v32 = vsel %vm8454_vm8, inf, %v8453_v21  ;;  %vm8456_vm10 = vcmp.eq.s32.totalorder %v8413_v12, %v6216_v53  ;;  %v8473_v42 = vld [vmem:[#allocation43_spill] sm:$0xff]  ;;  %v8475_v21 = vld [vmem:[#allocation44_spill] sm:$0xff] }
 0x189   : > { %v6385_v61 = vsel %vm8456_vm10, inf, %v8455_v49  ;;  %vm8458_vm6 = vcmp.eq.s32.totalorder %v8413_v12, %v6218_v16  ;;  %vm8460_vm12 = vcmp.eq.s32.totalorder %v8418_v24, %v6212_v33  ;;  %vm8462_vm8 = vcmp.eq.s32.totalorder %v8418_v24, %v6214_v9 }
 0x18a   : > { %v6391_v25 = vsel %vm8458_vm6, inf, %v8457_v50  ;;  %v6397_v57 = vsel %vm8460_vm12, inf, %v8459_v13  ;;  %v6403_v47 = vsel %vm8462_vm8, inf, %v8461_v20  ;;  %vm8464_vm10 = vcmp.eq.s32.totalorder %v8418_v24, %v6216_v53  ;;  %v8477_v50 = vld [vmem:[#allocation45_spill] sm:$0xff]  ;;  %v8478_v20 = vld [vmem:[#allocation46_spill] sm:$0xff] }
 0x18b   : > { %v6409_v62 = vsel %vm8464_vm10, inf, %v8463_v14  ;;  %vm8466_vm6 = vcmp.eq.s32.totalorder %v8418_v24, %v6218_v16  ;;  %vm8468_vm12 = vcmp.eq.s32.totalorder %v8423_v51, %v6212_v33  ;;  %vm8470_vm8 = vcmp.eq.s32.totalorder %v8423_v51, %v6214_v9 }
 0x18c   : > { %v6415_v59 = vsel %vm8466_vm6, inf, %v8465_v28  ;;  %v6421_v38 = vsel %vm8468_vm12, inf, %v8467_v60  ;;  %v6427_v39 = vsel %vm8470_vm8, inf, %v8469_v30  ;;  %vm8472_vm10 = vcmp.eq.s32.totalorder %v8423_v51, %v6216_v53  ;;  %v8479_v28 = vld [vmem:[#allocation47_spill] sm:$0xff]  ;;  %v8480_v30 = vld [vmem:[#allocation48_spill] sm:$0xff] }
 0x18d   : > { %v6433_v17 = vsel %vm8472_vm10, inf, %v8471_v34  ;;  %vm8474_vm6 = vcmp.eq.s32.totalorder %v8423_v51, %v6218_v16  ;;  %vm8476_vm12 = vcmp.eq.s32.totalorder %v8428_v29, %v6212_v33  ;;  %v6451_v13 = vsel %vm8145_vm5, inf, %v8477_v50  ;;  %v8482_v50 = vld [vmem:[#allocation21_spill] sm:$0xff] }
 0x18e   : > { %v6439_v0 = vsel %vm8474_vm6, inf, %v8473_v42  ;;  %v6445_v49 = vsel %vm8476_vm12, inf, %v8475_v21  ;;  %v6457_v14 = vsel %vm8144_vm3, inf, %v8478_v20  ;;  %v6463_v60 = vsel %vm8143_vm7, inf, %v8479_v28  ;;  %v8481_v42 = vld [vmem:[#allocation49_spill] sm:$0xff]  ;;  %v8483_v28 = vld [vmem:[#allocation50_spill] sm:$0xff] }
 0x18f   : > { %v6469_v34 = vsel %vm8142_vm11, inf, %v8480_v30  ;;  %v6475_v21 = vsel %vm8141_vm14, inf, %v8481_v42  ;;  %v6481_v20 = vsel %vm8140_vm13, inf, %v8482_v50  ;;  %v6487_v31 = vsel %vm8136_vm2, inf, %v8483_v28 }
 0x190   : > { %v3007_v30 = vmin.f32 %v6300_v37, %v6324_v48  ;;  %v3020_v6 = vmin.f32 %v6306_v36, %v6330_v18  ;;  %v3033_v42 = vmin.f32 %v6312_v63, %v6336_v52  ;;  %v3046_v44 = vmin.f32 %v6318_v19, %v6342_v2 }
 0x191   : > { %vm8484_vm8 = vcmp.lt.s32.totalorder %v6186_v15, 2  ;;  %vm1142_vm10 = vcmp.lt.s32.totalorder %v8446_v58, 2  ;;  %vm1143_vm6 = vcmp.lt.s32.totalorder %v8446_v58, 3  ;;  %vm1144_vm12 = vcmp.lt.s32.totalorder %v8446_v58, 4 }
 0x192   : > { %v1107_v50 = vsel %vm8484_vm8, %v6227_v11, %v6232_v10  ;;  %v3008_v28 = vmin.f32 %v3007_v30, %v6348_v22  ;;  %v3021_v16 = vmin.f32 %v3020_v6, %v6354_v7  ;;  %v3034_v9 = vmin.f32 %v3033_v42, %v6361_v8  ;;  %v8486_v10 = vld [vmem:[#allocation51_spill] sm:$0xff]  ;;  %v8487_v30 = vld [vmem:[#allocation62_spill] sm:$0xff] }
 0x193   : > { %v1108_v53 = vsel %vm1097_vm9, nan, %v1107_v50  ;;  %v3047_v33 = vmin.f32 %v3046_v44, %v6367_v5  ;;  %v1145_v6 = vsel %vm1141_vm0, %v8487_v30, %v8486_v10  ;;  %v1146_v50 = vsel %vm1144_vm12, %v6190_v56, 2102212464 }
 0x194   : > { %v1426_v3 = vadd.f32 %v8485_v46, %v1108_v53  ;;  %v3009_v15 = vmin.f32 %v3008_v28, %v6373_v27  ;;  %v3022_v11 = vmin.f32 %v3021_v16, %v6379_v32  ;;  %v3035_v42 = vmin.f32 %v3034_v9, %v6385_v61  ;;  %v8488_v53 = vld [vmem:[#allocation23_spill] sm:$0xff] }
 0x195   : > { %v3048_v44 = vmin.f32 %v3047_v33, %v6391_v25  ;;  %v1147_v28 = vsel %vm1143_vm6, %v8488_v53, %v1146_v50  ;;  %v1149_v16 = vsel %vm1141_vm0, %v8486_v10, %v8488_v53  ;;  %vm1224_vm8 = vcmp.gt.s32.totalorder %v8489_v55, 0 }
 0x196   : > { %3397 = vperm.xlu1 %4077, %v1426_v3   ;;  %v3010_v30 = vmin.f32 %v3009_v15, %v6397_v57  ;;  %v3023_v35 = vmin.f32 %v3022_v11, %v6403_v47  ;;  %v1148_v9 = vsel %vm1142_vm10, %v1145_v6, %v1147_v28  ;;  %v1150_v3 = vsel %vm1144_vm12, %v6208_v45, 920167782 }
 0x197   : > { %v3036_v33 = vmin.f32 %v3035_v42, %v6409_v62  ;;  %v3049_v50 = vmin.f32 %v3048_v44, %v6415_v59  ;;  %v1151_v10 = vsel %vm1143_vm6, %v6190_v56, %v1150_v3  ;;  %v1153_v15 = vsel %vm1141_vm0, %v8488_v53, %v6190_v56 }
 0x198   : > { %v3011_v11 = vmin.f32 %v3010_v30, %v6421_v38  ;;  %v3024_v6 = vmin.f32 %v3023_v35, %v6427_v39  ;;  %v1152_v28 = vsel %vm1142_vm10, %v1149_v16, %v1151_v10  ;;  %v8490_v42 = vor.u32 %v6204_v4, %v6200_v54  ;;  %v8492_v35 = vld [vmem:[#allocation59_spill] sm:$0xff]  ;;  %v8494_v10 = vld [vmem:[#allocation52_spill] sm:$0xff] }
 0x199   : > { %v3037_v3 = vmin.f32 %v3036_v33, %v6433_v17  ;;  %v3050_v29 = vmin.f32 %v3049_v50, %v6439_v0  ;;  %v8491_v51 = vmov 1   ;;  %v8493_v53 = vor.u32 8388608, %v8492_v35 }
 0x19a   : > { %v1154_v44 = vsel %vm1144_vm12, %v8490_v42, 1326507024  ;;  %4079 = vset.pattern.permute.xlu1 %v8491_v51  ;;  %v3012_v16 = vmin.f32 %v3011_v11, %v6445_v49  ;;  %v3025_v54 = vmin.f32 %v3024_v6, %v6451_v13  ;;  %v1935_v33 = vand.u32 3, %v8494_v10  ;;  %v8497_v6 = vld [vmem:[#allocation17_spill] sm:$0xff] }
 0x19b   : > { %v1155_v56 = vsel %vm1143_vm6, %v6208_v45, %v1154_v44  ;;  %v1157_v30 = vshll.u32 %v8493_v53, 8  ;;  %v3038_v50 = vmin.f32 %v3037_v3, %v6457_v14  ;;  %v3051_v42 = vmin.f32 %v3050_v29, %v6463_v60 }
 0x19c   : > { %v1156_v4 = vsel %vm1142_vm10, %v1153_v15, %v1155_v56  ;;  %v3013_v45 = vmin.f32 %v3012_v16, %v6469_v34  ;;  %v3026_v44 = vmin.f32 %v3025_v54, %v6475_v21  ;;  %vm1328_vm0 = vcmp.gt.s32.totalorder %v8497_v6, 0 }
 0x19d   : > { %v6570_v51 = vmul.u32.u64.low %v1157_v30, %v1156_v4  ;;  %v6571_v24 = vmul.u32.u64.high %v1157_v30, %v1156_v4, %v6570_v51  ;;  %v6575_v35 = vmul.u32.u64.low %v1157_v30, %v1152_v28  ;;  %v6576_v11 = vmul.u32.u64.high %v1157_v30, %v1152_v28, %v6575_v35 }
 0x19e   : > { %v3039_v58 = vmin.f32 %v3038_v50, %v6481_v20  ;;  %v3052_v15 = vmin.f32 %v3051_v42, %v6487_v31  ;;  %v1164_v3 = vmul.u32 %v1157_v30, %v1148_v9  ;;  %v3014_v56 = vrot.slane %v3013_v45, 4 }
 0x19f   : > { %8495 = vst [vmem:[#allocation53_spill] sm:$0xff] %v6571_v24  ;;  %8496 = vst [vmem:[#allocation54_spill] sm:$0xff] %v6575_v35  ;;  %v3027_v29 = vrot.slane %v3026_v44, 4  ;;  %vm1937_vm10 = vcmp.eq.s32.totalorder %v1935_v33, 0  ;;  %vm1940_vm6 = vcmp.eq.s32.totalorder %v1935_v33, 2  ;;  %vm1166_vm12 = vc.u32 %v6571_v24, %v6575_v35 }
 0x1a0   : > { %v3040_v51 = vrot.slane %v3039_v58, 4  ;;  %v3053_v53 = vrot.slane %v3052_v15, 4  ;;  %vm1936_vm2 = vcmp.lt.s32.totalorder %v1935_v33, 2  ;;  %v3015_v28 = vmin.f32 %v3013_v45, %v3014_v56 }
 0x1a1   : > { %v3028_v16 = vmin.f32 %v3026_v44, %v3027_v29  ;;  %v1167_v54 = vadd.s32 1, %v6576_v11  ;;  %v8498_v4 = vxor.u32 2147483648, %v6071_v1  ;;  %v1225_v9 = vsel %vm1224_vm8, %v8489_v55, 0 }
 0x1a2   : > { %v3041_v30 = vmin.f32 %v3039_v58, %v3040_v51  ;;  %v3054_v50 = vmin.f32 %v3052_v15, %v3053_v53  ;;  %v8499_v42 = vxor.u32 2147483648, %v6053_v26  ;;  %v3016_v35 = vrot.slane %v3015_v28, 2 }
 0x1a3   : > { %v1939_v10 = vsel %vm1937_vm10, %v6053_v26, %v8498_v4  ;;  %v3029_v33 = vrot.slane %v3028_v16, 2  ;;  %v1168_v45 = vsel %vm1166_vm12, %v1167_v54, %v6576_v11  ;;  %v1329_v55 = vsel %vm1328_vm0, %v8497_v6, 0 }
 0x1a4   : > { %v1942_v12 = vsel %vm1940_vm6, %v8499_v42, %v6071_v1  ;;  %v3042_v56 = vrot.slane %v3041_v30, 2  ;;  %v3055_v29 = vrot.slane %v3054_v50, 2  ;;  %v6595_v24 = vadd.s32 %v1168_v45, %v1164_v3 }
 0x1a5   : > { %v1943_v44 = vsel %vm1936_vm2, %v1939_v10, %v1942_v12  ;;  %v3017_v58 = vmin.f32 %v3015_v28, %v3016_v35  ;;  %v3030_v15 = vmin.f32 %v3028_v16, %v3029_v33  ;;  %v6603_v1 = vshrl.u32 %v1225_v9, 5  ;;  %v8500_v16 = vld [vmem:[#allocation22_spill] sm:$0xff]  ;;  %v8501_v33 = vld [vmem:[#allocation11_spill] sm:$0xff] }
 0x1a6   : > { %v1944_v4 = vsel %vm1097_vm9, nan, %v1943_v44  ;;  %v3043_v51 = vmin.f32 %v3041_v30, %v3042_v56  ;;  %v3056_v11 = vmin.f32 %v3054_v50, %v3055_v29  ;;  %v1170_v12 = vadd.s32 536870912, %v6595_v24 }
 0x1a7   : > { %v2258_v26 = vmul.f32 %v1944_v4, %v8485_v46  ;;  %v6606_v53 = vand.u32 31, %v1225_v9  ;;  %v6608_v3 = vshrl.u32 %v1329_v55, 5  ;;  %v3018_v40 = vrot.slane %v3017_v58, 1  ;;  %v8502_v9 = vld [vmem:[#allocation61_spill] sm:$0xff] }
 0x1a8   : > { %v3031_v54 = vrot.slane %v3030_v15, 1  ;;  %v6610_v10 = vand.u32 31, %v1329_v55  ;;  %v3044_v6 = vrot.slane %v3043_v51, 1  ;;  %v3057_v35 = vrot.slane %v3056_v11, 1 }
 0x1a9   : > { %3521 = vperm.xlu0 %4073, %v2258_v26   ;;  %v6612_v28 = vshrl.u32 %v1170_v12, 30  ;;  %v6616_v50 = vmin.f32 %v3017_v58, %v3018_v40  ;;  %v8503_v55 = vmov 0   ;;  %v8512_v12 = vld [vmem:[#allocation56_spill] sm:$0xff]  ;;  %v8517_v40 = vld [vmem:[#allocation57_spill] sm:$0xff] }
 0x1aa   : > { %v6618_v45 = vmin.f32 %v3030_v15, %v3031_v54  ;;  %v6621_v56 = vmin.f32 %v3043_v51, %v3044_v6  ;;  %v6623_v29 = vmin.f32 %v3056_v11, %v3057_v35  ;;  %v8507_v11 = vld [vmem:[#allocation55_spill] sm:$0xff]  ;;  %v8522_v54 = vld [vmem:[#allocation58_spill] sm:$0xff]  ;;  %v8524_v6 = vld [vmem:[#allocation60_spill] sm:$0xff] }
 0x1ab   : > { %vm3059_vm9 = vcmp.eq.f32.partialorder %v6300_v37, %v6616_v50  ;;  %vm3063_vm8 = vcmp.eq.f32.partialorder %v6324_v48, %v6616_v50  ;;  %vm3067_vm14 = vcmp.eq.f32.partialorder %v6348_v22, %v6616_v50  ;;  %vm3087_vm4 = vcmp.eq.f32.partialorder %v6469_v34, %v6616_v50 }
 0x1ac   : > { %vm3060_vm2 = vcmp.eq.f32.partialorder %v6306_v36, %v6618_v45  ;;  %vm3064_vm0 = vcmp.eq.f32.partialorder %v6330_v18, %v6618_v45  ;;  %vm3061_vm10 = vcmp.eq.f32.partialorder %v6312_v63, %v6621_v56  ;;  %vm3062_vm6 = vcmp.eq.f32.partialorder %v6318_v19, %v6623_v29 }
 0x1ad   : > { %4078 = vset.pattern.permute.xlu0 %v8503_v55  ;;  %vm3065_vm12 = vcmp.eq.f32.partialorder %v6336_v52, %v6621_v56  ;;  %vm3066_vm13 = vcmp.eq.f32.partialorder %v6342_v2, %v6623_v29  ;;  %vm3084_vm3 = vcmp.eq.f32.partialorder %v6451_v13, %v6618_v45  ;;  %vm3085_vm5 = vcmp.eq.f32.partialorder %v6457_v14, %v6621_v56 }
 0x1ae   : > { %vm3086_vm1 = vcmp.eq.f32.partialorder %v6463_v60, %v6623_v29  ;;  %vm3088_vm15 = vcmp.eq.f32.partialorder %v6475_v21, %v6618_v45  ;;  %vm3089_vm11 = vcmp.eq.f32.partialorder %v6481_v20, %v6621_v56  ;;  %vm3090_vm7 = vcmp.eq.f32.partialorder %v6487_v31, %v6623_v29 }
 0x1af   : > { %v3091_v58 = vsel %vm3059_vm9, %v8407_v23, 64  ;;  %v3092_v15 = vsel %vm3060_vm2, %v8407_v23, 64  ;;  %v3093_v26 = vsel %vm3061_vm10, %v8407_v23, 64  ;;  %v3094_v51 = vsel %vm3062_vm6, %v8407_v23, 64 }
 0x1b0   : > { %v3095_v37 = vsel %vm3063_vm8, %v8408_v43, 64  ;;  %v3096_v36 = vsel %vm3064_vm0, %v8408_v43, 64  ;;  %v3097_v63 = vsel %vm3065_vm12, %v8408_v43, 64  ;;  %v3098_v19 = vsel %vm3066_vm13, %v8408_v43, 64 }
 0x1b1   : > { %v3099_v48 = vsel %vm3067_vm14, %v8409_v41, 64  ;;  %vm8504_vm9 = vcmp.eq.f32.partialorder %v6354_v7, %v6618_v45  ;;  %vm8505_vm2 = vcmp.eq.f32.partialorder %v6361_v8, %v6621_v56  ;;  %vm8506_vm8 = vcmp.eq.f32.partialorder %v6367_v5, %v6623_v29 }
 0x1b2   : > { %v3100_v18 = vsel %vm8504_vm9, %v8409_v41, 64  ;;  %v3101_v52 = vsel %vm8505_vm2, %v8409_v41, 64  ;;  %v3102_v2 = vsel %vm8506_vm8, %v8409_v41, 64  ;;  %vm8508_vm13 = vcmp.eq.f32.partialorder %v6373_v27, %v6616_v50 }
 0x1b3   : > { %v3103_v22 = vsel %vm8508_vm13, %v8507_v11, 64  ;;  %vm8509_vm14 = vcmp.eq.f32.partialorder %v6379_v32, %v6618_v45  ;;  %vm8510_vm0 = vcmp.eq.f32.partialorder %v6385_v61, %v6621_v56  ;;  %vm8511_vm10 = vcmp.eq.f32.partialorder %v6391_v25, %v6623_v29 }
 0x1b4   : > { %v3104_v7 = vsel %vm8509_vm14, %v8507_v11, 64  ;;  %v3105_v8 = vsel %vm8510_vm0, %v8507_v11, 64  ;;  %v3106_v5 = vsel %vm8511_vm10, %v8507_v11, 64  ;;  %vm8513_vm6 = vcmp.eq.f32.partialorder %v6397_v57, %v6616_v50 }
 0x1b5   : > { %v3107_v27 = vsel %vm8513_vm6, %v8512_v12, 64  ;;  %vm8514_vm12 = vcmp.eq.f32.partialorder %v6403_v47, %v6618_v45  ;;  %vm8515_vm9 = vcmp.eq.f32.partialorder %v6409_v62, %v6621_v56  ;;  %vm8516_vm2 = vcmp.eq.f32.partialorder %v6415_v59, %v6623_v29 }
 0x1b6   : > { %v3108_v32 = vsel %vm8514_vm12, %v8512_v12, 64  ;;  %v3109_v61 = vsel %vm8515_vm9, %v8512_v12, 64  ;;  %v3110_v25 = vsel %vm8516_vm2, %v8512_v12, 64  ;;  %vm8518_vm8 = vcmp.eq.f32.partialorder %v6421_v38, %v6616_v50 }
 0x1b7   : > { %v3111_v57 = vsel %vm8518_vm8, %v8517_v40, 64  ;;  %vm8519_vm13 = vcmp.eq.f32.partialorder %v6427_v39, %v6618_v45  ;;  %vm8520_vm14 = vcmp.eq.f32.partialorder %v6433_v17, %v6621_v56  ;;  %vm8521_vm0 = vcmp.eq.f32.partialorder %v6439_v0, %v6623_v29 }
 0x1b8   : > { %v3112_v47 = vsel %vm8519_vm13, %v8517_v40, 64  ;;  %v3113_v62 = vsel %vm8520_vm14, %v8517_v40, 64  ;;  %v3114_v59 = vsel %vm8521_vm0, %v8517_v40, 64  ;;  %vm8523_vm10 = vcmp.eq.f32.partialorder %v6445_v49, %v6616_v50 }
 0x1b9   : > { %v3115_v38 = vsel %vm8523_vm10, %v8522_v54, 64  ;;  %v3116_v39 = vsel %vm3084_vm3, %v8522_v54, 64  ;;  %v3117_v17 = vsel %vm3085_vm5, %v8522_v54, 64  ;;  %v3118_v0 = vsel %vm3086_vm1, %v8522_v54, 64 }
 0x1ba   : > { %v3119_v49 = vsel %vm3087_vm4, %v8524_v6, 64  ;;  %v3120_v13 = vsel %vm3088_vm15, %v8524_v6, 64  ;;  %v3121_v14 = vsel %vm3089_vm11, %v8524_v6, 64  ;;  %v3122_v60 = vsel %vm3090_vm7, %v8524_v6, 64 }
 0x1bb   : > { %vm3123_vm1 = vcmp.lt.s32.totalorder %v3091_v58, %v3095_v37  ;;  %vm3146_vm5 = vcmp.lt.s32.totalorder %v3092_v15, %v3096_v36  ;;  %vm3169_vm3 = vcmp.lt.s32.totalorder %v3093_v26, %v3097_v63  ;;  %vm3192_vm6 = vcmp.lt.s32.totalorder %v3094_v51, %v3098_v19 }
 0x1bc   : > { %v3124_v34 = vsel %vm3123_vm1, %v3091_v58, %v3095_v37  ;;  %v3147_v35 = vsel %vm3146_vm5, %v3092_v15, %v3096_v36  ;;  %v3170_v44 = vsel %vm3169_vm3, %v3093_v26, %v3097_v63  ;;  %v3193_v30 = vsel %vm3192_vm6, %v3094_v51, %v3098_v19 }
 0x1bd   : > { %vm3125_vm4 = vcmp.lt.s32.totalorder %v3124_v34, %v3099_v48  ;;  %vm3148_vm15 = vcmp.lt.s32.totalorder %v3147_v35, %v3100_v18  ;;  %vm3171_vm12 = vcmp.lt.s32.totalorder %v3170_v44, %v3101_v52  ;;  %vm3194_vm9 = vcmp.lt.s32.totalorder %v3193_v30, %v3102_v2 }
 0x1be   : > { %v3126_v21 = vsel %vm3125_vm4, %v3124_v34, %v3099_v48  ;;  %v3149_v20 = vsel %vm3148_vm15, %v3147_v35, %v3100_v18  ;;  %v3172_v4 = vsel %vm3171_vm12, %v3170_v44, %v3101_v52  ;;  %v3195_v42 = vsel %vm3194_vm9, %v3193_v30, %v3102_v2  ;;  %v8531_v34 = vld [vmem:[#allocation12_spill] sm:$0xff]  ;;  %v8532_v35 = vld [vmem:[#allocation53_spill] sm:$0xff] }
 0x1bf   : > { %vm3127_vm11 = vcmp.lt.s32.totalorder %v3126_v21, %v3103_v22  ;;  %vm3150_vm2 = vcmp.lt.s32.totalorder %v3149_v20, %v3104_v7  ;;  %vm3173_vm8 = vcmp.lt.s32.totalorder %v3172_v4, %v3105_v8  ;;  %vm3196_vm7 = vcmp.lt.s32.totalorder %v3195_v42, %v3106_v5 }
 0x1c0   : > { %v3128_v31 = vsel %vm3127_vm11, %v3126_v21, %v3103_v22  ;;  %v3151_v6 = vsel %vm3150_vm2, %v3149_v20, %v3104_v7  ;;  %v3174_v54 = vsel %vm3173_vm8, %v3172_v4, %v3105_v8  ;;  %v3197_v40 = vsel %vm3196_vm7, %v3195_v42, %v3106_v5  ;;  %v8533_v21 = vld [vmem:[#allocation54_spill] sm:$0xff] }
 0x1c1   : > { %vm3129_vm13 = vcmp.lt.s32.totalorder %v3128_v31, %v3107_v27  ;;  %vm3152_vm14 = vcmp.lt.s32.totalorder %v3151_v6, %v3108_v32  ;;  %vm3175_vm0 = vcmp.lt.s32.totalorder %v3174_v54, %v3109_v61  ;;  %vm3198_vm10 = vcmp.lt.s32.totalorder %v3197_v40, %v3110_v25 }
 0x1c2   : > { %v3130_v58 = vsel %vm3129_vm13, %v3128_v31, %v3107_v27  ;;  %v3153_v15 = vsel %vm3152_vm14, %v3151_v6, %v3108_v32  ;;  %v3176_v26 = vsel %vm3175_vm0, %v3174_v54, %v3109_v61  ;;  %v3199_v51 = vsel %vm3198_vm10, %v3197_v40, %v3110_v25  ;;  %v8525_v27 = vld [vmem:[#allocation24_spill] sm:$0xff] }
 0x1c3   : > { %vm3131_vm1 = vcmp.lt.s32.totalorder %v3130_v58, %v3111_v57  ;;  %vm3154_vm5 = vcmp.lt.s32.totalorder %v3153_v15, %v3112_v47  ;;  %vm3177_vm3 = vcmp.lt.s32.totalorder %v3176_v26, %v3113_v62  ;;  %vm3200_vm6 = vcmp.lt.s32.totalorder %v3199_v51, %v3114_v59 }
 0x1c4   : > { %v3132_v30 = vsel %vm3131_vm1, %v3130_v58, %v3111_v57  ;;  %v3155_v44 = vsel %vm3154_vm5, %v3153_v15, %v3112_v47  ;;  %v3178_v37 = vsel %vm3177_vm3, %v3176_v26, %v3113_v62  ;;  %v3201_v36 = vsel %vm3200_vm6, %v3199_v51, %v3114_v59  ;;  %v8528_v57 = vld [vmem:[#allocation13_spill] sm:$0xff] }
 0x1c5   : > { %vm3133_vm4 = vcmp.lt.s32.totalorder %v3132_v30, %v3115_v38  ;;  %vm3156_vm15 = vcmp.lt.s32.totalorder %v3155_v44, %v3116_v39  ;;  %vm3179_vm12 = vcmp.lt.s32.totalorder %v3178_v37, %v3117_v17  ;;  %vm3202_vm9 = vcmp.lt.s32.totalorder %v3201_v36, %v3118_v0 }
 0x1c6   : > { %v3134_v42 = vsel %vm3133_vm4, %v3132_v30, %v3115_v38  ;;  %v3157_v4 = vsel %vm3156_vm15, %v3155_v44, %v3116_v39  ;;  %v3180_v63 = vsel %vm3179_vm12, %v3178_v37, %v3117_v17  ;;  %v3203_v19 = vsel %vm3202_vm9, %v3201_v36, %v3118_v0 }
 0x1c7   : > { %vm3135_vm11 = vcmp.lt.s32.totalorder %v3134_v42, %v3119_v49  ;;  %vm3158_vm2 = vcmp.lt.s32.totalorder %v3157_v4, %v3120_v13  ;;  %vm3181_vm8 = vcmp.lt.s32.totalorder %v3180_v63, %v3121_v14  ;;  %vm3204_vm7 = vcmp.lt.s32.totalorder %v3203_v19, %v3122_v60 }
 0x1c8   : > { %v3136_v48 = vsel %vm3135_vm11, %v3134_v42, %v3119_v49  ;;  %v3159_v18 = vsel %vm3158_vm2, %v3157_v4, %v3120_v13  ;;  %v3182_v52 = vsel %vm3181_vm8, %v3180_v63, %v3121_v14  ;;  %v3205_v2 = vsel %vm3204_vm7, %v3203_v19, %v3122_v60 }
 0x1c9   : > { %v3137_v22 = vrot.slane %v3136_v48, 4  ;;  %v3160_v7 = vrot.slane %v3159_v18, 4  ;;  %v3183_v8 = vrot.slane %v3182_v52, 4  ;;  %v3206_v5 = vrot.slane %v3205_v2, 4 }
 0x1ca   : > { %v2902_v32 = vmax.f32 %v8525_v27, 1e-16  ;;  %v8526_v61 = vmax.f32 %v8500_v16, 1e-16  ;;  %v8527_v25 = vshll.u32 %v6612_v28, 30  ;;  %v1228_v6 = vsub.s32 32, %v6606_v53 }
 0x1cb   : > { %v8152_v47 = vand.u32 2147483647, %v8528_v57  ;;  %vm3138_vm13 = vcmp.lt.s32.totalorder %v3136_v48, %v3137_v22  ;;  %vm3161_vm14 = vcmp.lt.s32.totalorder %v3159_v18, %v3160_v7  ;;  %vm3184_vm0 = vcmp.lt.s32.totalorder %v3182_v52, %v3183_v8 }
 0x1cc   : > { %4111 = vrcp.f32 %v8526_v61  ;;  %v6825_v40 = vsub.s32 %v6595_v24, %v8527_v25  ;;  %vm3207_vm10 = vcmp.lt.s32.totalorder %v3205_v2, %v3206_v5  ;;  %v3139_v62 = vsel %vm3138_vm13, %v3136_v48, %v3137_v22 }
 0x1cd   : > { %v3162_v59 = vsel %vm3161_vm14, %v3159_v18, %v3160_v7  ;;  %v3185_v54 = vsel %vm3184_vm0, %v3182_v52, %v3183_v8  ;;  %v3208_v38 = vsel %vm3207_vm10, %v3205_v2, %v3206_v5  ;;  %v3140_v39 = vrot.slane %v3139_v62, 2 }
 0x1ce   : > { %v3163_v17 = vrot.slane %v3162_v59, 2  ;;  %v3186_v0 = vrot.slane %v3185_v54, 2  ;;  %v3209_v16 = vrot.slane %v3208_v38, 2  ;;  %v8529_v49 = vmax.f32 %v8501_v33, 1e-16 }
 0x1cf   : > { %v1175_v24 = vsub.s32 0, %v6825_v40  ;;  %v6834_v13 = vand.u32 8388607, %v8152_v47  ;;  %v6837_v14 = vsub.s32 32, %v6610_v10  ;;  %v8530_v60 = vmax.f32 %v8502_v9, 1e-16 }
 0x1d0   : > { %4113 = vrcp.f32 %v8529_v49  ;;  %vm3141_vm1 = vcmp.lt.s32.totalorder %v3139_v62, %v3140_v39  ;;  %vm1111_vm5 = vcmp.lt.s32.totalorder %v8531_v34, 0  ;;  %vm3164_vm3 = vcmp.lt.s32.totalorder %v3162_v59, %v3163_v17 }
 0x1d1   : > { %4115 = vrcp.f32 %v8530_v60  ;;  %v3247_v33 = vmax.f32 %v6616_v50, 1e-16  ;;  %v1165_v20 = vadd.s32 %v8533_v21, %v8532_v35  ;;  %vm3187_vm6 = vcmp.lt.s32.totalorder %v3185_v54, %v3186_v0 }
 0x1d2   : > { %4117 = vrcp.f32 %v2902_v32  ;;  %vm3210_vm4 = vcmp.lt.s32.totalorder %v3208_v38, %v3209_v16  ;;  %v1195_v31 = vsub.s32 4, %v6612_v28  ;;  %v8534_v58 = vmov 683565275  }
 0x1d3   : > { %v1229_v15 = vshrl.u32 %v8534_v58, %v1228_v6  ;;  %v6847_v26 = vsel %vm3141_vm1, %v3139_v62, %v3140_v39  ;;  %v3923_v9 = vmin.u32 %v1175_v24, %v6825_v40  ;;  %v1221_v51 = vor.u32 8388608, %v6834_v13 }
 0x1d4   : > { %v1230_v30 = vshll.u32 %v8534_v58, %v6606_v53  ;;  %v6853_v44 = vsel %vm3164_vm3, %v3162_v59, %v3163_v17  ;;  %v3248_v50 = vmax.f32 %v6618_v45, 1e-16  ;;  %v3249_v37 = vmax.f32 %v6621_v56, 1e-16 }
 0x1d5   : > { %v8535_v36 = vmov 2475754826   ;;  %v6860_v63 = vsel %vm3187_vm6, %v3185_v54, %v3186_v0  ;;  %v6862_v19 = vsel %vm3210_vm4, %v3208_v38, %v3209_v16  ;;  %v3250_v48 = vmax.f32 %v6623_v29, 1e-16 }
 0x1d6   : > { %v1231_v42 = vshrl.u32 %v8535_v36, %v1228_v6  ;;  %v6858_v4 = vpop.eup %4111  ;;  %4119 = vrcp.f32 %v3247_v33  ;;  %v3143_v18 = vrot.slane %v6847_v26, 1  ;;  %v1177_v52 = vclz %v3923_v9 }
 0x1d7   : > { %v1196_v2 = vsel %vm1111_vm5, %v1195_v31, %v6612_v28  ;;  %v1233_v22 = vshll.u32 %v8535_v36, %v6606_v53  ;;  %v3166_v7 = vrot.slane %v6853_v44, 1  ;;  %v8536_v8 = vmov 2131351028  }
 0x1d8   : > { %v1234_v5 = vshrl.u32 %v8536_v8, %v1228_v6  ;;  %v1236_v27 = vshll.u32 %v8536_v8, %v6606_v53  ;;  %v8537_v32 = vmov 2102212464   ;;  %v3189_v25 = vrot.slane %v6860_v63, 1 }
 0x1d9   : > { %v1237_v61 = vshrl.u32 %v8537_v32, %v1228_v6  ;;  %v3212_v62 = vrot.slane %v6862_v19, 1  ;;  %v3924_v59 = vadd.s32 4294967294, %v1177_v52  ;;  %v1232_v54 = vor.u32 %v1231_v42, %v1230_v30 }
 0x1da   : > { %v6878_v38 = vpop.eup %4113  ;;  %v1235_v28 = vor.u32 %v1234_v5, %v1233_v22  ;;  %v1239_v17 = vshll.u32 %v8537_v32, %v6606_v53  ;;  %v8538_v0 = vmov 920167782   ;;  %v8539_v13 = vmov 1326507024  }
 0x1db   : > { %v1238_v39 = vor.u32 %v1237_v61, %v1236_v27  ;;  %v1240_v16 = vshrl.u32 %v8538_v0, %v1228_v6  ;;  %v6883_v49 = vpop.eup %4115  ;;  %vm3925_vm15 = vcmp.lt.s32.totalorder %v3924_v59, 0  ;;  %v1242_v24 = vshll.u32 %v8538_v0, %v6606_v53 }
 0x1dc   : > { %v1243_v60 = vshrl.u32 %v8539_v13, %v1228_v6  ;;  %vm1245_vm12 = vcmp.lt.s32.totalorder %v6603_v1, 1  ;;  %v6889_v33 = vpop.eup %4117  ;;  %v8540_v35 = vand.u32 2147483647, %v8531_v34  ;;  %v1180_v31 = vsel %vm3925_vm15, 0, %v3924_v59 }
 0x1dd   : > { %v1241_v9 = vor.u32 %v1240_v16, %v1239_v17  ;;  %vm1246_vm11 = vcmp.lt.s32.totalorder %v6603_v1, 2  ;;  %vm1247_vm2 = vcmp.lt.s32.totalorder %v6603_v1, 3  ;;  %v1181_v30 = vsub.s32 32, %v1180_v31 }
 0x1de   : > { %vm6893_vm9 = vcmp.le.f32.partialorder %v8540_v35, 0.7853982  ;;  %v1182_v53 = vshll.u32 %v6825_v40, %v1180_v31  ;;  %v1185_v6 = vsub.s32 4294967266, %v1180_v31  ;;  %v1244_v42 = vor.u32 %v1243_v60, %v1242_v24 }
 0x1df   : > { %vm1248_vm8 = vcmp.lt.s32.totalorder %v6603_v1, 4  ;;  %v1249_v52 = vsel %vm1245_vm12, %v1229_v15, %v1232_v54  ;;  %v1253_v22 = vsel %vm1245_vm12, %v1232_v54, %v1235_v28  ;;  %v1257_v5 = vsel %vm1245_vm12, %v1235_v28, %v1238_v39 }
 0x1e0   : > { %v1183_v27 = vshrl.u32 %v1165_v20, %v1181_v30  ;;  %v1186_v61 = vadd.s32 127, %v1185_v6  ;;  %v1250_v35 = vsel %vm1248_vm8, %v1238_v39, 2102212464  ;;  %v1254_v47 = vsel %vm1248_vm8, %v1241_v9, 920167782  ;;  %v6901_v59 = vpop.eup %4119 }
 0x1e1   : > { %8543 = vst [vmem:[#allocation75_spill] sm:$0xff] %v6901_v59  ;;  %v1251_v17 = vsel %vm1247_vm2, %v1235_v28, %v1250_v35  ;;  %v1255_v16 = vsel %vm1247_vm2, %v1238_v39, %v1254_v47  ;;  %v1258_v40 = vsel %vm1248_vm8, %v1244_v42, 1326507024  ;;  %v1261_v31 = vshll.u32 %v1221_v51, 8 }
 0x1e2   : > { %vm3144_vm7 = vcmp.lt.s32.totalorder %v6847_v26, %v3143_v18  ;;  %v1184_v24 = vor.u32 %v1183_v27, %v1182_v53  ;;  %v1187_v15 = vshll.u32 %v1186_v61, 23  ;;  %v1256_v20 = vsel %vm1246_vm11, %v1253_v22, %v1255_v16  ;;  %v8544_v27 = vld [vmem:[#allocation14_spill] sm:$0xff] }
 0x1e3   : > { %vm3167_vm13 = vcmp.lt.s32.totalorder %v6853_v44, %v3166_v7  ;;  %v1259_v54 = vsel %vm1247_vm2, %v1241_v9, %v1258_v40  ;;  %v6913_v60 = vmul.u32.u64.low %v1261_v31, %v1256_v20  ;;  %v6914_v30 = vmul.u32.u64.high %v1261_v31, %v1256_v20, %v6913_v60 }
 0x1e4   : > { %v1188_v28 = vor.u32 4788187, %v1187_v15  ;;  %v1191_v47 = vcvt.s32.f32 %v1184_v24  ;;  %v1252_v51 = vsel %vm1246_vm11, %v1249_v52, %v1251_v17  ;;  %v1260_v39 = vsel %vm1246_vm11, %v1257_v5, %v1259_v54  ;;  %v2263_v15 = vpop.permute.xlu0 %2262 }
 0x1e5   : > { %vm3190_vm14 = vcmp.lt.s32.totalorder %v6860_v63, %v3189_v25  ;;  %vm3213_vm0 = vcmp.lt.s32.totalorder %v6862_v19, %v3212_v62  ;;  %v6923_v53 = vmul.u32.u64.low %v1261_v31, %v1260_v39  ;;  %v6924_v6 = vmul.u32.u64.high %v1261_v31, %v1260_v39, %v6923_v53 }
 0x1e6   : > { %v6927_v9 = vsel %vm3144_vm7, %v6847_v26, %v3143_v18  ;;  %4121 = vrcp.f32 %v3248_v50  ;;  %v1189_v42 = vand.u32 2147483647, %v1188_v28  ;;  %v1198_v52 = vsel %vm6893_vm9, 0, %v1196_v2 }
 0x1e7   : > { %v6934_v1 = vsel %vm3167_vm13, %v6853_v44, %v3166_v7  ;;  %v1268_v22 = vmul.u32 %v1261_v31, %v1252_v51  ;;  %v1271_v5 = vadd.s32 1, %v6914_v30  ;;  %v1317_v61 = vand.u32 2147483647, %v8544_v27 }
 0x1e8   : > { %v6939_v35 = vsel %vm3190_vm14, %v6860_v63, %v3189_v25  ;;  %v6942_v26 = vsel %vm3213_vm0, %v6862_v19, %v3212_v62  ;;  %4123 = vrcp.f32 %v3249_v37  ;;  %v1192_v45 = vmul.f32 %v1191_v47, %v1189_v42 }
 0x1e9   : > { %v6946_v50 = vand.u32 3, %v1198_v52  ;;  %vm1270_vm10 = vc.u32 %v6924_v6, %v6913_v60  ;;  %v1334_v44 = vshll.u32 %v8534_v58, %v6610_v10  ;;  %v1335_v18 = vshrl.u32 %v8535_v36, %v6837_v14 }
 0x1ea   : > { %4125 = vrcp.f32 %v3250_v48  ;;  %v1193_v63 = vxor.u32 2147483648, %v1192_v45  ;;  %v1272_v19 = vsel %vm1270_vm10, %v1271_v5, %v6914_v30  ;;  %v1202_v56 = vadd.s32 3, %v1198_v52 }
 0x1eb   : > { %v1273_v37 = vadd.s32 %v1272_v19, %v1268_v22  ;;  %v1324_v2 = vand.u32 8388607, %v1317_v61  ;;  %v1333_v7 = vshrl.u32 %v8534_v58, %v6837_v14  ;;  %v1336_v25 = vor.u32 %v1335_v18, %v1334_v44 }
 0x1ec   : > { %v1194_v62 = vsel %vm1111_vm5, %v1193_v63, %v1192_v45  ;;  %v1337_v17 = vshll.u32 %v8535_v36, %v6610_v10  ;;  %v1338_v29 = vshrl.u32 %v8536_v8, %v6837_v14  ;;  %v1340_v48 = vshll.u32 %v8536_v8, %v6610_v10 }
 0x1ed   : > { %v1197_v16 = vsel %vm6893_vm9, %v8531_v34, %v1194_v62  ;;  %v1274_v40 = vadd.s32 536870912, %v1273_v37  ;;  %v1341_v58 = vshrl.u32 %v8537_v32, %v6837_v14  ;;  %v1343_v31 = vshll.u32 %v8537_v32, %v6610_v10 }
 0x1ee   : > { %4127 = vcosq.f32 %v1197_v16  ;;  %vm1215_vm1 = vcmp.lt.s32.totalorder %v8528_v57, 0  ;;  %v1339_v36 = vor.u32 %v1338_v29, %v1337_v17  ;;  %v1344_v24 = vshrl.u32 %v8538_v0, %v6837_v14  ;;  %v2267_v17 = vpop.permute.xlu0 %2266 }
 0x1ef   : > { %v1346_v8 = vshll.u32 %v8538_v0, %v6610_v10  ;;  %4129 = vsinq.f32 %v1197_v16  ;;  %v1275_v21 = vshrl.u32 %v1274_v40, 30  ;;  %v1342_v20 = vor.u32 %v1341_v58, %v1340_v48  ;;  %v4148_v48 = vld [vmem:[%s7889_s1 + $0x8] sm:$0xff] }
 0x1f0   : > { %v1347_v54 = vshrl.u32 %v8539_v13, %v6837_v14  ;;  %v6983_v30 = vpop.eup %4121  ;;  %v1325_v32 = vor.u32 8388608, %v1324_v2  ;;  %v1345_v28 = vor.u32 %v1344_v24, %v1343_v31  ;;  %vm1349_vm5 = vcmp.lt.s32.totalorder %v6608_v3, 1  ;;  %v2265_v13 = vpop.permute.xlu1 %2264 }
 0x1f1   : > { %8545 = vst [vmem:[#allocation76_spill] sm:$0xff] %v6983_v30  ;;  %vm1351_vm3 = vcmp.lt.s32.totalorder %v6608_v3, 3  ;;  %v8546_v47 = vand.u32 2147483647, %v8528_v57  ;;  %v1276_v10 = vshll.u32 %v1275_v21, 30  ;;  %vm1350_vm4 = vcmp.lt.s32.totalorder %v6608_v3, 2 }
 0x1f2   : > { %v1348_v0 = vor.u32 %v1347_v54, %v1346_v8  ;;  %vm1352_vm15 = vcmp.lt.s32.totalorder %v6608_v3, 4  ;;  %v6995_v14 = vpop.eup %4123  ;;  %vm2039_vm12 = vcmp.lt.s32.totalorder %v6946_v50, 2  ;;  %vm2040_vm9 = vcmp.eq.s32.totalorder %v6946_v50, 0  ;;  %v4149_v3 = vld [vmem:[%s7889_s1 + $0x10] sm:$0xff] }
 0x1f3   : > { %vm6989_vm6 = vcmp.le.f32.partialorder %v8546_v47, 0.7853982  ;;  %v1354_v39 = vsel %vm1352_vm15, %v1342_v20, 2102212464  ;;  %v1357_v53 = vsel %vm1349_vm5, %v1336_v25, %v1339_v36  ;;  %v1358_v42 = vsel %vm1352_vm15, %v1345_v28, 920167782 }
 0x1f4   : > { %vm1201_vm11 = vweird.f32 %v8531_v34  ;;  %v7006_v52 = vsub.s32 %v1273_v37, %v1276_v10  ;;  %v1299_v22 = vsub.s32 4, %v1275_v21  ;;  %v1203_v5 = vand.u32 3, %v1202_v56  ;;  %v7010_v44 = vpop.eup %4125 }
 0x1f5   : > { %v1359_v45 = vsel %vm1351_vm3, %v1342_v20, %v1358_v42  ;;  %vm2043_vm2 = vcmp.eq.s32.totalorder %v6946_v50, 2  ;;  %v1353_v18 = vsel %vm1349_vm5, %v1333_v7, %v1336_v25  ;;  %v1355_v63 = vsel %vm1351_vm3, %v1339_v36, %v1354_v39  ;;  %v4147_v7 = vld [vmem:[%s7889_s1] sm:$0xff]  ;;  %v4150_v42 = vld [vmem:[%s7889_s1 + $0x18] sm:$0xff] }
 0x1f6   : > { %v1360_v19 = vsel %vm1350_vm4, %v1357_v53, %v1359_v45  ;;  %v1279_v37 = vsub.s32 0, %v7006_v52  ;;  %v1361_v56 = vsel %vm1349_vm5, %v1339_v36, %v1342_v20  ;;  %v1362_v2 = vsel %vm1352_vm15, %v1348_v0, 1326507024  ;;  %v2271_v45 = vpop.permute.xlu0 %2270 }
 0x1f7   : > { %v1365_v62 = vshll.u32 %v1325_v32, 8  ;;  %v1269_v29 = vadd.s32 %v6913_v60, %v6924_v6  ;;  %v2286_v25 = vmul.f32 %v4147_v7, %v2263_v15  ;;  %v2287_v16 = vmul.f32 %v4148_v48, %v2265_v13  ;;  %v2269_v15 = vpop.permute.xlu1 %2268 }
 0x1f8   : > { %v1363_v40 = vsel %vm1351_vm3, %v1345_v28, %v1362_v2  ;;  %v3927_v58 = vmin.u32 %v1279_v37, %v7006_v52  ;;  %v1300_v31 = vsel %vm1215_vm1, %v1299_v22, %v1275_v21  ;;  %vm1205_vm8 = vcmp.eq.s32.totalorder %v1203_v5, 0  ;;  %v4128_v60 = vpop.eup %4127 }
 0x1f9   : > { %vm1208_vm7 = vcmp.eq.s32.totalorder %v1203_v5, 2  ;;  %v1356_v6 = vsel %vm1350_vm4, %v1353_v18, %v1355_v63  ;;  %v1364_v36 = vsel %vm1350_vm4, %v1361_v56, %v1363_v40  ;;  %v4130_v20 = vpop.eup %4129  ;;  %v1209_v54 = vxor.u32 2147483648, %v4128_v60 }
 0x1fa   : > { %v7041_v24 = vmul.u32.u64.low %v1365_v62, %v1360_v19  ;;  %v7042_v8 = vmul.u32.u64.high %v1365_v62, %v1360_v19, %v7041_v24  ;;  %v1281_v32 = vclz %v3927_v58  ;;  %v1206_v21 = vxor.u32 2147483648, %v4130_v20 }
 0x1fb   : > { %v7044_v28 = vmul.u32.u64.low %v1365_v62, %v1364_v36  ;;  %v7045_v47 = vmul.u32.u64.high %v1365_v62, %v1364_v36, %v7044_v28  ;;  %v1302_v10 = vsel %vm6989_vm6, 0, %v1300_v31  ;;  %vm1204_vm13 = vcmp.lt.s32.totalorder %v1203_v5, 2 }
 0x1fc   : > { %v2288_v0 = vmul.f32 %v4149_v3, %v2267_v17  ;;  %v2045_v13 = vsel %vm2043_vm2, %v1209_v54, %v4130_v20  ;;  %v3928_v39 = vadd.s32 4294967294, %v1281_v32  ;;  %v1210_v53 = vsel %vm1208_vm7, %v1209_v54, %v4130_v20  ;;  %v2275_v54 = vpop.permute.xlu0 %2274 }
 0x1fd   : > { %v2289_v22 = vmul.f32 %v4150_v42, %v2269_v15  ;;  %v2042_v18 = vsel %vm2040_vm9, %v4128_v60, %v1206_v21  ;;  %v1207_v63 = vsel %vm1205_vm8, %v4128_v60, %v1206_v21  ;;  %v1372_v19 = vmul.u32 %v1365_v62, %v1356_v6  ;;  %v8549_v60 = vld [vmem:[#allocation8_spill] sm:$0xff]  ;;  %v8556_v42 = vld [vmem:[#allocation67_spill] sm:$0xff] }
 0x1fe   : > { %v1375_v37 = vadd.s32 1, %v7042_v8  ;;  %v2046_v56 = vsel %vm2039_vm12, %v2042_v18, %v2045_v13  ;;  %vm3929_vm14 = vcmp.lt.s32.totalorder %v3928_v39, 0  ;;  %v1211_v2 = vsel %vm1204_vm13, %v1207_v63, %v1210_v53  ;;  %v8560_v63 = vld [vmem:[#allocation64_spill] sm:$0xff] }
 0x1ff   : > { %v1306_v17 = vadd.s32 3, %v1302_v10  ;;  %v2047_v7 = vsel %vm1201_vm11, nan, %v2046_v56  ;;  %v1284_v48 = vsel %vm3929_vm14, 0, %v3928_v39  ;;  %v1212_v40 = vsel %vm1201_vm11, nan, %v1211_v2 }
 0x200   : > { %vm1374_vm0 = vc.u32 %v7045_v47, %v7041_v24  ;;  %v2259_v62 = vmul.f32 %v2047_v7, %v8485_v46  ;;  %v1285_v58 = vsub.s32 32, %v1284_v48  ;;  %v1286_v31 = vshll.u32 %v7006_v52, %v1284_v48  ;;  %v8565_v7 = vld [vmem:[#allocation70_spill] sm:$0xff] }
 0x201   : > { %v1289_v50 = vsub.s32 4294967266, %v1284_v48  ;;  %v7073_v6 = vadd.f32 %v2286_v25, %v8549_v60  ;;  %v7076_v5 = vadd.f32 %v2287_v16, %v8549_v60  ;;  %v1427_v36 = vadd.f32 %v8485_v46, %v1212_v40  ;;  %v8566_v48 = vld [vmem:[#allocation66_spill] sm:$0xff] }
 0x202   : > { %vm1319_vm10 = vcmp.lt.s32.totalorder %v8544_v27, 0  ;;  %v1376_v34 = vsel %vm1374_vm0, %v1375_v37, %v7042_v8  ;;  %3526 = vperm.xlu1 %4079, %v2259_v62   ;;  %v1287_v15 = vshrl.u32 %v1269_v29, %v1285_v58  ;;  %vm7083_vm5 = vcmp.le.f32.partialorder %v1317_v61, 0.7853982  ;;  %v4151_v29 = vld [vmem:[%s7889_s1 + $0x20] sm:$0xff]  ;;  %v2273_v61 = vpop.permute.xlu1 %2272  ;;  %v8568_v62 = vld [vmem:[#allocation63_spill] sm:$0xff] }
 0x203   : > { %8550 = vst [vmem:[#allocation25_spill] sm:$0xff] %v7073_v6  ;;  %8551 = vst [vmem:[#allocation26_spill] sm:$0xff] %v7076_v5  ;;  %v1290_v20 = vadd.s32 127, %v1289_v50  ;;  %v1377_v25 = vadd.s32 %v1376_v34, %v1372_v19  ;;  %v7087_v32 = vand.u32 3, %v1302_v10  ;;  %3402 = vperm.xlu0 %4078, %v1427_v36   ;;  %v7090_v16 = vadd.f32 %v2288_v0, %v8549_v60  ;;  %v4152_v0 = vld [vmem:[%s7889_s1 + $0x30] sm:$0xff]  ;;  %v4153_v5 = vld [vmem:[%s7889_s1 + $0x28] sm:$0xff] }
 0x204   : > { %v7093_v28 = vadd.f32 %v2289_v22, %v8549_v60  ;;  %v2290_v8 = vmul.f32 %v4151_v29, %v2271_v45  ;;  %v1288_v21 = vor.u32 %v1287_v15, %v1286_v31  ;;  %v7098_v39 = vand.u32 3, %v1306_v17  ;;  %v8557_v22 = vld [vmem:[#allocation19_spill] sm:$0xff]  ;;  %v8559_v45 = vld [vmem:[#allocation68_spill] sm:$0xff]  ;;  %v8570_v31 = vld [vmem:[#allocation9_spill] sm:$0xff] }
 0x205   : > { %8554 = vst [vmem:[#allocation27_spill] sm:$0xff] %v7090_v16  ;;  %v1291_v3 = vshll.u32 %v1290_v20, 23  ;;  %v1378_v13 = vadd.s32 536870912, %v1377_v25  ;;  %v7101_v10 = vadd.s32 %v7041_v24, %v7045_v47  ;;  %v2292_v53 = vmul.f32 %v4152_v0, %v2275_v54  ;;  %v8562_v24 = vld [vmem:[#allocation69_spill] sm:$0xff]  ;;  %v8572_v36 = vld [vmem:[#allocation10_spill] sm:$0xff]  ;;  %v8574_v29 = vld [vmem:[#allocation15_spill] sm:$0xff] }
 0x206   : > { %8555 = vst [vmem:[#allocation28_spill] sm:$0xff] %v7093_v28  ;;  %vm8558_vm3 = vcmp.eq.s32.totalorder %v8407_v23, %v8557_v22  ;;  %vm8561_vm4 = vcmp.eq.s32.totalorder %v8407_v23, %v8560_v63  ;;  %v1295_v56 = vcvt.s32.f32 %v1288_v21  ;;  %v8563_v47 = vld [vmem:[#allocation65_spill] sm:$0xff]  ;;  %vm8567_vm12 = vcmp.eq.s32.totalorder %v8407_v23, %v8566_v48 }
 0x207   : > { %v2563_v18 = vsel %vm8558_vm3, %v8556_v42, 0.0  ;;  %v2564_v19 = vsel %vm8561_vm4, %v8559_v45, 0.0  ;;  %v1292_v37 = vor.u32 4788187, %v1291_v3  ;;  %v1379_v2 = vshrl.u32 %v1378_v13, 30  ;;  %v2277_v3 = vpop.permute.xlu1 %2276 }
 0x208   : > { %vm8564_vm15 = vcmp.eq.s32.totalorder %v8407_v23, %v8563_v47  ;;  %v2566_v40 = vsel %vm8567_vm12, %v8565_v7, 0.0  ;;  %vm8569_vm9 = vcmp.eq.s32.totalorder %v8407_v23, %v8568_v62  ;;  %vm8571_vm11 = vcmp.eq.s32.totalorder %v8407_v23, %v8570_v31 }
 0x209   : > { %v2565_v17 = vsel %vm8564_vm15, %v8562_v24, 0.0  ;;  %v2911_v58 = vsel %vm8569_vm9, %v6858_v4, 0.0  ;;  %v2912_v50 = vsel %vm8571_vm11, %v6878_v38, 0.0  ;;  %vm8573_vm2 = vcmp.eq.s32.totalorder %v8407_v23, %v8572_v36 }
 0x20a   : > { %v2913_v34 = vsel %vm8573_vm2, %v6883_v49, 0.0  ;;  %v1293_v15 = vand.u32 2147483647, %v1292_v37  ;;  %v1380_v20 = vshll.u32 %v1379_v2, 30  ;;  %v1403_v54 = vsub.s32 4, %v1379_v2 }
 0x20b   : > { %vm8575_vm8 = vcmp.eq.s32.totalorder %v8407_v23, %v8574_v29  ;;  %v2943_v13 = vadd.f32 %v2911_v58, %v2563_v18  ;;  %v2944_v0 = vadd.f32 %v2912_v50, %v2564_v19  ;;  %v2945_v28 = vadd.f32 %v2913_v34, %v2565_v17 }
 0x20c   : > { %v2914_v21 = vsel %vm8575_vm8, %v6889_v33, 0.0  ;;  %v1296_v12 = vmul.f32 %v1295_v56, %v1293_v15  ;;  %v7138_v11 = vsub.s32 %v1377_v25, %v1380_v20  ;;  %v1404_v16 = vsel %vm1319_vm10, %v1403_v54, %v1379_v2  ;;  %v4154_v56 = vld [vmem:[%s7889_s1 + $0x38] sm:$0xff] }
 0x20d   : > { %v2946_v6 = vadd.f32 %v2914_v21, %v2566_v40  ;;  %vm3215_vm7 = vcmp.eq.s32.totalorder %v8407_v23, %v6927_v9  ;;  %v1406_v37 = vsel %vm7083_vm5, 0, %v1404_v16  ;;  %v2291_v18 = vmul.f32 %v4153_v5, %v2273_v61 }
 0x20e   : > { %vm3216_vm13 = vcmp.eq.s32.totalorder %v8407_v23, %v6934_v1  ;;  %vm3217_vm14 = vcmp.eq.s32.totalorder %v8407_v23, %v6939_v35  ;;  %v1297_v25 = vxor.u32 2147483648, %v1296_v12  ;;  %v1383_v19 = vsub.s32 0, %v7138_v11 }
 0x20f   : > { %v2293_v2 = vmul.f32 %v4154_v56, %v2277_v3  ;;  %vm3218_vm0 = vcmp.eq.s32.totalorder %v8407_v23, %v6942_v26  ;;  %v1410_v16 = vadd.s32 3, %v1406_v37  ;;  %v7160_v5 = vadd.f32 %v2290_v8, %v8549_v60  ;;  %v3378_v3 = vpop.permute.xlu0 %3377 }
 0x210   : > { %v7163_v61 = vadd.f32 %v2292_v53, %v8549_v60  ;;  %v3259_v17 = vsel %vm3215_vm7, %v6901_v59, 0.0  ;;  %v1298_v40 = vsel %vm1215_vm1, %v1297_v25, %v1296_v12  ;;  %v3931_v58 = vmin.u32 %v1383_v19, %v7138_v11 }
 0x211   : > { %8576 = vst [vmem:[#allocation29_spill] sm:$0xff] %v7160_v5  ;;  %v3260_v50 = vsel %vm3216_vm13, %v6983_v30, 0.0  ;;  %v3261_v34 = vsel %vm3217_vm14, %v6995_v14, 0.0  ;;  %v1301_v23 = vsel %vm6989_vm6, %v8528_v57, %v1298_v40  ;;  %v7175_v8 = vadd.f32 %v2291_v18, %v8549_v60 }
 0x212   : > { %8577 = vst [vmem:[#allocation18_spill] sm:$0xff] %v7163_v61  ;;  %v3262_v53 = vsel %vm3218_vm0, %v7010_v44, 0.0  ;;  %v7178_v15 = vadd.f32 %v3259_v17, %v2943_v13  ;;  %4131 = vcosq.f32 %v1301_v23  ;;  %v1385_v20 = vclz %v3931_v58 }
 0x213   : > { %8578 = vst [vmem:[#allocation30_spill] sm:$0xff] %v7175_v8  ;;  %v7181_v12 = vadd.f32 %v2293_v2, %v8549_v60  ;;  %v7183_v54 = vand.u32 3, %v1406_v37  ;;  %4133 = vsinq.f32 %v1301_v23  ;;  %v7185_v21 = vand.u32 3, %v1410_v16 }
 0x214   : > { %8579 = vst [vmem:[#allocation31_spill] sm:$0xff] %v7178_v15  ;;  %v7187_v51 = vadd.f32 %v3260_v50, %v2944_v0  ;;  %v7189_v25 = vadd.f32 %v3261_v34, %v2945_v28  ;;  %vm2146_vm1 = vcmp.eq.s32.totalorder %v7087_v32, 2  ;;  %v3932_v18 = vadd.s32 4294967294, %v1385_v20 }
 0x215   : > { %8580 = vst [vmem:[#allocation32_spill] sm:$0xff] %v7181_v12  ;;  %vm1312_vm6 = vcmp.eq.s32.totalorder %v7098_v39, 2  ;;  %v7193_v13 = vadd.f32 %v3262_v53, %v2946_v6  ;;  %v7196_v60 = vmul.f32 %v3378_v3, %v7178_v15  ;;  %vm8584_vm3 = vcmp.eq.s32.totalorder %v8408_v43, %v8557_v22 }
 0x216   : > { %8581 = vst [vmem:[#allocation33_spill] sm:$0xff] %v7187_v51  ;;  %8582 = vst [vmem:[#allocation34_spill] sm:$0xff] %v7189_v25  ;;  %v2567_v37 = vsel %vm8584_vm3, %v8556_v42, 0.0  ;;  %vm2143_vm4 = vcmp.eq.s32.totalorder %v7087_v32, 0  ;;  %vm1309_vm15 = vcmp.eq.s32.totalorder %v7098_v39, 0  ;;  %v7205_v28 = vmul.f32 %v3378_v3, %v7187_v51 }
 0x217   : > { %8583 = vst [vmem:[#allocation35_spill] sm:$0xff] %v7193_v13  ;;  %v7208_v0 = vmul.f32 %v3378_v3, %v7189_v25  ;;  %vm8585_vm12 = vcmp.eq.s32.totalorder %v8408_v43, %v8560_v63  ;;  %vm8586_vm9 = vcmp.eq.s32.totalorder %v8408_v43, %v8563_v47  ;;  %vm2142_vm11 = vcmp.lt.s32.totalorder %v7087_v32, 2 }
 0x218   : > { %v2568_v6 = vsel %vm8585_vm12, %v8559_v45, 0.0  ;;  %v2569_v19 = vsel %vm8586_vm9, %v8562_v24, 0.0  ;;  %vm3933_vm2 = vcmp.lt.s32.totalorder %v3932_v18, 0  ;;  %vm1308_vm8 = vcmp.lt.s32.totalorder %v7098_v39, 2 }
 0x219   : > { %v7221_v56 = vmul.f32 %v3378_v3, %v7193_v13  ;;  %vm8587_vm7 = vcmp.eq.s32.totalorder %v8408_v43, %v8566_v48  ;;  %vm8588_vm13 = vcmp.eq.s32.totalorder %v8408_v43, %v8568_v62  ;;  %vm1305_vm14 = vweird.f32 %v8528_v57 }
 0x21a   : > { %v2570_v2 = vsel %vm8587_vm7, %v8565_v7, 0.0  ;;  %v2915_v16 = vsel %vm8588_vm13, %v6858_v4, 0.0  ;;  %v1388_v17 = vsel %vm3933_vm2, 0, %v3932_v18  ;;  %vm8589_vm0 = vcmp.eq.s32.totalorder %v8408_v43, %v8570_v31 }
 0x21b   : > { %v2916_v40 = vsel %vm8589_vm0, %v6878_v38, 0.0  ;;  %vm8590_vm3 = vcmp.eq.s32.totalorder %v8408_v43, %v8572_v36  ;;  %vm8591_vm12 = vcmp.eq.s32.totalorder %v8408_v43, %v8574_v29  ;;  %v1389_v34 = vsub.s32 32, %v1388_v17 }
 0x21c   : > { %v2917_v58 = vsel %vm8590_vm3, %v6883_v49, 0.0  ;;  %v2918_v50 = vsel %vm8591_vm12, %v6889_v33, 0.0  ;;  %v1390_v23 = vshll.u32 %v7138_v11, %v1388_v17  ;;  %v1393_v53 = vsub.s32 4294967266, %v1388_v17 }
 0x21d   : > { %v2947_v20 = vadd.f32 %v2915_v16, %v2567_v37  ;;  %v2948_v3 = vadd.f32 %v2916_v40, %v2568_v6  ;;  %v2949_v18 = vadd.f32 %v2917_v58, %v2569_v19  ;;  %v2950_v12 = vadd.f32 %v2918_v50, %v2570_v2  ;;  %v4132_v19 = vpop.eup %4131  ;;  %v3383_v50 = vpop.permute.xlu1 %3382 }
 0x21e   : > { %vm3219_vm9 = vcmp.eq.s32.totalorder %v8408_v43, %v6927_v9  ;;  %v1391_v8 = vshrl.u32 %v7101_v10, %v1389_v34  ;;  %v1394_v5 = vadd.s32 127, %v1393_v53  ;;  %vm3220_vm2 = vcmp.eq.s32.totalorder %v8408_v43, %v6934_v1  ;;  %v4134_v40 = vpop.eup %4133 }
 0x21f   : > { %vm3221_vm7 = vcmp.eq.s32.totalorder %v8408_v43, %v6939_v35  ;;  %vm3222_vm13 = vcmp.eq.s32.totalorder %v8408_v43, %v6942_v26  ;;  %v3263_v11 = vsel %vm3219_vm9, %v6901_v59, 0.0  ;;  %v3264_v37 = vsel %vm3220_vm2, %v6983_v30, 0.0 }
 0x220   : > { %v3265_v6 = vsel %vm3221_vm7, %v6995_v14, 0.0  ;;  %v1392_v2 = vor.u32 %v1391_v8, %v1390_v23  ;;  %v1395_v16 = vshll.u32 %v1394_v5, 23  ;;  %v3266_v10 = vsel %vm3222_vm13, %v7010_v44, 0.0 }
 0x221   : > { %v7258_v17 = vadd.f32 %v3263_v11, %v2947_v20  ;;  %v1313_v58 = vxor.u32 2147483648, %v4132_v19  ;;  %v7260_v34 = vadd.f32 %v3264_v37, %v2948_v3  ;;  %v7262_v53 = vadd.f32 %v3265_v6, %v2949_v18 }
 0x222   : > { %v7264_v43 = vadd.f32 %v3266_v10, %v2950_v12  ;;  %v1310_v61 = vxor.u32 2147483648, %v4134_v40  ;;  %v1396_v30 = vor.u32 4788187, %v1395_v16  ;;  %v1399_v59 = vcvt.s32.f32 %v1392_v2 }
 0x223   : > { %8592 = vst [vmem:[#allocation36_spill] sm:$0xff] %v7258_v17  ;;  %8593 = vst [vmem:[#allocation37_spill] sm:$0xff] %v7260_v34  ;;  %v7268_v8 = vadd.f32 %v7258_v17, %v7178_v15  ;;  %v2148_v5 = vsel %vm2146_vm1, %v1313_v58, %v4134_v40  ;;  %v1314_v23 = vsel %vm1312_vm6, %v1313_v58, %v4134_v40  ;;  %vm2249_vm0 = vcmp.eq.s32.totalorder %v7183_v54, 2 }
 0x224   : > { %8594 = vst [vmem:[#allocation38_spill] sm:$0xff] %v7262_v53  ;;  %8595 = vst [vmem:[#allocation39_spill] sm:$0xff] %v7264_v43  ;;  %v7276_v20 = vadd.f32 %v7260_v34, %v7187_v51  ;;  %v7280_v12 = vadd.f32 %v7262_v53, %v7189_v25  ;;  %v2145_v3 = vsel %vm2143_vm4, %v4132_v19, %v1310_v61  ;;  %v1397_v18 = vand.u32 2147483647, %v1396_v30 }
 0x225   : > { %v1311_v11 = vsel %vm1309_vm15, %v4132_v19, %v1310_v61  ;;  %v7288_v37 = vadd.f32 %v7264_v43, %v7193_v13  ;;  %v2149_v6 = vsel %vm2142_vm11, %v2145_v3, %v2148_v5  ;;  %v3419_v16 = vmul.f32 %v3383_v50, %v7258_v17 }
 0x226   : > { %v1315_v2 = vsel %vm1308_vm8, %v1311_v11, %v1314_v23  ;;  %v3420_v10 = vmul.f32 %v3383_v50, %v7260_v34  ;;  %v2150_v30 = vsel %vm1305_vm14, nan, %v2149_v6  ;;  %v1400_v40 = vmul.f32 %v1399_v59, %v1397_v18  ;;  %v3507_v23 = vpop.permute.xlu1 %3506 }
 0x227   : > { %v1316_v61 = vsel %vm1305_vm14, nan, %v1315_v2  ;;  %v3421_v19 = vmul.f32 %v3383_v50, %v7262_v53  ;;  %v2260_v58 = vmul.f32 %v2150_v30, %v8485_v46  ;;  %v3422_v39 = vmul.f32 %v3383_v50, %v7264_v43 }
 0x228   : > { %v1428_v32 = vadd.f32 %v8485_v46, %v1316_v61  ;;  %v7305_v5 = vadd.f32 %v3419_v16, %v7196_v60  ;;  %v1401_v3 = vxor.u32 2147483648, %v1400_v40  ;;  %v7308_v11 = vadd.f32 %v3420_v10, %v7205_v28 }
 0x229   : > { %v7311_v59 = vadd.f32 %v3421_v19, %v7208_v0  ;;  %v7314_v57 = vmul.f32 %v3507_v23, %v7258_v17  ;;  %3531 = vperm.xlu1 %4079, %v2260_v58   ;;  %v7317_v18 = vadd.f32 %v3422_v39, %v7221_v56  ;;  %v7320_v50 = vmul.f32 %v3507_v23, %v7260_v34  ;;  %v8607_v58 = vld [vmem:[#allocation26_spill] sm:$0xff] }
 0x22a   : > { %3407 = vperm.xlu0 %4078, %v1428_v32   ;;  %v7323_v60 = vmul.f32 %v3507_v23, %v7262_v53  ;;  %vm8598_vm1 = vcmp.eq.s32.totalorder %v8409_v41, %v8557_v22  ;;  %v1402_v0 = vsel %vm1319_vm10, %v1401_v3, %v1400_v40  ;;  %v7332_v6 = vmul.f32 %v3507_v23, %v7264_v43  ;;  %v3388_v32 = vpop.permute.xlu1 %3387 }
 0x22b   : > { %8596 = vst [vmem:[#allocation40_spill] sm:$0xff] %v7320_v50  ;;  %v2571_v28 = vsel %vm8598_vm1, %v8556_v42, 0.0  ;;  %vm8600_vm6 = vcmp.eq.s32.totalorder %v8409_v41, %v8560_v63  ;;  %vm8601_vm4 = vcmp.eq.s32.totalorder %v8409_v41, %v8563_v47  ;;  %v1405_v16 = vsel %vm7083_vm5, %v8544_v27, %v1402_v0 }
 0x22c   : > { %8597 = vst [vmem:[#allocation41_spill] sm:$0xff] %v7323_v60  ;;  %8599 = vst [vmem:[#allocation42_spill] sm:$0xff] %v7332_v6  ;;  %v2572_v56 = vsel %vm8600_vm6, %v8559_v45, 0.0  ;;  %v2573_v2 = vsel %vm8601_vm4, %v8562_v24, 0.0  ;;  %vm8602_vm10 = vcmp.eq.s32.totalorder %v8409_v41, %v8566_v48  ;;  %vm8603_vm15 = vcmp.eq.s32.totalorder %v8409_v41, %v8568_v62  ;;  %v8622_v6 = vld [vmem:[#allocation18_spill] sm:$0xff] }
 0x22d   : > { %v2574_v10 = vsel %vm8602_vm10, %v8565_v7, 0.0  ;;  %v2919_v30 = vsel %vm8603_vm15, %v6858_v4, 0.0  ;;  %vm8604_vm11 = vcmp.eq.s32.totalorder %v8409_v41, %v8570_v31  ;;  %4135 = vcosq.f32 %v1405_v16  ;;  %4080 = vset.pattern.permute.xlu1 %v8503_v55 }
 0x22e   : > { %v2920_v40 = vsel %vm8604_vm11, %v6878_v38, 0.0  ;;  %vm8605_vm5 = vcmp.eq.s32.totalorder %v8409_v41, %v8572_v36  ;;  %vm8606_vm8 = vcmp.eq.s32.totalorder %v8409_v41, %v8574_v29  ;;  %v2951_v19 = vadd.f32 %v2919_v30, %v2571_v28  ;;  %3630 = vperm.xlu0 %4078, %v8607_v58   ;;  %v8608_v28 = vld [vmem:[#allocation75_spill] sm:$0xff]  ;;  %v3512_v17 = vpop.permute.xlu1 %3511 }
 0x22f   : > { %v2921_v52 = vsel %vm8605_vm5, %v6883_v49, 0.0  ;;  %v2922_v61 = vsel %vm8606_vm8, %v6889_v33, 0.0  ;;  %4137 = vsinq.f32 %v1405_v16  ;;  %v2952_v39 = vadd.f32 %v2920_v40, %v2572_v56  ;;  %v8609_v56 = vld [vmem:[#allocation76_spill] sm:$0xff]  ;;  %v8615_v58 = vld [vmem:[#allocation55_spill] sm:$0xff] }
 0x230   : > { %v2953_v23 = vadd.f32 %v2921_v52, %v2573_v2  ;;  %v2954_v3 = vadd.f32 %v2922_v61, %v2574_v10  ;;  %vm1416_vm14 = vcmp.eq.s32.totalorder %v7185_v21, 2  ;;  %vm3223_vm3 = vcmp.eq.s32.totalorder %v8409_v41, %v6927_v9  ;;  %v8614_v61 = vld [vmem:[#allocation27_spill] sm:$0xff] }
 0x231   : > { %vm3224_vm12 = vcmp.eq.s32.totalorder %v8409_v41, %v6934_v1  ;;  %vm3225_vm9 = vcmp.eq.s32.totalorder %v8409_v41, %v6939_v35  ;;  %vm3226_vm2 = vcmp.eq.s32.totalorder %v8409_v41, %v6942_v26  ;;  %vm1413_vm7 = vcmp.eq.s32.totalorder %v7185_v21, 0 }
 0x232   : > { %vm2246_vm13 = vcmp.eq.s32.totalorder %v7183_v54, 0  ;;  %v3267_v0 = vsel %vm3223_vm3, %v8608_v28, 0.0  ;;  %v3268_v2 = vsel %vm3224_vm12, %v8609_v56, 0.0  ;;  %v3269_v16 = vsel %vm3225_vm9, %v6995_v14, 0.0  ;;  %3635 = vperm.xlu0 %4078, %v8614_v61  }
 0x233   : > { %v3270_v10 = vsel %vm3226_vm2, %v7010_v44, 0.0  ;;  %vm1412_vm1 = vcmp.lt.s32.totalorder %v7185_v21, 2  ;;  %vm2245_vm6 = vcmp.lt.s32.totalorder %v7183_v54, 2  ;;  %v7385_v30 = vadd.f32 %v3267_v0, %v2951_v19  ;;  %v3393_v54 = vpop.permute.xlu1 %3392 }
 0x234   : > { %v7387_v40 = vadd.f32 %v3268_v2, %v2952_v39  ;;  %v7389_v41 = vadd.f32 %v3269_v16, %v2953_v23  ;;  %v7391_v52 = vadd.f32 %v3270_v10, %v2954_v3  ;;  %vm1409_vm4 = vweird.f32 %v8544_v27 }
 0x235   : > { %8610 = vst [vmem:[#allocation43_spill] sm:$0xff] %v7385_v30  ;;  %vm8616_vm10 = vcmp.eq.s32.totalorder %v8615_v58, %v8557_v22  ;;  %vm8617_vm15 = vcmp.eq.s32.totalorder %v8615_v58, %v8560_v63  ;;  %vm8618_vm11 = vcmp.eq.s32.totalorder %v8615_v58, %v8563_v47  ;;  %vm8619_vm5 = vcmp.eq.s32.totalorder %v8615_v58, %v8566_v48 }
 0x236   : > { %8611 = vst [vmem:[#allocation44_spill] sm:$0xff] %v7387_v40  ;;  %8612 = vst [vmem:[#allocation45_spill] sm:$0xff] %v7389_v41  ;;  %v2575_v43 = vsel %vm8616_vm10, %v8556_v42, 0.0  ;;  %v2576_v19 = vsel %vm8617_vm15, %v8559_v45, 0.0  ;;  %v2577_v39 = vsel %vm8618_vm11, %v8562_v24, 0.0  ;;  %v2578_v23 = vsel %vm8619_vm5, %v8565_v7, 0.0  ;;  %3655 = vperm.xlu0 %4078, %v8622_v6  }
 0x237   : > { %8613 = vst [vmem:[#allocation46_spill] sm:$0xff] %v7391_v52  ;;  %v3324_v3 = vadd.f32 %v7268_v8, %v7385_v30  ;;  %v3337_v0 = vadd.f32 %v7276_v20, %v7387_v40  ;;  %v3350_v2 = vadd.f32 %v7280_v12, %v7389_v41  ;;  %v3363_v16 = vadd.f32 %v7288_v37, %v7391_v52 }
 0x238   : > { %v3423_v10 = vmul.f32 %v3388_v32, %v7385_v30  ;;  %v3424_v61 = vmul.f32 %v3388_v32, %v7387_v40  ;;  %v3425_v53 = vmul.f32 %v3388_v32, %v7389_v41  ;;  %v3426_v34 = vmul.f32 %v3388_v32, %v7391_v52 }
 0x239   : > { %v7424_v8 = vmul.f32 %v3512_v17, %v7385_v30  ;;  %v7427_v20 = vmul.f32 %v3512_v17, %v7387_v40  ;;  %v7430_v12 = vmul.f32 %v3512_v17, %v7389_v41  ;;  %v7433_v37 = vmul.f32 %v3512_v17, %v7391_v52 }
 0x23a   : > { %v3448_v60 = vadd.f32 %v7305_v5, %v3423_v10  ;;  %v3461_v50 = vadd.f32 %v7308_v11, %v3424_v61  ;;  %v3474_v32 = vadd.f32 %v7311_v59, %v3425_v53  ;;  %v3487_v30 = vadd.f32 %v7317_v18, %v3426_v34 }
 0x23b   : > { %8620 = vst [vmem:[#allocation47_spill] sm:$0xff] %v7424_v8  ;;  %8621 = vst [vmem:[#allocation48_spill] sm:$0xff] %v7433_v37  ;;  %v4136_v8 = vpop.eup %4135  ;;  %vm8623_vm8 = vcmp.eq.s32.totalorder %v8615_v58, %v8568_v62  ;;  %vm8624_vm3 = vcmp.eq.s32.totalorder %v8615_v58, %v8570_v31  ;;  %vm8625_vm12 = vcmp.eq.s32.totalorder %v8615_v58, %v8572_v36  ;;  %v8627_v40 = vmov 1  }
 0x23c   : > { %v2923_v41 = vsel %vm8623_vm8, %v6858_v4, 0.0  ;;  %v2924_v17 = vsel %vm8624_vm3, %v6878_v38, 0.0  ;;  %v2925_v5 = vsel %vm8625_vm12, %v6883_v49, 0.0  ;;  %vm8626_vm9 = vcmp.eq.s32.totalorder %v8615_v58, %v8574_v29  ;;  %v4138_v53 = vpop.eup %4137  ;;  %4081 = vset.pattern.permute.xlu0 %v8627_v40 }
 0x23d   : > { %v2926_v34 = vsel %vm8626_vm9, %v6889_v33, 0.0  ;;  %v1417_v11 = vxor.u32 2147483648, %v4136_v8  ;;  %v2955_v59 = vadd.f32 %v2923_v41, %v2575_v43  ;;  %v2956_v18 = vadd.f32 %v2924_v17, %v2576_v19 }
 0x23e   : > { %v2957_v6 = vadd.f32 %v2925_v5, %v2577_v39  ;;  %v1414_v10 = vxor.u32 2147483648, %v4138_v53  ;;  %v2958_v61 = vadd.f32 %v2926_v34, %v2578_v23  ;;  %vm3227_vm2 = vcmp.eq.s32.totalorder %v8615_v58, %v6927_v9 }
 0x23f   : > { %vm3228_vm10 = vcmp.eq.s32.totalorder %v8615_v58, %v6934_v1  ;;  %v1418_v52 = vsel %vm1416_vm14, %v1417_v11, %v4138_v53  ;;  %v2251_v37 = vsel %vm2249_vm0, %v1417_v11, %v4138_v53  ;;  %vm3229_vm15 = vcmp.eq.s32.totalorder %v8615_v58, %v6939_v35 }
 0x240   : > { %vm3230_vm11 = vcmp.eq.s32.totalorder %v8615_v58, %v6942_v26  ;;  %v1415_v43 = vsel %vm1413_vm7, %v4136_v8, %v1414_v10  ;;  %v2248_v41 = vsel %vm2246_vm13, %v4136_v8, %v1414_v10  ;;  %v3271_v19 = vsel %vm3227_vm2, %v8608_v28, 0.0 }
 0x241   : > { %v3272_v39 = vsel %vm3228_vm10, %v8609_v56, 0.0  ;;  %v1419_v40 = vsel %vm1412_vm1, %v1415_v43, %v1418_v52  ;;  %v2252_v23 = vsel %vm2245_vm6, %v2248_v41, %v2251_v37  ;;  %v3273_v17 = vsel %vm3229_vm15, %v6995_v14, 0.0 }
 0x242   : > { %v3274_v58 = vsel %vm3230_vm11, %v7010_v44, 0.0  ;;  %v1420_v5 = vsel %vm1409_vm4, nan, %v1419_v40  ;;  %v2253_v8 = vsel %vm1409_vm4, nan, %v2252_v23  ;;  %v7485_v34 = vadd.f32 %v3271_v19, %v2955_v59 }
 0x243   : > { %v7487_v53 = vadd.f32 %v3272_v39, %v2956_v18  ;;  %v1429_v21 = vadd.f32 %v8485_v46, %v1420_v5  ;;  %v2261_v52 = vmul.f32 %v2253_v8, %v8485_v46  ;;  %v7491_v37 = vadd.f32 %v3273_v17, %v2957_v6  ;;  %v8630_v6 = vld [vmem:[#allocation56_spill] sm:$0xff] }
 0x244   : > { %v7493_v11 = vadd.f32 %v3274_v58, %v2958_v61  ;;  %v3325_v10 = vadd.f32 %v3324_v3, %v7485_v34  ;;  %v3427_v27 = vmul.f32 %v3393_v54, %v7485_v34  ;;  %vm8631_vm14 = vcmp.eq.s32.totalorder %v8630_v6, %v8557_v22  ;;  %v8639_v58 = vld [vmem:[#allocation25_spill] sm:$0xff] }
 0x245   : > { %8628 = vst [vmem:[#allocation49_spill] sm:$0xff] %v7487_v53  ;;  %8629 = vst [vmem:[#allocation21_spill] sm:$0xff] %v7491_v37  ;;  %v3338_v43 = vadd.f32 %v3337_v0, %v7487_v53  ;;  %v3428_v59 = vmul.f32 %v3393_v54, %v7487_v53  ;;  %3412 = vperm.xlu1 %4080, %v1429_v21   ;;  %3536 = vperm.xlu0 %4081, %v2261_v52   ;;  %v2579_v61 = vsel %vm8631_vm14, %v8556_v42, 0.0 }
 0x246   : > { %v3351_v18 = vadd.f32 %v3350_v2, %v7491_v37  ;;  %v3364_v41 = vadd.f32 %v3363_v16, %v7493_v11  ;;  %v3429_v46 = vmul.f32 %v3393_v54, %v7491_v37  ;;  %v3430_v3 = vmul.f32 %v3393_v54, %v7493_v11 }
 0x247   : > { %v3449_v0 = vadd.f32 %v3448_v60, %v3427_v27  ;;  %v3462_v19 = vadd.f32 %v3461_v50, %v3428_v59  ;;  %vm8632_vm0 = vcmp.eq.s32.totalorder %v8630_v6, %v8560_v63  ;;  %vm8633_vm7 = vcmp.eq.s32.totalorder %v8630_v6, %v8563_v47 }
 0x248   : > { %v2580_v39 = vsel %vm8632_vm0, %v8559_v45, 0.0  ;;  %v3475_v40 = vadd.f32 %v3474_v32, %v3429_v46  ;;  %v2581_v2 = vsel %vm8633_vm7, %v8562_v24, 0.0  ;;  %vm8634_vm13 = vcmp.eq.s32.totalorder %v8630_v6, %v8566_v48 }
 0x249   : > { %v2582_v16 = vsel %vm8634_vm13, %v8565_v7, 0.0  ;;  %vm8635_vm1 = vcmp.eq.s32.totalorder %v8630_v6, %v8568_v62  ;;  %v3488_v60 = vadd.f32 %v3487_v30, %v3430_v3  ;;  %vm8636_vm6 = vcmp.eq.s32.totalorder %v8630_v6, %v8570_v31  ;;  %3625 = vperm.xlu1 %4080, %v8639_v58   ;;  %4082 = vset.pattern.permute.xlu0 %v8503_v55 }
 0x24a   : > { %v2927_v50 = vsel %vm8635_vm1, %v6858_v4, 0.0  ;;  %v2928_v32 = vsel %vm8636_vm6, %v6878_v38, 0.0  ;;  %vm8637_vm4 = vcmp.eq.s32.totalorder %v8630_v6, %v8572_v36  ;;  %vm8638_vm5 = vcmp.eq.s32.totalorder %v8630_v6, %v8574_v29 }
 0x24b   : > { %v2929_v23 = vsel %vm8637_vm4, %v6883_v49, 0.0  ;;  %v2930_v17 = vsel %vm8638_vm5, %v6889_v33, 0.0  ;;  %v2959_v5 = vadd.f32 %v2927_v50, %v2579_v61  ;;  %v2960_v8 = vadd.f32 %v2928_v32, %v2580_v39 }
 0x24c   : > { %v2961_v30 = vadd.f32 %v2929_v23, %v2581_v2  ;;  %v2962_v21 = vadd.f32 %v2930_v17, %v2582_v16  ;;  %vm3231_vm8 = vcmp.eq.s32.totalorder %v8630_v6, %v6927_v9  ;;  %vm3232_vm3 = vcmp.eq.s32.totalorder %v8630_v6, %v6934_v1  ;;  %v3502_v2 = vpop.permute.xlu0 %3501  ;;  %v3398_v23 = vpop.permute.xlu1 %3397 }
 0x24d   : > { %vm3233_vm12 = vcmp.eq.s32.totalorder %v8630_v6, %v6939_v35  ;;  %vm3234_vm9 = vcmp.eq.s32.totalorder %v8630_v6, %v6942_v26  ;;  %v3275_v52 = vsel %vm3231_vm8, %v8608_v28, 0.0  ;;  %v3276_v54 = vsel %vm3232_vm3, %v8609_v56, 0.0  ;;  %v8640_v6 = vld [vmem:[#allocation28_spill] sm:$0xff] }
 0x24e   : > { %v3277_v27 = vsel %vm3233_vm12, %v6995_v14, 0.0  ;;  %v3278_v59 = vsel %vm3234_vm9, %v7010_v44, 0.0  ;;  %v7549_v46 = vadd.f32 %v3275_v52, %v2959_v5  ;;  %v7551_v61 = vadd.f32 %v3276_v54, %v2960_v8  ;;  %3640 = vperm.xlu1 %4080, %v8640_v6   ;;  %v8642_v6 = vld [vmem:[#allocation41_spill] sm:$0xff] }
 0x24f   : > { %v7553_v3 = vadd.f32 %v3277_v27, %v2961_v30  ;;  %v7555_v39 = vadd.f32 %v3278_v59, %v2962_v21  ;;  %v3539_v55 = vmul.f32 %v3502_v2, %v7178_v15  ;;  %v3540_v16 = vmul.f32 %v3502_v2, %v7187_v51  ;;  %v8641_v59 = vld [vmem:[#allocation40_spill] sm:$0xff] }
 0x250   : > { %v3541_v50 = vmul.f32 %v3502_v2, %v7189_v25  ;;  %v3542_v32 = vmul.f32 %v3502_v2, %v7193_v13  ;;  %v3326_v17 = vadd.f32 %v3325_v10, %v7549_v46  ;;  %v3339_v58 = vadd.f32 %v3338_v43, %v7551_v61  ;;  %v8643_v13 = vld [vmem:[#allocation42_spill] sm:$0xff]  ;;  %v8644_v25 = vld [vmem:[#allocation29_spill] sm:$0xff] }
 0x251   : > { %v3352_v5 = vadd.f32 %v3351_v18, %v7553_v3  ;;  %v3365_v8 = vadd.f32 %v3364_v41, %v7555_v39  ;;  %v3431_v30 = vmul.f32 %v3398_v23, %v7549_v46  ;;  %v3432_v21 = vmul.f32 %v3398_v23, %v7551_v61 }
 0x252   : > { %v3433_v52 = vmul.f32 %v3398_v23, %v7553_v3  ;;  %v3434_v54 = vmul.f32 %v3398_v23, %v7555_v39  ;;  %v3571_v27 = vadd.f32 %v7314_v57, %v3539_v55  ;;  %v3584_v2 = vadd.f32 %v8641_v59, %v3540_v16  ;;  %3645 = vperm.xlu1 %4080, %v8644_v25   ;;  %v8645_v23 = vld [vmem:[#allocation57_spill] sm:$0xff] }
 0x253   : > { %v3597_v10 = vadd.f32 %v8642_v6, %v3541_v50  ;;  %v3610_v43 = vadd.f32 %v8643_v13, %v3542_v32  ;;  %v7575_v18 = vadd.f32 %v3449_v0, %v3431_v30  ;;  %v7577_v41 = vadd.f32 %v3462_v19, %v3432_v21  ;;  %v8654_v21 = vld [vmem:[#allocation30_spill] sm:$0xff] }
 0x254   : > { %v7579_v51 = vadd.f32 %v3475_v40, %v3433_v52  ;;  %v7581_v15 = vadd.f32 %v3488_v60, %v3434_v54  ;;  %vm8646_vm2 = vcmp.eq.s32.totalorder %v8645_v23, %v8557_v22  ;;  %vm8647_vm10 = vcmp.eq.s32.totalorder %v8645_v23, %v8560_v63 }
 0x255   : > { %v2583_v57 = vsel %vm8646_vm2, %v8556_v42, 0.0  ;;  %v2584_v13 = vsel %vm8647_vm10, %v8559_v45, 0.0  ;;  %vm8648_vm15 = vcmp.eq.s32.totalorder %v8645_v23, %v8563_v47  ;;  %vm8649_vm11 = vcmp.eq.s32.totalorder %v8645_v23, %v8566_v48 }
 0x256   : > { %v2585_v25 = vsel %vm8648_vm15, %v8562_v24, 0.0  ;;  %v2586_v0 = vsel %vm8649_vm11, %v8565_v7, 0.0  ;;  %vm8650_vm14 = vcmp.eq.s32.totalorder %v8645_v23, %v8568_v62  ;;  %vm8651_vm0 = vcmp.eq.s32.totalorder %v8645_v23, %v8570_v31  ;;  %3650 = vperm.xlu1 %4080, %v8654_v21   ;;  %v8655_v21 = vld [vmem:[#allocation32_spill] sm:$0xff] }
 0x257   : > { %v2931_v19 = vsel %vm8650_vm14, %v6858_v4, 0.0  ;;  %v2932_v40 = vsel %vm8651_vm0, %v6878_v38, 0.0  ;;  %vm8652_vm7 = vcmp.eq.s32.totalorder %v8645_v23, %v8572_v36  ;;  %vm8653_vm13 = vcmp.eq.s32.totalorder %v8645_v23, %v8574_v29 }
 0x258   : > { %v2933_v60 = vsel %vm8652_vm7, %v6883_v49, 0.0  ;;  %v2934_v55 = vsel %vm8653_vm13, %v6889_v33, 0.0  ;;  %v2963_v16 = vadd.f32 %v2931_v19, %v2583_v57  ;;  %v2964_v50 = vadd.f32 %v2932_v40, %v2584_v13  ;;  %v3517_v19 = vpop.permute.xlu0 %3516 }
 0x259   : > { %v2965_v32 = vadd.f32 %v2933_v60, %v2585_v25  ;;  %v2966_v30 = vadd.f32 %v2934_v55, %v2586_v0  ;;  %vm3235_vm1 = vcmp.eq.s32.totalorder %v8645_v23, %v6927_v9  ;;  %vm3236_vm6 = vcmp.eq.s32.totalorder %v8645_v23, %v6934_v1 }
 0x25a   : > { %vm3237_vm4 = vcmp.eq.s32.totalorder %v8645_v23, %v6939_v35  ;;  %vm3238_vm5 = vcmp.eq.s32.totalorder %v8645_v23, %v6942_v26  ;;  %v3279_v52 = vsel %vm3235_vm1, %v8608_v28, 0.0  ;;  %v3280_v54 = vsel %vm3236_vm6, %v8609_v56, 0.0  ;;  %3660 = vperm.xlu1 %4080, %v8655_v21  }
 0x25b   : > { %v3281_v59 = vsel %vm3237_vm4, %v6995_v14, 0.0  ;;  %v3282_v6 = vsel %vm3238_vm5, %v7010_v44, 0.0  ;;  %v7628_v57 = vadd.f32 %v3279_v52, %v2963_v16  ;;  %v7630_v13 = vadd.f32 %v3280_v54, %v2964_v50  ;;  %v8656_v52 = vld [vmem:[#allocation47_spill] sm:$0xff] }
 0x25c   : > { %v7632_v25 = vadd.f32 %v3281_v59, %v2965_v32  ;;  %v7634_v0 = vadd.f32 %v3282_v6, %v2966_v30  ;;  %v3551_v40 = vmul.f32 %v3517_v19, %v7485_v34  ;;  %v3552_v23 = vmul.f32 %v3517_v19, %v7487_v53  ;;  %v8657_v53 = vld [vmem:[#allocation48_spill] sm:$0xff] }
 0x25d   : > { %v3553_v60 = vmul.f32 %v3517_v19, %v7491_v37  ;;  %v3554_v55 = vmul.f32 %v3517_v19, %v7493_v11  ;;  %v3327_v16 = vadd.f32 %v3326_v17, %v7628_v57  ;;  %v3340_v50 = vadd.f32 %v3339_v58, %v7630_v13  ;;  %v8658_v19 = vld [vmem:[#allocation58_spill] sm:$0xff] }
 0x25e   : > { %v3353_v32 = vadd.f32 %v3352_v5, %v7632_v25  ;;  %v3366_v30 = vadd.f32 %v3365_v8, %v7634_v0  ;;  %v3572_v54 = vadd.f32 %v3571_v27, %v8656_v52  ;;  %v3585_v59 = vadd.f32 %v3584_v2, %v7427_v20 }
 0x25f   : > { %v3598_v6 = vadd.f32 %v3597_v10, %v7430_v12  ;;  %v3611_v37 = vadd.f32 %v3610_v43, %v8657_v53  ;;  %vm8659_vm8 = vcmp.eq.s32.totalorder %v8658_v19, %v8557_v22  ;;  %vm8660_vm3 = vcmp.eq.s32.totalorder %v8658_v19, %v8560_v63 }
 0x260   : > { %v2587_v21 = vsel %vm8659_vm8, %v8556_v42, 0.0  ;;  %v2588_v17 = vsel %vm8660_vm3, %v8559_v45, 0.0  ;;  %vm8661_vm12 = vcmp.eq.s32.totalorder %v8658_v19, %v8563_v47  ;;  %vm8662_vm9 = vcmp.eq.s32.totalorder %v8658_v19, %v8566_v48 }
 0x261   : > { %v2589_v58 = vsel %vm8661_vm12, %v8562_v24, 0.0  ;;  %v2590_v20 = vsel %vm8662_vm9, %v8565_v7, 0.0  ;;  %v3573_v12 = vadd.f32 %v3572_v54, %v3551_v40  ;;  %v3586_v53 = vadd.f32 %v3585_v59, %v3552_v23 }
 0x262   : > { %v3599_v5 = vadd.f32 %v3598_v6, %v3553_v60  ;;  %v3612_v22 = vadd.f32 %v3611_v37, %v3554_v55  ;;  %vm8663_vm2 = vcmp.eq.s32.totalorder %v8658_v19, %v8568_v62  ;;  %vm8664_vm10 = vcmp.eq.s32.totalorder %v8658_v19, %v8570_v31  ;;  %v3522_v55 = vpop.permute.xlu0 %3521 }
 0x263   : > { %v2935_v42 = vsel %vm8663_vm2, %v6858_v4, 0.0  ;;  %v2936_v45 = vsel %vm8664_vm10, %v6878_v38, 0.0  ;;  %vm8665_vm15 = vcmp.eq.s32.totalorder %v8658_v19, %v8572_v36  ;;  %vm8666_vm11 = vcmp.eq.s32.totalorder %v8658_v19, %v8574_v29 }
 0x264   : > { %v2937_v63 = vsel %vm8665_vm15, %v6883_v49, 0.0  ;;  %v2938_v24 = vsel %vm8666_vm11, %v6889_v33, 0.0  ;;  %v2967_v47 = vadd.f32 %v2935_v42, %v2587_v21  ;;  %v2968_v7 = vadd.f32 %v2936_v45, %v2588_v17 }
 0x265   : > { %v2969_v48 = vadd.f32 %v2937_v63, %v2589_v58  ;;  %v2970_v37 = vadd.f32 %v2938_v24, %v2590_v20  ;;  %vm3239_vm14 = vcmp.eq.s32.totalorder %v8658_v19, %v6927_v9  ;;  %vm3240_vm0 = vcmp.eq.s32.totalorder %v8658_v19, %v6934_v1  ;;  %v8667_v24 = vld [vmem:[#allocation60_spill] sm:$0xff] }
 0x266   : > { %vm3241_vm7 = vcmp.eq.s32.totalorder %v8658_v19, %v6939_v35  ;;  %vm3242_vm13 = vcmp.eq.s32.totalorder %v8658_v19, %v6942_v26  ;;  %v3283_v8 = vsel %vm3239_vm14, %v8608_v28, 0.0  ;;  %v3284_v27 = vsel %vm3240_vm0, %v8609_v56, 0.0 }
 0x267   : > { %v3285_v2 = vsel %vm3241_vm7, %v6995_v14, 0.0  ;;  %v3286_v10 = vsel %vm3242_vm13, %v7010_v44, 0.0  ;;  %v7693_v43 = vadd.f32 %v3283_v8, %v2967_v47  ;;  %v7695_v40 = vadd.f32 %v3284_v27, %v2968_v7 }
 0x268   : > { %v7697_v23 = vadd.f32 %v3285_v2, %v2969_v48  ;;  %v7699_v60 = vadd.f32 %v3286_v10, %v2970_v37  ;;  %v3555_v52 = vmul.f32 %v3522_v55, %v7549_v46  ;;  %v3556_v54 = vmul.f32 %v3522_v55, %v7551_v61 }
 0x269   : > { %v3557_v59 = vmul.f32 %v3522_v55, %v7553_v3  ;;  %v3558_v6 = vmul.f32 %v3522_v55, %v7555_v39  ;;  %v3328_v19 = vadd.f32 %v3327_v16, %v7693_v43  ;;  %v3341_v21 = vadd.f32 %v3340_v50, %v7695_v40 }
 0x26a   : > { %v3354_v17 = vadd.f32 %v3353_v32, %v7697_v23  ;;  %v3367_v58 = vadd.f32 %v3366_v30, %v7699_v60  ;;  %v3574_v20 = vadd.f32 %v3573_v12, %v3555_v52  ;;  %v3587_v42 = vadd.f32 %v3586_v53, %v3556_v54  ;;  %v8672_v30 = vld [vmem:[#allocation71_spill] sm:$0xff]  ;;  %v8673_v53 = vld [vmem:[#allocation72_spill] sm:$0xff] }
 0x26b   : > { %v3600_v45 = vadd.f32 %v3599_v5, %v3557_v59  ;;  %v3613_v63 = vadd.f32 %v3612_v22, %v3558_v6  ;;  %vm8668_vm1 = vcmp.eq.s32.totalorder %v8667_v24, %v8568_v62  ;;  %vm8669_vm6 = vcmp.eq.s32.totalorder %v8667_v24, %v8570_v31  ;;  %v8675_v22 = vld [vmem:[#allocation74_spill] sm:$0xff] }
 0x26c   : > { %v2939_v47 = vsel %vm8668_vm1, %v6858_v4, 0.0  ;;  %v2940_v16 = vsel %vm8669_vm6, %v6878_v38, 0.0  ;;  %vm8670_vm4 = vcmp.eq.s32.totalorder %v8667_v24, %v8572_v36  ;;  %vm8671_vm5 = vcmp.eq.s32.totalorder %v8667_v24, %v8574_v29  ;;  %v8674_v4 = vld [vmem:[#allocation73_spill] sm:$0xff] }
 0x26d   : > { %v2941_v50 = vsel %vm8670_vm4, %v6883_v49, 0.0  ;;  %v2942_v32 = vsel %vm8671_vm5, %v6889_v33, 0.0  ;;  %v2971_v12 = vadd.f32 %v2939_v47, %v8672_v30  ;;  %v2972_v62 = vadd.f32 %v2940_v16, %v8673_v53 }
 0x26e   : > { %v2973_v5 = vadd.f32 %v2941_v50, %v8674_v4  ;;  %v2974_v7 = vadd.f32 %v2942_v32, %v8675_v22  ;;  %vm3243_vm8 = vcmp.eq.s32.totalorder %v8667_v24, %v6927_v9  ;;  %vm3244_vm3 = vcmp.eq.s32.totalorder %v8667_v24, %v6934_v1 }
 0x26f   : > { %vm3245_vm12 = vcmp.eq.s32.totalorder %v8667_v24, %v6939_v35  ;;  %vm3246_vm9 = vcmp.eq.s32.totalorder %v8667_v24, %v6942_v26  ;;  %v3287_v38 = vsel %vm3243_vm8, %v8608_v28, 0.0  ;;  %v3288_v49 = vsel %vm3244_vm3, %v8609_v56, 0.0 }
 0x270   : > { %v3289_v33 = vsel %vm3245_vm12, %v6995_v14, 0.0  ;;  %v3290_v31 = vsel %vm3246_vm9, %v7010_v44, 0.0  ;;  %v7741_v36 = vadd.f32 %v3287_v38, %v2971_v12  ;;  %v7743_v9 = vadd.f32 %v3288_v49, %v2972_v62 }
 0x271   : > { %v7745_v29 = vadd.f32 %v3289_v33, %v2973_v5  ;;  %v7747_v1 = vadd.f32 %v3290_v31, %v2974_v7  ;;  %vm3747_vm2 = vcmask 1040384   ;;  %vm3752_vm10 = vcmask 1041408  }
 0x272   : > { %v3329_v35 = vadd.f32 %v3328_v19, %v7741_v36  ;;  %v3342_v26 = vadd.f32 %v3341_v21, %v7743_v9 }
 0x273   : > { %v3355_v28 = vadd.f32 %v3354_v17, %v7745_v29  ;;  %v3368_v56 = vadd.f32 %v3367_v58, %v7747_v1 }
 0x274   : > { %v3330_v47 = vrot.slane %v3329_v35, 4  ;;  %v3343_v50 = vrot.slane %v3342_v26, 4 }
 0x275   : > { %v3356_v32 = vrot.slane %v3355_v28, 4  ;;  %v3369_v30 = vrot.slane %v3368_v56, 4 }
 0x276   : > { %v3331_v16 = vadd.f32 %v3330_v47, %v3329_v35  ;;  %v3344_v53 = vadd.f32 %v3343_v50, %v3342_v26 }
 0x277   : > { %v3357_v62 = vadd.f32 %v3356_v32, %v3355_v28 }
 0x278   : > { %v3332_v12 = vrot.slane %v3331_v16, 2 }
 0x279   : > { %v3358_v4 = vrot.slane %v3357_v62, 2 }
 0x281   : > { %v3527_v48 = vpop.permute.xlu1 %3526 }
 0x282   : > { %v3559_v14 = vmul.f32 %v3527_v48, %v7628_v57  ;;  %v3560_v44 = vmul.f32 %v3527_v48, %v7630_v13  ;;  %v3561_v37 = vmul.f32 %v3527_v48, %v7632_v25  ;;  %v3562_v8 = vmul.f32 %v3527_v48, %v7634_v0  ;;  %v3403_v27 = vpop.permute.xlu0 %3402 }
 0x283   : > { %v3435_v2 = vmul.f32 %v3403_v27, %v7628_v57  ;;  %v3436_v10 = vmul.f32 %v3403_v27, %v7630_v13  ;;  %v3437_v55 = vmul.f32 %v3403_v27, %v7632_v25  ;;  %v3438_v52 = vmul.f32 %v3403_v27, %v7634_v0 }
 0x284   : > { %v3575_v54 = vadd.f32 %v3574_v20, %v3559_v14  ;;  %v3588_v59 = vadd.f32 %v3587_v42, %v3560_v44  ;;  %v3601_v6 = vadd.f32 %v3600_v45, %v3561_v37  ;;  %v3614_v19 = vadd.f32 %v3613_v63, %v3562_v8 }
 0x285   : > { %v3451_v21 = vadd.f32 %v7575_v18, %v3435_v2  ;;  %v3464_v17 = vadd.f32 %v7577_v41, %v3436_v10  ;;  %v3477_v58 = vadd.f32 %v7579_v51, %v3437_v55  ;;  %v3490_v24 = vadd.f32 %v7581_v15, %v3438_v52 }
 0x286   : > { %v3370_v20 = vadd.f32 %v3369_v30, %v3368_v56  ;;  %v3333_v45 = vadd.f32 %v3332_v12, %v3331_v16  ;;  %v3345_v63 = vrot.slane %v3344_v53, 2  ;;  %v3359_v27 = vadd.f32 %v3358_v4, %v3357_v62  ;;  %v8679_v12 = vld [vmem:[#allocation39_spill] sm:$0xff] }
 0x287   : > { %v8680_v62 = vld [vmem:[#allocation43_spill] sm:$0xff] }
 0x288   : > { %v3371_v18 = vrot.slane %v3370_v20, 2  ;;  %v3346_v8 = vadd.f32 %v3345_v63, %v3344_v53  ;;  %v3334_v10 = vrot.slane %v3333_v45, 1  ;;  %v3360_v52 = vrot.slane %v3359_v27, 1  ;;  %v8682_v63 = vld [vmem:[#allocation45_spill] sm:$0xff] }
 0x28a   : > { %v3372_v2 = vadd.f32 %v3371_v18, %v3370_v20  ;;  %v3347_v55 = vrot.slane %v3346_v8, 1  ;;  %v3335_v50 = vadd.f32 %v3334_v10, %v3333_v45  ;;  %v3361_v30 = vadd.f32 %v3360_v52, %v3359_v27  ;;  %v8683_v18 = vld [vmem:[#allocation46_spill] sm:$0xff] }
 0x28c   : > { %v3373_v16 = vrot.slane %v3372_v2, 1  ;;  %v3348_v32 = vadd.f32 %v3347_v55, %v3346_v8  ;;  %4139 = vrcp.f32 %v3335_v50 }
 0x28e   : > { %4141 = vrcp.f32 %v3348_v32 }
 0x28f   : > { %4143 = vrcp.f32 %v3361_v30 }
 0x296   : > { %v7801_v52 = vpop.eup %4139 }
 0x2a8   : > { %v3532_v42 = vpop.permute.xlu1 %3531 }
 0x2a9   : > { %v3408_v5 = vpop.permute.xlu0 %3407  ;;  %v3563_v41 = vmul.f32 %v3532_v42, %v7693_v43  ;;  %v3564_v51 = vmul.f32 %v3532_v42, %v7695_v40  ;;  %v3565_v15 = vmul.f32 %v3532_v42, %v7697_v23  ;;  %v3566_v22 = vmul.f32 %v3532_v42, %v7699_v60  ;;  %v8681_v42 = vld [vmem:[#allocation44_spill] sm:$0xff] }
 0x2aa   : > { %v3439_v7 = vmul.f32 %v3408_v5, %v7693_v43  ;;  %v3440_v38 = vmul.f32 %v3408_v5, %v7695_v40  ;;  %v3441_v49 = vmul.f32 %v3408_v5, %v7697_v23  ;;  %v3442_v33 = vmul.f32 %v3408_v5, %v7699_v60 }
 0x2ab   : > { %v3576_v31 = vadd.f32 %v3575_v54, %v3563_v41  ;;  %v3589_v35 = vadd.f32 %v3588_v59, %v3564_v51  ;;  %v3602_v26 = vadd.f32 %v3601_v6, %v3565_v15  ;;  %v3615_v28 = vadd.f32 %v3614_v19, %v3566_v22  ;;  %v8676_v6 = vld [vmem:[#allocation36_spill] sm:$0xff] }
 0x2ac   : > { %v3452_v56 = vadd.f32 %v3451_v21, %v3439_v7  ;;  %v3465_v48 = vadd.f32 %v3464_v17, %v3440_v38  ;;  %v3478_v14 = vadd.f32 %v3477_v58, %v3441_v49  ;;  %v3491_v44 = vadd.f32 %v3490_v24, %v3442_v33  ;;  %v8677_v21 = vld [vmem:[#allocation37_spill] sm:$0xff]  ;;  %v8678_v58 = vld [vmem:[#allocation38_spill] sm:$0xff] }
 0x2ad   : > { %v3631_v37 = vpop.permute.xlu0 %3630  ;;  %v3374_v54 = vadd.f32 %v3373_v16, %v3372_v2 }
 0x2ae   : > { %v3667_v19 = vmul.f32 %v3631_v37, %v8676_v6  ;;  %v3668_v17 = vmul.f32 %v3631_v37, %v8677_v21  ;;  %v3669_v24 = vmul.f32 %v3631_v37, %v8678_v58  ;;  %v3670_v53 = vmul.f32 %v3631_v37, %v8679_v12  ;;  %v8685_v21 = vld [vmem:[#allocation33_spill] sm:$0xff] }
 0x2af   : > { %4145 = vrcp.f32 %v3374_v54  ;;  %v7811_v54 = vpop.eup %4141 }
 0x2b0   : > { %v7817_v12 = vpop.eup %4143 }
 0x2b1   : > { %v3636_v47 = vpop.permute.xlu0 %3635 }
 0x2b2   : > { %v3671_v20 = vmul.f32 %v3636_v47, %v8680_v62  ;;  %v3672_v45 = vmul.f32 %v3636_v47, %v8681_v42  ;;  %v3673_v4 = vmul.f32 %v3636_v47, %v8682_v63  ;;  %v3674_v5 = vmul.f32 %v3636_v47, %v8683_v18 }
 0x2b5   : > { %v3656_v59 = vpop.permute.xlu0 %3655 }
 0x2b6   : > { %v7782_v51 = vmul.f32 %v3656_v59, %v7693_v43  ;;  %v7785_v15 = vmul.f32 %v3656_v59, %v7695_v40  ;;  %v7788_v22 = vmul.f32 %v3656_v59, %v7697_v23  ;;  %v7791_v7 = vmul.f32 %v3656_v59, %v7699_v60  ;;  %v8684_v59 = vld [vmem:[#allocation31_spill] sm:$0xff] }
 0x2c4   : > { %v3413_v41 = vpop.permute.xlu1 %3412  ;;  %v3537_v38 = vpop.permute.xlu0 %3536 }
 0x2c5   : > { %v3443_v49 = vmul.f32 %v3413_v41, %v7741_v36  ;;  %v3444_v33 = vmul.f32 %v3413_v41, %v7743_v9  ;;  %v3445_v37 = vmul.f32 %v3413_v41, %v7745_v29  ;;  %v3446_v8 = vmul.f32 %v3413_v41, %v7747_v1 }
 0x2c6   : > { %v3567_v43 = vmul.f32 %v3537_v38, %v7741_v36  ;;  %v3568_v40 = vmul.f32 %v3537_v38, %v7743_v9  ;;  %v3569_v27 = vmul.f32 %v3537_v38, %v7745_v29  ;;  %v3570_v23 = vmul.f32 %v3537_v38, %v7747_v1 }
 0x2c7   : > { %v3453_v2 = vadd.f32 %v3452_v56, %v3443_v49  ;;  %v3466_v60 = vadd.f32 %v3465_v48, %v3444_v33  ;;  %v3479_v10 = vadd.f32 %v3478_v14, %v3445_v37  ;;  %v3492_v55 = vadd.f32 %v3491_v44, %v3446_v8  ;;  %v8686_v48 = vld [vmem:[#allocation34_spill] sm:$0xff]  ;;  %v8687_v44 = vld [vmem:[#allocation35_spill] sm:$0xff] }
 0x2c8   : > { %v3626_v47 = vpop.permute.xlu1 %3625  ;;  %v7803_v16 = vadd.f32 %v3576_v31, %v3567_v43  ;;  %v7805_v50 = vadd.f32 %v3589_v35, %v3568_v40  ;;  %v7807_v32 = vadd.f32 %v3602_v26, %v3569_v27  ;;  %v7809_v30 = vadd.f32 %v3615_v28, %v3570_v23  ;;  %v7819_v26 = vpop.eup %4145  ;;  %v8688_v40 = vld [vmem:[#allocation49_spill] sm:$0xff] }
 0x2c9   : > { %v3663_v6 = vmul.f32 %v3626_v47, %v8684_v59  ;;  %v3664_v56 = vmul.f32 %v3626_v47, %v8685_v21  ;;  %v3665_v14 = vmul.f32 %v3626_v47, %v8686_v48  ;;  %v3666_v58 = vmul.f32 %v3626_v47, %v8687_v44  ;;  %v8689_v23 = vld [vmem:[#allocation21_spill] sm:$0xff] }
 0x2ca   : > { %v3454_v31 = vrot.slane %v3453_v2, 4  ;;  %v3467_v62 = vrot.slane %v3466_v60, 4  ;;  %v3480_v35 = vrot.slane %v3479_v10, 4  ;;  %v3493_v42 = vrot.slane %v3492_v55, 4 }
 0x2cb   : > { %v3695_v28 = vadd.f32 %v3667_v19, %v3663_v6  ;;  %v3708_v63 = vadd.f32 %v3668_v17, %v3664_v56  ;;  %v3721_v18 = vadd.f32 %v3669_v24, %v3665_v14  ;;  %v3734_v41 = vadd.f32 %v3670_v53, %v3666_v58 }
 0x2cc   : > { %v3455_v38 = vadd.f32 %v3454_v31, %v3453_v2  ;;  %v3468_v49 = vadd.f32 %v3467_v62, %v3466_v60  ;;  %v3481_v33 = vadd.f32 %v3480_v35, %v3479_v10  ;;  %v3494_v37 = vadd.f32 %v3493_v42, %v3492_v55 }
 0x2cd   : > { %v3641_v8 = vpop.permute.xlu1 %3640  ;;  %v3696_v17 = vadd.f32 %v3695_v28, %v3671_v20  ;;  %v3709_v24 = vadd.f32 %v3708_v63, %v3672_v45  ;;  %v3722_v53 = vadd.f32 %v3721_v18, %v3673_v4  ;;  %v3735_v2 = vadd.f32 %v3734_v41, %v3674_v5 }
 0x2ce   : > { %v3675_v43 = vmul.f32 %v3641_v8, %v7485_v34  ;;  %v3676_v27 = vmul.f32 %v3641_v8, %v8688_v40  ;;  %v3677_v47 = vmul.f32 %v3641_v8, %v8689_v23  ;;  %v3678_v59 = vmul.f32 %v3641_v8, %v7493_v11 }
 0x2cf   : > { %v3456_v21 = vrot.slane %v3455_v38, 2  ;;  %v3469_v48 = vrot.slane %v3468_v49, 2  ;;  %v3482_v44 = vrot.slane %v3481_v33, 2  ;;  %v3495_v19 = vrot.slane %v3494_v37, 2 }
 0x2d0   : > { %v3697_v45 = vadd.f32 %v3696_v17, %v3675_v43  ;;  %v3710_v4 = vadd.f32 %v3709_v24, %v3676_v27  ;;  %v3723_v5 = vadd.f32 %v3722_v53, %v3677_v47  ;;  %v3736_v42 = vadd.f32 %v3735_v2, %v3678_v59 }
 0x2d1   : > { %v3457_v60 = vadd.f32 %v3456_v21, %v3455_v38  ;;  %v3470_v10 = vadd.f32 %v3469_v48, %v3468_v49  ;;  %v3483_v55 = vadd.f32 %v3482_v44, %v3481_v33  ;;  %v3496_v6 = vadd.f32 %v3495_v19, %v3494_v37  ;;  %v3646_v56 = vpop.permute.xlu1 %3645 }
 0x2d2   : > { %v3679_v34 = vmul.f32 %v3646_v56, %v7549_v46  ;;  %v3680_v14 = vmul.f32 %v3646_v56, %v7551_v61  ;;  %v3681_v58 = vmul.f32 %v3646_v56, %v7553_v3  ;;  %v3682_v11 = vmul.f32 %v3646_v56, %v7555_v39 }
 0x2d3   : > { %v3458_v31 = vrot.slane %v3457_v60, 1  ;;  %v3471_v62 = vrot.slane %v3470_v10, 1  ;;  %v3484_v35 = vrot.slane %v3483_v55, 1  ;;  %v3497_v20 = vrot.slane %v3496_v6, 1 }
 0x2d4   : > { %v3698_v49 = vadd.f32 %v3697_v45, %v3679_v34  ;;  %v3711_v33 = vadd.f32 %v3710_v4, %v3680_v14  ;;  %v3724_v37 = vadd.f32 %v3723_v5, %v3681_v58  ;;  %v3737_v8 = vadd.f32 %v3736_v42, %v3682_v11 }
 0x2d5   : > { %v7829_v28 = vadd.f32 %v3458_v31, %v3457_v60  ;;  %v7831_v63 = vadd.f32 %v3471_v62, %v3470_v10  ;;  %v7833_v18 = vadd.f32 %v3484_v35, %v3483_v55  ;;  %v7835_v46 = vadd.f32 %v3497_v20, %v3496_v6  ;;  %v3651_v61 = vpop.permute.xlu1 %3650 }
 0x2d6   : > { %v3683_v3 = vmul.f32 %v3651_v61, %v7628_v57  ;;  %v3684_v39 = vmul.f32 %v3651_v61, %v7630_v13  ;;  %v3685_v41 = vmul.f32 %v3651_v61, %v7632_v25  ;;  %v3686_v38 = vmul.f32 %v3651_v61, %v7634_v0 }
 0x2d7   : > { %v3578_v43 = vrot.slane %v7803_v16, 4  ;;  %v3591_v40 = vrot.slane %v7805_v50, 4  ;;  %v3604_v27 = vrot.slane %v7807_v32, 4  ;;  %v3617_v23 = vrot.slane %v7809_v30, 4 }
 0x2d8   : > { %v3699_v47 = vadd.f32 %v3698_v49, %v3683_v3  ;;  %v3712_v57 = vadd.f32 %v3711_v33, %v3684_v39  ;;  %v3725_v59 = vadd.f32 %v3724_v37, %v3685_v41  ;;  %v3738_v13 = vadd.f32 %v3737_v8, %v3686_v38 }
 0x2d9   : > { %v3661_v21 = vpop.permute.xlu1 %3660  ;;  %v3579_v2 = vadd.f32 %v3578_v43, %v7803_v16  ;;  %v3592_v60 = vadd.f32 %v3591_v40, %v7805_v50 }
 0x2da   : > { %v3691_v25 = vmul.f32 %v3661_v21, %v7741_v36  ;;  %v3692_v0 = vmul.f32 %v3661_v21, %v7743_v9  ;;  %v3693_v48 = vmul.f32 %v3661_v21, %v7745_v29  ;;  %v3694_v44 = vmul.f32 %v3661_v21, %v7747_v1 }
 0x2db   : > { %v3700_v19 = vadd.f32 %v3699_v47, %v7782_v51  ;;  %v3713_v17 = vadd.f32 %v3712_v57, %v7785_v15  ;;  %v3726_v24 = vadd.f32 %v3725_v59, %v7788_v22  ;;  %v3739_v53 = vadd.f32 %v3738_v13, %v7791_v7 }
 0x2dc   : > { %v3605_v36 = vadd.f32 %v3604_v27, %v7807_v32  ;;  %v3618_v9 = vadd.f32 %v3617_v23, %v7809_v30  ;;  %v3580_v51 = vrot.slane %v3579_v2, 2  ;;  %v3593_v6 = vrot.slane %v3592_v60, 2 }
 0x2dd   : > { %v3701_v29 = vadd.f32 %v3700_v19, %v3691_v25  ;;  %v3714_v10 = vadd.f32 %v3713_v17, %v3692_v0  ;;  %v3727_v1 = vadd.f32 %v3726_v24, %v3693_v48  ;;  %v3740_v55 = vadd.f32 %v3739_v53, %v3694_v44 }
 0x2de   : > { %v3606_v15 = vrot.slane %v3605_v36, 2  ;;  %v3619_v56 = vrot.slane %v3618_v9, 2  ;;  %v3581_v58 = vadd.f32 %v3580_v51, %v3579_v2  ;;  %v3594_v16 = vadd.f32 %v3593_v6, %v3592_v60 }
 0x2df   : > { %v3702_v22 = vrot.slane %v3701_v29, 4  ;;  %v3715_v34 = vrot.slane %v3714_v10, 4  ;;  %v3728_v7 = vrot.slane %v3727_v1, 4  ;;  %v3741_v14 = vrot.slane %v3740_v55, 4 }
 0x2e0   : > { %v3607_v11 = vadd.f32 %v3606_v15, %v3605_v36  ;;  %v3620_v50 = vadd.f32 %v3619_v56, %v3618_v9  ;;  %v3582_v35 = vrot.slane %v3581_v58, 1  ;;  %v3595_v20 = vrot.slane %v3594_v16, 1 }
 0x2e1   : > { %v3703_v31 = vadd.f32 %v3702_v22, %v3701_v29  ;;  %v3716_v32 = vadd.f32 %v3715_v34, %v3714_v10  ;;  %v3729_v62 = vadd.f32 %v3728_v7, %v3727_v1  ;;  %v3742_v30 = vadd.f32 %v3741_v14, %v3740_v55 }
 0x2e2   : > { %v3608_v45 = vrot.slane %v3607_v11, 1  ;;  %v3621_v4 = vrot.slane %v3620_v50, 1  ;;  %v3583_v39 = vadd.f32 %v3582_v35, %v3581_v58  ;;  %v3596_v41 = vadd.f32 %v3595_v20, %v3594_v16 }
 0x2e3   : > { %v3704_v5 = vrot.slane %v3703_v31, 2  ;;  %v3717_v42 = vrot.slane %v3716_v32, 2  ;;  %v3730_v61 = vrot.slane %v3729_v62, 2  ;;  %v3743_v3 = vrot.slane %v3742_v30, 2 }
 0x2e4   : > { %v3609_v38 = vadd.f32 %v3608_v45, %v3607_v11  ;;  %v3622_v49 = vadd.f32 %v3621_v4, %v3620_v50  ;;  %v3748_v40 = vsel %vm3747_vm2, %v7829_v28, %v3583_v39  ;;  %v3749_v27 = vsel %vm3747_vm2, %v7831_v63, %v3596_v41 }
 0x2e5   : > { %v3705_v33 = vadd.f32 %v3704_v5, %v3703_v31  ;;  %v3718_v37 = vadd.f32 %v3717_v42, %v3716_v32  ;;  %v3731_v8 = vadd.f32 %v3730_v61, %v3729_v62  ;;  %v3744_v43 = vadd.f32 %v3743_v3, %v3742_v30 }
 0x2e6   : > { %v3750_v23 = vsel %vm3747_vm2, %v7833_v18, %v3609_v38  ;;  %v3751_v47 = vsel %vm3747_vm2, %v7835_v46, %v3622_v49 }
 0x2e7   : > { %v3706_v57 = vrot.slane %v3705_v33, 1  ;;  %v3719_v59 = vrot.slane %v3718_v37, 1  ;;  %v3732_v13 = vrot.slane %v3731_v8, 1  ;;  %v3745_v21 = vrot.slane %v3744_v43, 1 }
 0x2e9   : > { %v3707_v25 = vadd.f32 %v3706_v57, %v3705_v33  ;;  %v3720_v0 = vadd.f32 %v3719_v59, %v3718_v37  ;;  %v3733_v48 = vadd.f32 %v3732_v13, %v3731_v8  ;;  %v3746_v44 = vadd.f32 %v3745_v21, %v3744_v43 }
 0x2eb   : > { %v3753_v28 = vsel %vm3752_vm10, %v3748_v40, %v3707_v25  ;;  %v3754_v19 = vsel %vm3752_vm10, %v3749_v27, %v3720_v0  ;;  %v3755_v17 = vsel %vm3752_vm10, %v3750_v23, %v3733_v48  ;;  %v3756_v63 = vsel %vm3752_vm10, %v3751_v47, %v3746_v44 }
 0x2ec   : > { %v3758_v24 = vmul.f32 %v7801_v52, %v3753_v28  ;;  %v3760_v18 = vmul.f32 %v7811_v54, %v3754_v19  ;;  %v3762_v46 = vmul.f32 %v7817_v12, %v3755_v17  ;;  %v3764_v53 = vmul.f32 %v7819_v26, %v3756_v63 }
 0x2ee   : > { %v3769_v2 = vcombine.low %v3758_v24, %v3760_v18  ;;  %v3770_v60 = vcombine.low %v3762_v46, %v3764_v53 }
 0x2f0   : > { %3773 = vst [vmem:[%s262_s16] sm:$0x77] %v3769_v2  ;;  %3774 = vst [vmem:[%s262_s16 + $0x8] sm:$0x77] %v3770_v60 }
 0x2f1 PF: > { %s16_s19 = sadd.s32 1, %s4231_s19   ;;  %s8690_s15 = smov %s4223_s17 }
 0x2f2   : > { %p13_p7 = scmp.ge.s32.totalorder %s16_s19, 6   ;;  %s8691_s16 = smov %s4227_s18 }
 0x2f3   : > { %s8692_s17 = smov %s8695_s21  ;;  %s8693_s18 = smov %s8699_s22 }
 0x2f4   :  { %15 = sbr.rel (!%p13_p7) target bundleno = 4 (0x4), region = 75 }
 0x2fb   :  { %3805 = vsyncpa [#allocation3], 1 }
 0x2fc   :  { %3807 = vsyncpa [#allocation3 + $0x1], 1 }
 0x2fd   :  { %3808 = vsyncpa [#allocation5], 1 }

</bundles_post_ra>
